<compile_context>
chip_gen: v7x
topology: tpu7x:2x2x1
jax: 0.10.0
libtpu: 0.0.40
codegen_flags: <defaults>
</compile_context>

<pallas_src>
import functools

import jax
import jax.numpy as jnp
from jax import lax
from jax.experimental import pallas as pl
from jax.experimental.pallas import tpu as pltpu


def _silu(z):
    # z * sigmoid(z).  The sigmoid denominator uses the EUP approx reciprocal
    # (separate issue slot, ~1e-3 rel error — inside this kernel's bf16-matmul
    # inference tolerance).  The softmax path below uses exact division.
    return z * pl.reciprocal(1.0 + jnp.exp(-z), approx=True)


WEIGHT_NAMES = ("w_cv1", "b_cv1", "w_qkv", "b_qkv", "w_pe", "b_pe",
                "w_proj", "b_proj", "w_ffn1", "b_ffn1", "w_ffn2", "b_ffn2",
                "w_cv2a", "w_cv2b", "b_cv2")

# Weights that feed MXU matmuls -> stored/DMA'd as bf16.  Biases and the
# depthwise pe tap table stay f32 (VPU-side adds/multiplies).
_MXU_WEIGHTS = frozenset({"w_cv1", "w_qkv", "w_proj", "w_ffn1", "w_ffn2",
                          "w_cv2a", "w_cv2b"})


def _c2psa_kernel(x_ref, xpos_ref,
                  w_cv1_ref, b_cv1_ref, w_qkv_ref, b_qkv_ref,
                  w_pe_ref, b_pe_ref, w_proj_ref, b_proj_ref,
                  w_ffn1_ref, b_ffn1_ref, w_ffn2_ref, b_ffn2_ref,
                  w_cv2a_ref, w_cv2b_ref, b_cv2_ref,
                  o_ref,
                  a_sc, bfeat_sc, q_sc, pe_sc,
                  *, H, W, c, num_heads, key_dim, head_dim, scale,
                  q_chunk, n_chunks, q_align):
    N = H * W
    nhkd = num_heads * key_dim
    x = x_ref[0]                                    # (N, C1) bf16 (bf16 DMA)

    def mm(lhs, w_ref, b_ref):
        # bf16 x bf16 MXU matmul, f32 accumulation, f32 bias add.
        lhs_bf = lhs if lhs.dtype == jnp.bfloat16 else lhs.astype(jnp.bfloat16)
        return (jnp.dot(lhs_bf, w_ref[...], preferred_element_type=jnp.float32)
                + b_ref[...])

    # ---- cv1 (1x1 conv + folded BN + SiLU): one 2c-lane-dense matmul -------
    y = _silu(mm(x, w_cv1_ref, b_cv1_ref))          # (N, 2c) f32
    a_sc[...] = y[:, :c].astype(jnp.bfloat16)       # 'a' half, only used as bf16
    bfeat = y[:, c:]                                # 'b' half, f32
    bfeat_sc[...] = bfeat                           # kept for the residual adds

    # ---- qkv 1x1 conv (+BN): one lane-dense matmul, columns [q | k | v] ----
    qkv = mm(bfeat, w_qkv_ref, b_qkv_ref)           # (N, 2*nh*kd + c) f32
    q_sc[...] = qkv[:, :nhkd].astype(jnp.bfloat16)  # sliced per q-chunk below
    k_bf = qkv[:, nhkd:2 * nhkd].astype(jnp.bfloat16)   # (N, nh*kd) bf16
    v_f32 = qkv[:, 2 * nhkd:]                           # (N, c) f32 (for pe)
    v_bf = v_f32.astype(jnp.bfloat16)                   # (N, c) bf16 (attn RHS)

    # ---- pe: depthwise 3x3 (+BN) via 9 masked sublane rolls (XLU slot) -----
    # Shape-agnostic boundary masks: y from a flat iota compare, x from the
    # precomputed (N, 1) int32 column-index input (no power-of-two W needed).
    w_pe = w_pe_ref[...]                            # (9, c), loaded once
    n_idx = lax.broadcasted_iota(jnp.int32, (N, 1), 0)
    xx = xpos_ref[...]                              # (N, 1) int32 : n % W
    y_mask = {-1: n_idx >= W, 0: None, 1: n_idx < (H - 1) * W}
    x_mask = {-1: xx >= 1, 0: None, 1: xx <= W - 2}
    pe_acc = jnp.zeros((N, c), jnp.float32)
    for ky in range(3):
        for kx in range(3):
            dy, dx = ky - 1, kx - 1
            off = dy * W + dx
            rolled = (pltpu.roll(v_f32, (-off) % N, 0) if off != 0 else v_f32)
            tap = rolled * w_pe[ky * 3 + kx:ky * 3 + kx + 1, :]   # (N,c)*(1,c)
            my, mx = y_mask[dy], x_mask[dx]
            if my is None and mx is None:
                pe_acc = pe_acc + tap
            else:
                m = my if mx is None else (mx if my is None else my & mx)
                pe_acc = pe_acc + jnp.where(m, tap, 0.0)
    pe_sc[...] = pe_acc + b_pe_ref[...]             # wrapped rows are masked

    # ---- attention + proj + ffn + cv2, fused per query-row chunk -----------
    def chunk_body(ci, carry):
        qs = ci * q_chunk
        if not isinstance(qs, int):
            qs = pl.multiple_of(qs, q_align)
        q_c = q_sc[pl.ds(qs, q_chunk), :]           # (qc, nh*kd) bf16

        outs = []
        for h in range(num_heads):                  # nh = c//64: tiny, static
            qh = q_c[:, h * key_dim:(h + 1) * key_dim]
            kh = k_bf[:, h * key_dim:(h + 1) * key_dim]
            vh = v_bf[:, h * head_dim:(h + 1) * head_dim]
            s = lax.dot_general(qh, kh, (((1,), (1,)), ((), ())),
                                preferred_element_type=jnp.float32) * scale
            s = s - jnp.max(s, axis=-1, keepdims=True)
            p = jnp.exp(s)
            p = p / jnp.sum(p, axis=-1, keepdims=True)   # exact normalization
            outs.append(jnp.dot(p.astype(jnp.bfloat16), vh,
                                preferred_element_type=jnp.float32))
        att_c = outs[0] if num_heads == 1 else jnp.concatenate(outs, axis=-1)
        x_att = att_c + pe_sc[pl.ds(qs, q_chunk), :]     # (qc, c) f32

        # proj (+BN) and attention shortcut.
        b2 = bfeat_sc[pl.ds(qs, q_chunk), :] + mm(x_att, w_proj_ref, b_proj_ref)
        # ffn (Conv+BN+SiLU, Conv+BN) and shortcut.
        h1 = _silu(mm(b2, w_ffn1_ref, b_ffn1_ref))
        b3 = b2 + mm(h1, w_ffn2_ref, b_ffn2_ref)
        # cv2 on concat(a, b3): split-weight form avoids an in-kernel concat.
        out_c = _silu(
            jnp.dot(a_sc[pl.ds(qs, q_chunk), :], w_cv2a_ref[...],
                    preferred_element_type=jnp.float32)
            + jnp.dot(b3.astype(jnp.bfloat16), w_cv2b_ref[...],
                      preferred_element_type=jnp.float32)
            + b_cv2_ref[...])
        o_ref[0, pl.ds(qs, q_chunk), :] = out_c.astype(o_ref.dtype)
        return carry

    if n_chunks == 1:
        chunk_body(0, 0)
    else:
        lax.fori_loop(0, n_chunks, chunk_body, 0)


def _pick_q_chunk(N):
    """Largest divisor of N <= 512 that is a multiple of 8 (review fix: no
    silent fallback to a full (N, N) score matrix)."""
    if N <= 512:
        return N
    for cand in range(512, 7, -1):
        if cand % 8 == 0 and N % cand == 0:
            return cand
    for cand in range(512, 0, -1):
        if N % cand == 0:
            return cand
    return N


def _vmem_cap_bytes():
    # Per-generation cap: ~3/4 of physical VMEM (v7x 64 MiB -> 48 MiB, v5e/v6e
    # 128 MiB -> 96 MiB), leaving headroom for compiler-internal scratch.
    try:
        info = pltpu.get_tpu_info()
        cap = int(getattr(info, "vmem_capacity_bytes", 0))
        if cap > 0:
            return (cap * 3) // 4
    except Exception:
        pass
    return 48 << 20        # conservative default, safe on every generation


def c2psa_forward(x_nchw, params, *, c, num_heads, key_dim, head_dim):
    B, C1, H, W = x_nchw.shape
    N = H * W
    # Activations are only ever consumed as bf16 MXU operands -> DMA bf16.
    x = (jnp.transpose(x_nchw, (0, 2, 3, 1)).reshape(B, N, C1)
         .astype(jnp.bfloat16))
    # Column index per flat pixel (shape-agnostic pe boundary masks).
    xpos = (jnp.arange(N, dtype=jnp.int32) % W).reshape(N, 1)

    q_chunk = _pick_q_chunk(N)
    n_chunks = N // q_chunk
    q_align = q_chunk & (-q_chunk)                  # pow-2 alignment hint
    nhkd = num_heads * key_dim

    kernel = functools.partial(
        _c2psa_kernel, H=H, W=W, c=c, num_heads=num_heads, key_dim=key_dim,
        head_dim=head_dim, scale=float(key_dim) ** -0.5,
        q_chunk=q_chunk, n_chunks=n_chunks, q_align=q_align)

    weights = [params[n].astype(jnp.bfloat16) if n in _MXU_WEIGHTS
               else params[n] for n in WEIGHT_NAMES]

    def _whole(arr):
        nd = arr.ndim
        # Constant index map -> fetched once; single-buffer to halve VMEM.
        return pl.BlockSpec(arr.shape, lambda i, _nd=nd: (0,) * _nd,
                            pipeline_mode=pl.Buffered(1))

    # ---- scoped-VMEM budget from the working set, per-generation cap -------
    f32, bf16 = 4, 2
    w_bytes = sum(int(w.size) * w.dtype.itemsize for w in weights)
    io_bytes = 2 * N * C1 * (f32 + bf16)                 # double-buffered x/out
    scratch_bytes = N * c * (bf16 + 2 * f32) + N * nhkd * bf16
    live_bytes = (N * (2 * nhkd + c) * f32               # qkv f32
                  + N * (nhkd + c) * bf16                 # k/v bf16
                  + 2 * N * c * f32                       # v f32 + pe accum
                  + 2 * q_chunk * N * f32                 # score + prob tile
                  + 8 * q_chunk * c * f32)                # per-chunk temps
    est = io_bytes + w_bytes + scratch_bytes + live_bytes + N * 4
    vmem_limit = int(min(_vmem_cap_bytes(), max(32 << 20, int(1.5 * est))))

    # ---- advisory cost estimate for the XLA scheduler -----------------------
    flops = (2 * N * (C1 * 2 * c + c * (2 * nhkd + c) + c * c + 4 * c * c
                      + 2 * c * C1)
             + 2 * N * N * num_heads * (key_dim + head_dim) + 18 * N * c)
    transcendentals = num_heads * N * N + N * (4 * c + C1)
    cost = pl.CostEstimate(
        flops=int(B * flops), transcendentals=int(B * transcendentals),
        bytes_accessed=int(B * N * C1 * (bf16 + f32) + w_bytes))

    out = pl.pallas_call(
        kernel,
        out_shape=jax.ShapeDtypeStruct((B, N, C1), jnp.float32),
        grid=(B,),
        in_specs=[pl.BlockSpec((1, N, C1), lambda i: (i, 0, 0)),
                  _whole(xpos)] + [_whole(w) for w in weights],
        out_specs=pl.BlockSpec((1, N, C1), lambda i: (i, 0, 0)),
        scratch_shapes=[pltpu.VMEM((N, c), jnp.bfloat16),      # a (cv2 lhs)
                        pltpu.VMEM((N, c), jnp.float32),       # bfeat (residual)
                        pltpu.VMEM((N, nhkd), jnp.bfloat16),   # q
                        pltpu.VMEM((N, c), jnp.float32)],      # pe(v)
        compiler_params=pltpu.CompilerParams(
            dimension_semantics=("parallel",),
            vmem_limit_bytes=vmem_limit),
        cost_estimate=cost,
    )(x, xpos, *weights)

    return jnp.transpose(out.reshape(B, H, W, C1), (0, 3, 1, 2))


def make_params(key, c1, e=0.5, attn_ratio=0.5):
    """Deterministic Conv+BN parameters, BN folded to per-channel scale/bias."""
    c = int(c1 * e)
    num_heads = c // 64
    assert num_heads >= 1, "C2PSA requires hidden channels >= 64 (c//64 heads)"
    head_dim = c // num_heads
    key_dim = int(head_dim * attn_ratio)
    per_head = 2 * key_dim + head_dim
    h_qkv = c + 2 * key_dim * num_heads
    eps = 1e-5

    def conv_bn(k, cin, cout, ksz=1, groups=1):
        kw, kg, kb, km, kv = jax.random.split(k, 5)
        w = 0.05 * jax.random.normal(kw, (cout, cin // groups, ksz, ksz),
                                     jnp.float32)
        gamma = 1.0 + 0.1 * jax.random.normal(kg, (cout,), jnp.float32)
        beta = 0.1 * jax.random.normal(kb, (cout,), jnp.float32)
        mean = 0.1 * jax.random.normal(km, (cout,), jnp.float32)
        var = 1.0 + 0.1 * jax.random.uniform(kv, (cout,), jnp.float32)
        s = gamma / jnp.sqrt(var + eps)
        return w * s[:, None, None, None], beta - mean * s

    keys = jax.random.split(key, 7)
    p = {}

    # cv1 : Conv(c1, 2c, 1)+BN+SiLU; columns [:c] = 'a' half, [c:] = 'b' half.
    w, b = conv_bn(keys[0], c1, 2 * c)
    p["w_cv1"] = w[:, :, 0, 0].T                     # (c1, 2c)
    p["b_cv1"] = b[None, :]

    # Attention.qkv : Conv(c, h, 1)+BN; columns reordered to [q | k | v],
    # each head-major, matching the PyTorch view/split channel layout.
    w, b = conv_bn(keys[1], c, h_qkv)
    w2d = w[:, :, 0, 0]                              # (h_qkv, c)
    q_idx = jnp.concatenate([jnp.arange(h * per_head, h * per_head + key_dim)
                             for h in range(num_heads)])
    k_idx = q_idx + key_dim
    v_idx = jnp.concatenate([jnp.arange(h * per_head + 2 * key_dim,
                                        (h + 1) * per_head)
                             for h in range(num_heads)])
    order = jnp.concatenate([q_idx, k_idx, v_idx])
    p["w_qkv"] = w2d[order].T                        # (c, 2*nh*kd + c)
    p["b_qkv"] = b[order][None, :]

    # Attention.pe : depthwise Conv(c, c, 3, g=c)+BN -> (9, c) tap weights.
    w, b = conv_bn(keys[2], c, c, ksz=3, groups=c)   # (c, 1, 3, 3)
    p["w_pe"] = jnp.transpose(w[:, 0], (1, 2, 0)).reshape(9, c)
    p["b_pe"] = b[None, :]

    # Attention.proj : Conv(c, c, 1)+BN.
    w, b = conv_bn(keys[3], c, c)
    p["w_proj"], p["b_proj"] = w[:, :, 0, 0].T, b[None, :]

    # PSABlock.ffn : Conv(c, 2c, 1)+BN+SiLU, Conv(2c, c, 1)+BN.
    w, b = conv_bn(keys[4], c, 2 * c)
    p["w_ffn1"], p["b_ffn1"] = w[:, :, 0, 0].T, b[None, :]
    w, b = conv_bn(keys[5], 2 * c, c)
    p["w_ffn2"], p["b_ffn2"] = w[:, :, 0, 0].T, b[None, :]

    # cv2 : Conv(2c, c1, 1)+BN+SiLU ; input channels split as (a | b).
    w, b = conv_bn(keys[6], 2 * c, c1)
    w2d = w[:, :, 0, 0]                              # (c1, 2c)
    p["w_cv2a"], p["w_cv2b"] = w2d[:, :c].T, w2d[:, c:].T
    p["b_cv2"] = b[None, :]

    meta = dict(c=c, num_heads=num_heads, key_dim=key_dim, head_dim=head_dim)
    return p, meta


if __name__ == "__main__":
    key = jax.random.PRNGKey(0)
    kx, kp = jax.random.split(key)

    # c1 must be >= 128 so that num_heads = (c1*e)//64 >= 1, as in the module.
    # W=12 is deliberately NOT a power of two (the old restriction is gone).
    B, C1, H, W = 2, 128, 12, 12
    x = jax.random.normal(kx, (B, C1, H, W), jnp.float32)

    params, meta = make_params(kp, C1, e=0.5, attn_ratio=0.5)
    out = c2psa_forward(x, params, **meta)
    out = jax.block_until_ready(out)
    assert out.shape == (B, C1, H, W)
    assert bool(jnp.all(jnp.isfinite(out)))
    print("KERNEL_OK")
</pallas_src>

<mosaic_0001>
module attributes {stable_mosaic.version = 11 : i64} {
  func.func @_c2psa_kernel(%arg0: i32, %arg1: memref<1x144x128xbf16, #tpu.memory_space<vmem>>, %arg2: memref<144x1xi32, #tpu.memory_space<vmem>>, %arg3: memref<128x128xbf16, #tpu.memory_space<vmem>>, %arg4: memref<1x128xf32, #tpu.memory_space<vmem>>, %arg5: memref<64x128xbf16, #tpu.memory_space<vmem>>, %arg6: memref<1x128xf32, #tpu.memory_space<vmem>>, %arg7: memref<9x64xf32, #tpu.memory_space<vmem>>, %arg8: memref<1x64xf32, #tpu.memory_space<vmem>>, %arg9: memref<64x64xbf16, #tpu.memory_space<vmem>>, %arg10: memref<1x64xf32, #tpu.memory_space<vmem>>, %arg11: memref<64x128xbf16, #tpu.memory_space<vmem>>, %arg12: memref<1x128xf32, #tpu.memory_space<vmem>>, %arg13: memref<128x64xbf16, #tpu.memory_space<vmem>>, %arg14: memref<1x64xf32, #tpu.memory_space<vmem>>, %arg15: memref<64x128xbf16, #tpu.memory_space<vmem>>, %arg16: memref<64x128xbf16, #tpu.memory_space<vmem>>, %arg17: memref<1x128xf32, #tpu.memory_space<vmem>>, %arg18: memref<1x144x128xf32, #tpu.memory_space<vmem>>, %arg19: memref<144x64xbf16, #tpu.memory_space<vmem>>, %arg20: memref<144x64xf32, #tpu.memory_space<vmem>>, %arg21: memref<144x32xbf16, #tpu.memory_space<vmem>>, %arg22: memref<144x64xf32, #tpu.memory_space<vmem>>) attributes {dimension_semantics = [#tpu.dimension_semantics<parallel>], iteration_bounds = array<i64: 2>, scalar_prefetch = 0 : i64, scratch_operands = 4 : i64, tpu.core_type = #tpu.core_type<tc>, window_params = [{transform_indices = @transform_0, window_bounds = array<i64: 1, 144, 128>}, {pipeline_mode = #tpu.pipeline_mode<synchronous>, transform_indices = @transform_1, window_bounds = array<i64: 144, 1>}, {pipeline_mode = #tpu.pipeline_mode<synchronous>, transform_indices = @transform_2, window_bounds = array<i64: 128, 128>}, {pipeline_mode = #tpu.pipeline_mode<synchronous>, transform_indices = @transform_3, window_bounds = array<i64: 1, 128>}, {pipeline_mode = #tpu.pipeline_mode<synchronous>, transform_indices = @transform_4, window_bounds = array<i64: 64, 128>}, {pipeline_mode = #tpu.pipeline_mode<synchronous>, transform_indices = @transform_5, window_bounds = array<i64: 1, 128>}, {pipeline_mode = #tpu.pipeline_mode<synchronous>, transform_indices = @transform_6, window_bounds = array<i64: 9, 64>}, {pipeline_mode = #tpu.pipeline_mode<synchronous>, transform_indices = @transform_7, window_bounds = array<i64: 1, 64>}, {pipeline_mode = #tpu.pipeline_mode<synchronous>, transform_indices = @transform_8, window_bounds = array<i64: 64, 64>}, {pipeline_mode = #tpu.pipeline_mode<synchronous>, transform_indices = @transform_9, window_bounds = array<i64: 1, 64>}, {pipeline_mode = #tpu.pipeline_mode<synchronous>, transform_indices = @transform_10, window_bounds = array<i64: 64, 128>}, {pipeline_mode = #tpu.pipeline_mode<synchronous>, transform_indices = @transform_11, window_bounds = array<i64: 1, 128>}, {pipeline_mode = #tpu.pipeline_mode<synchronous>, transform_indices = @transform_12, window_bounds = array<i64: 128, 64>}, {pipeline_mode = #tpu.pipeline_mode<synchronous>, transform_indices = @transform_13, window_bounds = array<i64: 1, 64>}, {pipeline_mode = #tpu.pipeline_mode<synchronous>, transform_indices = @transform_14, window_bounds = array<i64: 64, 128>}, {pipeline_mode = #tpu.pipeline_mode<synchronous>, transform_indices = @transform_15, window_bounds = array<i64: 64, 128>}, {pipeline_mode = #tpu.pipeline_mode<synchronous>, transform_indices = @transform_16, window_bounds = array<i64: 1, 128>}, {transform_indices = @transform_17, window_bounds = array<i64: 1, 144, 128>}]} {
    %c0 = arith.constant 0 : index
    %c0_0 = arith.constant 0 : index
    %c0_1 = arith.constant 0 : index
    %0 = vector.load %arg1[%c0, %c0_0, %c0_1] : memref<1x144x128xbf16, #tpu.memory_space<vmem>>, vector<1x144x128xbf16>
    %1 = vector.shape_cast %0 : vector<1x144x128xbf16> to vector<144x128xbf16>
    %c0_2 = arith.constant 0 : index
    %c0_3 = arith.constant 0 : index
    %2 = vector.load %arg3[%c0_2, %c0_3] : memref<128x128xbf16, #tpu.memory_space<vmem>>, vector<128x128xbf16>
    %cst = arith.constant dense<0.000000e+00> : vector<144x128xf32>
    %3 = tpu.matmul %1, %2, %cst {dimension_numbers = #tpu.dot_dimension_numbers<[1], [0], [0], [1], [0, 0, 1, 1], [], []>} : vector<144x128xbf16>, vector<128x128xbf16>, vector<144x128xf32> -> vector<144x128xf32>
    %c0_4 = arith.constant 0 : index
    %c0_5 = arith.constant 0 : index
    %4 = vector.load %arg4[%c0_4, %c0_5] : memref<1x128xf32, #tpu.memory_space<vmem>>, vector<1x128xf32>
    %5 = vector.broadcast %4 : vector<1x128xf32> to vector<144x128xf32>
    %6 = arith.addf %3, %5 : vector<144x128xf32>
    %cst_6 = arith.constant 0.000000e+00 : f32
    %7 = vector.broadcast %cst_6 : f32 to vector<144x128xf32>
    %8 = arith.subf %7, %6 : vector<144x128xf32>
    %9 = math.exp %8 : vector<144x128xf32>
    %cst_7 = arith.constant 1.000000e+00 : f32
    %10 = vector.broadcast %cst_7 : f32 to vector<144x128xf32>
    %11 = arith.addf %10, %9 : vector<144x128xf32>
    %12 = tpu.reciprocal %11 {approx = true} : vector<144x128xf32> -> vector<144x128xf32>
    %13 = arith.mulf %6, %12 : vector<144x128xf32>
    %14 = vector.extract_strided_slice %13 {offsets = [0, 0], sizes = [144, 64], strides = [1, 1]} : vector<144x128xf32> to vector<144x64xf32>
    %15 = arith.truncf %14 : vector<144x64xf32> to vector<144x64xbf16>
    %c0_8 = arith.constant 0 : index
    %c0_9 = arith.constant 0 : index
    %16 = vector.load %arg19[%c0_8, %c0_9] : memref<144x64xbf16, #tpu.memory_space<vmem>>, vector<144x64xbf16>
    tpu.vector_store %arg19[%c0_8, %c0_9], %15 {strides = array<i32>} : memref<144x64xbf16, #tpu.memory_space<vmem>>, vector<144x64xbf16>,
    %17 = vector.extract_strided_slice %13 {offsets = [0, 64], sizes = [144, 64], strides = [1, 1]} : vector<144x128xf32> to vector<144x64xf32>
    %c0_10 = arith.constant 0 : index
    %c0_11 = arith.constant 0 : index
    %18 = vector.load %arg20[%c0_10, %c0_11] : memref<144x64xf32, #tpu.memory_space<vmem>>, vector<144x64xf32>
    tpu.vector_store %arg20[%c0_10, %c0_11], %17 {strides = array<i32>} : memref<144x64xf32, #tpu.memory_space<vmem>>, vector<144x64xf32>,
    %19 = arith.truncf %17 : vector<144x64xf32> to vector<144x64xbf16>
    %c0_12 = arith.constant 0 : index
    %c0_13 = arith.constant 0 : index
    %20 = vector.load %arg5[%c0_12, %c0_13] : memref<64x128xbf16, #tpu.memory_space<vmem>>, vector<64x128xbf16>
    %cst_14 = arith.constant dense<0.000000e+00> : vector<144x128xf32>
    %21 = tpu.matmul %19, %20, %cst_14 {dimension_numbers = #tpu.dot_dimension_numbers<[1], [0], [0], [1], [0, 0, 1, 1], [], []>} : vector<144x64xbf16>, vector<64x128xbf16>, vector<144x128xf32> -> vector<144x128xf32>
    %c0_15 = arith.constant 0 : index
    %c0_16 = arith.constant 0 : index
    %22 = vector.load %arg6[%c0_15, %c0_16] : memref<1x128xf32, #tpu.memory_space<vmem>>, vector<1x128xf32>
    %23 = vector.broadcast %22 : vector<1x128xf32> to vector<144x128xf32>
    %24 = arith.addf %21, %23 : vector<144x128xf32>
    %25 = vector.extract_strided_slice %24 {offsets = [0, 0], sizes = [144, 32], strides = [1, 1]} : vector<144x128xf32> to vector<144x32xf32>
    %26 = arith.truncf %25 : vector<144x32xf32> to vector<144x32xbf16>
    %c0_17 = arith.constant 0 : index
    %c0_18 = arith.constant 0 : index
    %27 = vector.load %arg21[%c0_17, %c0_18] : memref<144x32xbf16, #tpu.memory_space<vmem>>, vector<144x32xbf16>
    tpu.vector_store %arg21[%c0_17, %c0_18], %26 {strides = array<i32>} : memref<144x32xbf16, #tpu.memory_space<vmem>>, vector<144x32xbf16>,
    %28 = vector.extract_strided_slice %24 {offsets = [0, 32], sizes = [144, 32], strides = [1, 1]} : vector<144x128xf32> to vector<144x32xf32>
    %29 = arith.truncf %28 : vector<144x32xf32> to vector<144x32xbf16>
    %30 = vector.extract_strided_slice %24 {offsets = [0, 64], sizes = [144, 64], strides = [1, 1]} : vector<144x128xf32> to vector<144x64xf32>
    %31 = arith.truncf %30 : vector<144x64xf32> to vector<144x64xbf16>
    %c0_19 = arith.constant 0 : index
    %c0_20 = arith.constant 0 : index
    %32 = vector.load %arg7[%c0_19, %c0_20] : memref<9x64xf32, #tpu.memory_space<vmem>>, vector<9x64xf32>
    %33 = tpu.iota {dimensions = array<i32: 0>} : vector<144x1xi32>
    %c0_21 = arith.constant 0 : index
    %c0_22 = arith.constant 0 : index
    %34 = vector.load %arg2[%c0_21, %c0_22] : memref<144x1xi32, #tpu.memory_space<vmem>>, vector<144x1xi32>
    %c12_i32 = arith.constant 12 : i32
    %35 = vector.broadcast %c12_i32 : i32 to vector<144x1xi32>
    %36 = arith.cmpi sge, %33, %35 : vector<144x1xi32>
    %c132_i32 = arith.constant 132 : i32
    %37 = vector.broadcast %c132_i32 : i32 to vector<144x1xi32>
    %38 = arith.cmpi slt, %33, %37 : vector<144x1xi32>
    %c1_i32 = arith.constant 1 : i32
    %39 = vector.broadcast %c1_i32 : i32 to vector<144x1xi32>
    %40 = arith.cmpi sge, %34, %39 : vector<144x1xi32>
    %c10_i32 = arith.constant 10 : i32
    %41 = vector.broadcast %c10_i32 : i32 to vector<144x1xi32>
    %42 = arith.cmpi sle, %34, %41 : vector<144x1xi32>
    %cst_23 = arith.constant 0.000000e+00 : f32
    %43 = vector.broadcast %cst_23 : f32 to vector<144x64xf32>
    %c13_i32 = arith.constant 13 : i32
    %44 = tpu.dynamic_rotate %30 by %c13_i32 dim 0 : vector<144x64xf32>, i32 -> vector<144x64xf32>
    %45 = vector.extract_strided_slice %32 {offsets = [0, 0], sizes = [1, 64], strides = [1, 1]} : vector<9x64xf32> to vector<1x64xf32>
    %46 = vector.broadcast %45 : vector<1x64xf32> to vector<144x64xf32>
    %47 = arith.mulf %44, %46 : vector<144x64xf32>
    %48 = arith.andi %36, %40 : vector<144x1xi1>
    %cst_24 = arith.constant 0.000000e+00 : f32
    %49 = vector.shape_cast %48 : vector<144x1xi1> to vector<144x1xi1>
    %50 = vector.broadcast %49 : vector<144x1xi1> to vector<144x64xi1>
    %51 = vector.broadcast %cst_24 : f32 to vector<144x64xf32>
    %52 = arith.select %50, %47, %51 : vector<144x64xi1>, vector<144x64xf32>
    %53 = arith.addf %43, %52 : vector<144x64xf32>
    %c12_i32_25 = arith.constant 12 : i32
    %54 = tpu.dynamic_rotate %30 by %c12_i32_25 dim 0 : vector<144x64xf32>, i32 -> vector<144x64xf32>
    %55 = vector.extract_strided_slice %32 {offsets = [1, 0], sizes = [1, 64], strides = [1, 1]} : vector<9x64xf32> to vector<1x64xf32>
    %56 = vector.broadcast %55 : vector<1x64xf32> to vector<144x64xf32>
    %57 = arith.mulf %54, %56 : vector<144x64xf32>
    %cst_26 = arith.constant 0.000000e+00 : f32
    %58 = vector.shape_cast %36 : vector<144x1xi1> to vector<144x1xi1>
    %59 = vector.broadcast %58 : vector<144x1xi1> to vector<144x64xi1>
    %60 = vector.broadcast %cst_26 : f32 to vector<144x64xf32>
    %61 = arith.select %59, %57, %60 : vector<144x64xi1>, vector<144x64xf32>
    %62 = arith.addf %53, %61 : vector<144x64xf32>
    %c11_i32 = arith.constant 11 : i32
    %63 = tpu.dynamic_rotate %30 by %c11_i32 dim 0 : vector<144x64xf32>, i32 -> vector<144x64xf32>
    %64 = vector.extract_strided_slice %32 {offsets = [2, 0], sizes = [1, 64], strides = [1, 1]} : vector<9x64xf32> to vector<1x64xf32>
    %65 = vector.broadcast %64 : vector<1x64xf32> to vector<144x64xf32>
    %66 = arith.mulf %63, %65 : vector<144x64xf32>
    %67 = arith.andi %36, %42 : vector<144x1xi1>
    %cst_27 = arith.constant 0.000000e+00 : f32
    %68 = vector.shape_cast %67 : vector<144x1xi1> to vector<144x1xi1>
    %69 = vector.broadcast %68 : vector<144x1xi1> to vector<144x64xi1>
    %70 = vector.broadcast %cst_27 : f32 to vector<144x64xf32>
    %71 = arith.select %69, %66, %70 : vector<144x64xi1>, vector<144x64xf32>
    %72 = arith.addf %62, %71 : vector<144x64xf32>
    %c1_i32_28 = arith.constant 1 : i32
    %73 = tpu.dynamic_rotate %30 by %c1_i32_28 dim 0 : vector<144x64xf32>, i32 -> vector<144x64xf32>
    %74 = vector.extract_strided_slice %32 {offsets = [3, 0], sizes = [1, 64], strides = [1, 1]} : vector<9x64xf32> to vector<1x64xf32>
    %75 = vector.broadcast %74 : vector<1x64xf32> to vector<144x64xf32>
    %76 = arith.mulf %73, %75 : vector<144x64xf32>
    %cst_29 = arith.constant 0.000000e+00 : f32
    %77 = vector.shape_cast %40 : vector<144x1xi1> to vector<144x1xi1>
    %78 = vector.broadcast %77 : vector<144x1xi1> to vector<144x64xi1>
    %79 = vector.broadcast %cst_29 : f32 to vector<144x64xf32>
    %80 = arith.select %78, %76, %79 : vector<144x64xi1>, vector<144x64xf32>
    %81 = arith.addf %72, %80 : vector<144x64xf32>
    %82 = vector.extract_strided_slice %32 {offsets = [4, 0], sizes = [1, 64], strides = [1, 1]} : vector<9x64xf32> to vector<1x64xf32>
    %83 = vector.broadcast %82 : vector<1x64xf32> to vector<144x64xf32>
    %84 = arith.mulf %30, %83 : vector<144x64xf32>
    %85 = arith.addf %81, %84 : vector<144x64xf32>
    %c143_i32 = arith.constant 143 : i32
    %86 = tpu.dynamic_rotate %30 by %c143_i32 dim 0 : vector<144x64xf32>, i32 -> vector<144x64xf32>
    %87 = vector.extract_strided_slice %32 {offsets = [5, 0], sizes = [1, 64], strides = [1, 1]} : vector<9x64xf32> to vector<1x64xf32>
    %88 = vector.broadcast %87 : vector<1x64xf32> to vector<144x64xf32>
    %89 = arith.mulf %86, %88 : vector<144x64xf32>
    %cst_30 = arith.constant 0.000000e+00 : f32
    %90 = vector.shape_cast %42 : vector<144x1xi1> to vector<144x1xi1>
    %91 = vector.broadcast %90 : vector<144x1xi1> to vector<144x64xi1>
    %92 = vector.broadcast %cst_30 : f32 to vector<144x64xf32>
    %93 = arith.select %91, %89, %92 : vector<144x64xi1>, vector<144x64xf32>
    %94 = arith.addf %85, %93 : vector<144x64xf32>
    %c133_i32 = arith.constant 133 : i32
    %95 = tpu.dynamic_rotate %30 by %c133_i32 dim 0 : vector<144x64xf32>, i32 -> vector<144x64xf32>
    %96 = vector.extract_strided_slice %32 {offsets = [6, 0], sizes = [1, 64], strides = [1, 1]} : vector<9x64xf32> to vector<1x64xf32>
    %97 = vector.broadcast %96 : vector<1x64xf32> to vector<144x64xf32>
    %98 = arith.mulf %95, %97 : vector<144x64xf32>
    %99 = arith.andi %38, %40 : vector<144x1xi1>
    %cst_31 = arith.constant 0.000000e+00 : f32
    %100 = vector.shape_cast %99 : vector<144x1xi1> to vector<144x1xi1>
    %101 = vector.broadcast %100 : vector<144x1xi1> to vector<144x64xi1>
    %102 = vector.broadcast %cst_31 : f32 to vector<144x64xf32>
    %103 = arith.select %101, %98, %102 : vector<144x64xi1>, vector<144x64xf32>
    %104 = arith.addf %94, %103 : vector<144x64xf32>
    %c132_i32_32 = arith.constant 132 : i32
    %105 = tpu.dynamic_rotate %30 by %c132_i32_32 dim 0 : vector<144x64xf32>, i32 -> vector<144x64xf32>
    %106 = vector.extract_strided_slice %32 {offsets = [7, 0], sizes = [1, 64], strides = [1, 1]} : vector<9x64xf32> to vector<1x64xf32>
    %107 = vector.broadcast %106 : vector<1x64xf32> to vector<144x64xf32>
    %108 = arith.mulf %105, %107 : vector<144x64xf32>
    %cst_33 = arith.constant 0.000000e+00 : f32
    %109 = vector.shape_cast %38 : vector<144x1xi1> to vector<144x1xi1>
    %110 = vector.broadcast %109 : vector<144x1xi1> to vector<144x64xi1>
    %111 = vector.broadcast %cst_33 : f32 to vector<144x64xf32>
    %112 = arith.select %110, %108, %111 : vector<144x64xi1>, vector<144x64xf32>
    %113 = arith.addf %104, %112 : vector<144x64xf32>
    %c131_i32 = arith.constant 131 : i32
    %114 = tpu.dynamic_rotate %30 by %c131_i32 dim 0 : vector<144x64xf32>, i32 -> vector<144x64xf32>
    %115 = vector.extract_strided_slice %32 {offsets = [8, 0], sizes = [1, 64], strides = [1, 1]} : vector<9x64xf32> to vector<1x64xf32>
    %116 = vector.broadcast %115 : vector<1x64xf32> to vector<144x64xf32>
    %117 = arith.mulf %114, %116 : vector<144x64xf32>
    %118 = arith.andi %38, %42 : vector<144x1xi1>
    %cst_34 = arith.constant 0.000000e+00 : f32
    %119 = vector.shape_cast %118 : vector<144x1xi1> to vector<144x1xi1>
    %120 = vector.broadcast %119 : vector<144x1xi1> to vector<144x64xi1>
    %121 = vector.broadcast %cst_34 : f32 to vector<144x64xf32>
    %122 = arith.select %120, %117, %121 : vector<144x64xi1>, vector<144x64xf32>
    %123 = arith.addf %113, %122 : vector<144x64xf32>
    %c0_35 = arith.constant 0 : index
    %c0_36 = arith.constant 0 : index
    %124 = vector.load %arg8[%c0_35, %c0_36] : memref<1x64xf32, #tpu.memory_space<vmem>>, vector<1x64xf32>
    %125 = vector.broadcast %124 : vector<1x64xf32> to vector<144x64xf32>
    %126 = arith.addf %123, %125 : vector<144x64xf32>
    %c0_37 = arith.constant 0 : index
    %c0_38 = arith.constant 0 : index
    %127 = vector.load %arg22[%c0_37, %c0_38] : memref<144x64xf32, #tpu.memory_space<vmem>>, vector<144x64xf32>
    tpu.vector_store %arg22[%c0_37, %c0_38], %126 {strides = array<i32>} : memref<144x64xf32, #tpu.memory_space<vmem>>, vector<144x64xf32>,
    %c0_39 = arith.constant 0 : index
    %c0_40 = arith.constant 0 : index
    %128 = vector.load %arg21[%c0_39, %c0_40] : memref<144x32xbf16, #tpu.memory_space<vmem>>, vector<144x32xbf16>
    %cst_41 = arith.constant dense<0.000000e+00> : vector<144x144xf32>
    %129 = tpu.matmul %128, %29, %cst_41 {dimension_numbers = #tpu.dot_dimension_numbers<[1], [1], [0], [0], [0, 0, 1, 0], [], []>} : vector<144x32xbf16>, vector<144x32xbf16>, vector<144x144xf32> -> vector<144x144xf32>
    %cst_42 = arith.constant 0.176776692 : f32
    %130 = vector.broadcast %cst_42 : f32 to vector<144x144xf32>
    %131 = arith.mulf %129, %130 : vector<144x144xf32>
    %cst_43 = arith.constant dense<0xFF800000> : vector<144xf32>
    %132 = vector.multi_reduction <maximumf>, %131, %cst_43 [1] : vector<144x144xf32> to vector<144xf32>
    %133 = vector.shape_cast %132 : vector<144xf32> to vector<144x1xf32>
    %134 = vector.broadcast %133 : vector<144x1xf32> to vector<144x144xf32>
    %135 = arith.subf %131, %134 : vector<144x144xf32>
    %136 = math.exp %135 : vector<144x144xf32>
    %cst_44 = arith.constant dense<0.000000e+00> : vector<144xf32>
    %137 = vector.multi_reduction <add>, %136, %cst_44 [1] : vector<144x144xf32> to vector<144xf32>
    %138 = vector.shape_cast %137 : vector<144xf32> to vector<144x1xf32>
    %139 = vector.broadcast %138 : vector<144x1xf32> to vector<144x144xf32>
    %140 = arith.divf %136, %139 : vector<144x144xf32>
    %141 = arith.truncf %140 : vector<144x144xf32> to vector<144x144xbf16>
    %cst_45 = arith.constant dense<0.000000e+00> : vector<144x64xf32>
    %142 = tpu.matmul %141, %31, %cst_45 {dimension_numbers = #tpu.dot_dimension_numbers<[1], [0], [0], [1], [0, 0, 1, 1], [], []>} : vector<144x144xbf16>, vector<144x64xbf16>, vector<144x64xf32> -> vector<144x64xf32>
    %c0_46 = arith.constant 0 : index
    %c0_47 = arith.constant 0 : index
    %143 = vector.load %arg22[%c0_46, %c0_47] : memref<144x64xf32, #tpu.memory_space<vmem>>, vector<144x64xf32>
    %144 = arith.addf %142, %143 : vector<144x64xf32>
    %c0_48 = arith.constant 0 : index
    %c0_49 = arith.constant 0 : index
    %145 = vector.load %arg20[%c0_48, %c0_49] : memref<144x64xf32, #tpu.memory_space<vmem>>, vector<144x64xf32>
    %146 = arith.truncf %144 : vector<144x64xf32> to vector<144x64xbf16>
    %c0_50 = arith.constant 0 : index
    %c0_51 = arith.constant 0 : index
    %147 = vector.load %arg9[%c0_50, %c0_51] : memref<64x64xbf16, #tpu.memory_space<vmem>>, vector<64x64xbf16>
    %cst_52 = arith.constant dense<0.000000e+00> : vector<144x64xf32>
    %148 = tpu.matmul %146, %147, %cst_52 {dimension_numbers = #tpu.dot_dimension_numbers<[1], [0], [0], [1], [0, 0, 1, 1], [], []>} : vector<144x64xbf16>, vector<64x64xbf16>, vector<144x64xf32> -> vector<144x64xf32>
    %c0_53 = arith.constant 0 : index
    %c0_54 = arith.constant 0 : index
    %149 = vector.load %arg10[%c0_53, %c0_54] : memref<1x64xf32, #tpu.memory_space<vmem>>, vector<1x64xf32>
    %150 = vector.broadcast %149 : vector<1x64xf32> to vector<144x64xf32>
    %151 = arith.addf %148, %150 : vector<144x64xf32>
    %152 = arith.addf %145, %151 : vector<144x64xf32>
    %153 = arith.truncf %152 : vector<144x64xf32> to vector<144x64xbf16>
    %c0_55 = arith.constant 0 : index
    %c0_56 = arith.constant 0 : index
    %154 = vector.load %arg11[%c0_55, %c0_56] : memref<64x128xbf16, #tpu.memory_space<vmem>>, vector<64x128xbf16>
    %cst_57 = arith.constant dense<0.000000e+00> : vector<144x128xf32>
    %155 = tpu.matmul %153, %154, %cst_57 {dimension_numbers = #tpu.dot_dimension_numbers<[1], [0], [0], [1], [0, 0, 1, 1], [], []>} : vector<144x64xbf16>, vector<64x128xbf16>, vector<144x128xf32> -> vector<144x128xf32>
    %c0_58 = arith.constant 0 : index
    %c0_59 = arith.constant 0 : index
    %156 = vector.load %arg12[%c0_58, %c0_59] : memref<1x128xf32, #tpu.memory_space<vmem>>, vector<1x128xf32>
    %157 = vector.broadcast %156 : vector<1x128xf32> to vector<144x128xf32>
    %158 = arith.addf %155, %157 : vector<144x128xf32>
    %cst_60 = arith.constant 0.000000e+00 : f32
    %159 = vector.broadcast %cst_60 : f32 to vector<144x128xf32>
    %160 = arith.subf %159, %158 : vector<144x128xf32>
    %161 = math.exp %160 : vector<144x128xf32>
    %cst_61 = arith.constant 1.000000e+00 : f32
    %162 = vector.broadcast %cst_61 : f32 to vector<144x128xf32>
    %163 = arith.addf %162, %161 : vector<144x128xf32>
    %164 = tpu.reciprocal %163 {approx = true} : vector<144x128xf32> -> vector<144x128xf32>
    %165 = arith.mulf %158, %164 : vector<144x128xf32>
    %166 = arith.truncf %165 : vector<144x128xf32> to vector<144x128xbf16>
    %c0_62 = arith.constant 0 : index
    %c0_63 = arith.constant 0 : index
    %167 = vector.load %arg13[%c0_62, %c0_63] : memref<128x64xbf16, #tpu.memory_space<vmem>>, vector<128x64xbf16>
    %cst_64 = arith.constant dense<0.000000e+00> : vector<144x64xf32>
    %168 = tpu.matmul %166, %167, %cst_64 {dimension_numbers = #tpu.dot_dimension_numbers<[1], [0], [0], [1], [0, 0, 1, 1], [], []>} : vector<144x128xbf16>, vector<128x64xbf16>, vector<144x64xf32> -> vector<144x64xf32>
    %c0_65 = arith.constant 0 : index
    %c0_66 = arith.constant 0 : index
    %169 = vector.load %arg14[%c0_65, %c0_66] : memref<1x64xf32, #tpu.memory_space<vmem>>, vector<1x64xf32>
    %170 = vector.broadcast %169 : vector<1x64xf32> to vector<144x64xf32>
    %171 = arith.addf %168, %170 : vector<144x64xf32>
    %172 = arith.addf %152, %171 : vector<144x64xf32>
    %c0_67 = arith.constant 0 : index
    %c0_68 = arith.constant 0 : index
    %173 = vector.load %arg19[%c0_67, %c0_68] : memref<144x64xbf16, #tpu.memory_space<vmem>>, vector<144x64xbf16>
    %c0_69 = arith.constant 0 : index
    %c0_70 = arith.constant 0 : index
    %174 = vector.load %arg15[%c0_69, %c0_70] : memref<64x128xbf16, #tpu.memory_space<vmem>>, vector<64x128xbf16>
    %cst_71 = arith.constant dense<0.000000e+00> : vector<144x128xf32>
    %175 = tpu.matmul %173, %174, %cst_71 {dimension_numbers = #tpu.dot_dimension_numbers<[1], [0], [0], [1], [0, 0, 1, 1], [], []>} : vector<144x64xbf16>, vector<64x128xbf16>, vector<144x128xf32> -> vector<144x128xf32>
    %176 = arith.truncf %172 : vector<144x64xf32> to vector<144x64xbf16>
    %c0_72 = arith.constant 0 : index
    %c0_73 = arith.constant 0 : index
    %177 = vector.load %arg16[%c0_72, %c0_73] : memref<64x128xbf16, #tpu.memory_space<vmem>>, vector<64x128xbf16>
    %cst_74 = arith.constant dense<0.000000e+00> : vector<144x128xf32>
    %178 = tpu.matmul %176, %177, %cst_74 {dimension_numbers = #tpu.dot_dimension_numbers<[1], [0], [0], [1], [0, 0, 1, 1], [], []>} : vector<144x64xbf16>, vector<64x128xbf16>, vector<144x128xf32> -> vector<144x128xf32>
    %179 = arith.addf %175, %178 : vector<144x128xf32>
    %c0_75 = arith.constant 0 : index
    %c0_76 = arith.constant 0 : index
    %180 = vector.load %arg17[%c0_75, %c0_76] : memref<1x128xf32, #tpu.memory_space<vmem>>, vector<1x128xf32>
    %181 = vector.broadcast %180 : vector<1x128xf32> to vector<144x128xf32>
    %182 = arith.addf %179, %181 : vector<144x128xf32>
    %cst_77 = arith.constant 0.000000e+00 : f32
    %183 = vector.broadcast %cst_77 : f32 to vector<144x128xf32>
    %184 = arith.subf %183, %182 : vector<144x128xf32>
    %185 = math.exp %184 : vector<144x128xf32>
    %cst_78 = arith.constant 1.000000e+00 : f32
    %186 = vector.broadcast %cst_78 : f32 to vector<144x128xf32>
    %187 = arith.addf %186, %185 : vector<144x128xf32>
    %188 = tpu.reciprocal %187 {approx = true} : vector<144x128xf32> -> vector<144x128xf32>
    %189 = arith.mulf %182, %188 : vector<144x128xf32>
    %c0_79 = arith.constant 0 : index
    %c0_80 = arith.constant 0 : index
    %c0_81 = arith.constant 0 : index
    %190 = vector.load %arg18[%c0_79, %c0_80, %c0_81] : memref<1x144x128xf32, #tpu.memory_space<vmem>>, vector<1x144x128xf32>
    %191 = vector.shape_cast %190 : vector<1x144x128xf32> to vector<144x128xf32>
    %192 = vector.shape_cast %189 : vector<144x128xf32> to vector<1x144x128xf32>
    tpu.vector_store %arg18[%c0_79, %c0_80, %c0_81], %192 {strides = array<i32>} : memref<1x144x128xf32, #tpu.memory_space<vmem>>, vector<1x144x128xf32>,
    return
  }
  func.func @transform_0(%arg0: i32) -> (i32, i32, i32) {
    %c0_i32 = arith.constant 0 : i32
    %c0_i32_0 = arith.constant 0 : i32
    %c0_i32_1 = arith.constant 0 : i32
    return %arg0, %c0_i32, %c0_i32_0 : i32, i32, i32
  }
  func.func @transform_1(%arg0: i32) -> (i32, i32) {
    %c0_i32 = arith.constant 0 : i32
    %c0_i32_0 = arith.constant 0 : i32
    %c0_i32_1 = arith.constant 0 : i32
    return %c0_i32, %c0_i32_0 : i32, i32
  }
  func.func @transform_2(%arg0: i32) -> (i32, i32) {
    %c0_i32 = arith.constant 0 : i32
    %c0_i32_0 = arith.constant 0 : i32
    %c0_i32_1 = arith.constant 0 : i32
    return %c0_i32, %c0_i32_0 : i32, i32
  }
  func.func @transform_3(%arg0: i32) -> (i32, i32) {
    %c0_i32 = arith.constant 0 : i32
    %c0_i32_0 = arith.constant 0 : i32
    %c0_i32_1 = arith.constant 0 : i32
    return %c0_i32, %c0_i32_0 : i32, i32
  }
  func.func @transform_4(%arg0: i32) -> (i32, i32) {
    %c0_i32 = arith.constant 0 : i32
    %c0_i32_0 = arith.constant 0 : i32
    %c0_i32_1 = arith.constant 0 : i32
    return %c0_i32, %c0_i32_0 : i32, i32
  }
  func.func @transform_5(%arg0: i32) -> (i32, i32) {
    %c0_i32 = arith.constant 0 : i32
    %c0_i32_0 = arith.constant 0 : i32
    %c0_i32_1 = arith.constant 0 : i32
    return %c0_i32, %c0_i32_0 : i32, i32
  }
  func.func @transform_6(%arg0: i32) -> (i32, i32) {
    %c0_i32 = arith.constant 0 : i32
    %c0_i32_0 = arith.constant 0 : i32
    %c0_i32_1 = arith.constant 0 : i32
    return %c0_i32, %c0_i32_0 : i32, i32
  }
  func.func @transform_7(%arg0: i32) -> (i32, i32) {
    %c0_i32 = arith.constant 0 : i32
    %c0_i32_0 = arith.constant 0 : i32
    %c0_i32_1 = arith.constant 0 : i32
    return %c0_i32, %c0_i32_0 : i32, i32
  }
  func.func @transform_8(%arg0: i32) -> (i32, i32) {
    %c0_i32 = arith.constant 0 : i32
    %c0_i32_0 = arith.constant 0 : i32
    %c0_i32_1 = arith.constant 0 : i32
    return %c0_i32, %c0_i32_0 : i32, i32
  }
  func.func @transform_9(%arg0: i32) -> (i32, i32) {
    %c0_i32 = arith.constant 0 : i32
    %c0_i32_0 = arith.constant 0 : i32
    %c0_i32_1 = arith.constant 0 : i32
    return %c0_i32, %c0_i32_0 : i32, i32
  }
  func.func @transform_10(%arg0: i32) -> (i32, i32) {
    %c0_i32 = arith.constant 0 : i32
    %c0_i32_0 = arith.constant 0 : i32
    %c0_i32_1 = arith.constant 0 : i32
    return %c0_i32, %c0_i32_0 : i32, i32
  }
  func.func @transform_11(%arg0: i32) -> (i32, i32) {
    %c0_i32 = arith.constant 0 : i32
    %c0_i32_0 = arith.constant 0 : i32
    %c0_i32_1 = arith.constant 0 : i32
    return %c0_i32, %c0_i32_0 : i32, i32
  }
  func.func @transform_12(%arg0: i32) -> (i32, i32) {
    %c0_i32 = arith.constant 0 : i32
    %c0_i32_0 = arith.constant 0 : i32
    %c0_i32_1 = arith.constant 0 : i32
    return %c0_i32, %c0_i32_0 : i32, i32
  }
  func.func @transform_13(%arg0: i32) -> (i32, i32) {
    %c0_i32 = arith.constant 0 : i32
    %c0_i32_0 = arith.constant 0 : i32
    %c0_i32_1 = arith.constant 0 : i32
    return %c0_i32, %c0_i32_0 : i32, i32
  }
  func.func @transform_14(%arg0: i32) -> (i32, i32) {
    %c0_i32 = arith.constant 0 : i32
    %c0_i32_0 = arith.constant 0 : i32
    %c0_i32_1 = arith.constant 0 : i32
    return %c0_i32, %c0_i32_0 : i32, i32
  }
  func.func @transform_15(%arg0: i32) -> (i32, i32) {
    %c0_i32 = arith.constant 0 : i32
    %c0_i32_0 = arith.constant 0 : i32
    %c0_i32_1 = arith.constant 0 : i32
    return %c0_i32, %c0_i32_0 : i32, i32
  }
  func.func @transform_16(%arg0: i32) -> (i32, i32) {
    %c0_i32 = arith.constant 0 : i32
    %c0_i32_0 = arith.constant 0 : i32
    %c0_i32_1 = arith.constant 0 : i32
    return %c0_i32, %c0_i32_0 : i32, i32
  }
  func.func @transform_17(%arg0: i32) -> (i32, i32, i32) {
    %c0_i32 = arith.constant 0 : i32
    %c0_i32_0 = arith.constant 0 : i32
    %c0_i32_1 = arith.constant 0 : i32
    return %arg0, %c0_i32, %c0_i32_0 : i32, i32, i32
  }
}

</mosaic_0001>

<bundles_post_ra>
// kernel: tpu_custom_call.1
= control target key start
LH: loop header
LB: loop body
LE: loop exit
PB: predicated region body
PF: predicated region fallthrough
CT: control target
= control target key end

     0   :  { %s9530_s0 = inlined_call_operand.vmem [shape: bf16[2,144,128], index: 0, kind: input, shape index: {}]   ;;  %s9531_s1 = inlined_call_operand.vmem [shape: s32[144,1], index: 1, kind: input, shape index: {}]   ;;  %s9532_s2 = inlined_call_operand.vmem [shape: bf16[128,128], index: 2, kind: input, shape index: {}]   ;;  %s9533_s3 = inlined_call_operand.vmem [shape: f32[1,128], index: 3, kind: input, shape index: {}]   ;;  %s9534_s4 = inlined_call_operand.vmem [shape: bf16[64,128], index: 4, kind: input, shape index: {}]   ;;  %s9535_s5 = inlined_call_operand.vmem [shape: f32[1,128], index: 5, kind: input, shape index: {}]   ;;  %s9536_s6 = inlined_call_operand.hbm [shape: f32[9,64], index: 6, kind: input, shape index: {}]   ;;  %s9537_s7 = inlined_call_operand.vmem [shape: f32[1,64], index: 7, kind: input, shape index: {}]   ;;  %s9538_s8 = inlined_call_operand.hbm [shape: bf16[64,64], index: 8, kind: input, shape index: {}]   ;;  %s9539_s9 = inlined_call_operand.vmem [shape: f32[1,64], index: 9, kind: input, shape index: {}]   ;;  %s9540_s10 = inlined_call_operand.hbm [shape: bf16[64,128], index: 10, kind: input, shape index: {}]   ;;  %s9541_s11 = inlined_call_operand.vmem [shape: f32[1,128], index: 11, kind: input, shape index: {}]   ;;  %s9542_s12 = inlined_call_operand.vmem [shape: bf16[128,64], index: 12, kind: input, shape index: {}]   ;;  %s9543_s13 = inlined_call_operand.vmem [shape: f32[1,64], index: 13, kind: input, shape index: {}]   ;;  %s9544_s14 = inlined_call_operand.hbm [shape: bf16[64,128], index: 14, kind: input, shape index: {}]   ;;  %s9545_s15 = inlined_call_operand.hbm [shape: bf16[64,128], index: 15, kind: input, shape index: {}]   ;;  %s9546_s16 = inlined_call_operand.vmem [shape: f32[1,128], index: 16, kind: input, shape index: {}]   ;;  %s9547_s17 = inlined_call_operand.hbm [shape: f32[2,144,128], index: 17, kind: output, shape index: {}]  }
   0x1   :  { %9694 = sst [smem:[#allocation96_spill]] %s9530_s0 }
   0x2   :  { %9695 = sst [smem:[#allocation97_spill]] %s9531_s1 }
   0x3   :  { %9696 = sst [smem:[#allocation98_spill]] %s9538_s8 }
   0x4   :  { %9697 = sst [smem:[#allocation99_spill]] %s9543_s13 }
   0x5   :  { %9698 = sst [smem:[#allocation100_spill]] %s9544_s14 }
   0x6   :  { %9699 = sst [smem:[#allocation101_spill]] %s9546_s16 }
   0x7   :  { %9700 = sst [smem:[#allocation102_spill]] %s9547_s17 }
   0x8   :  { %22 = vsyncpa [#allocation7], 0 }
   0x9   :  { %23 = vsyncpa [#allocation10], 0 }
   0xa   :  { %24 = vsyncpa [#allocation13], 0 }
   0xb   :  { %25 = vsyncpa [#allocation8], 0 }
   0xc   :  { %27 = vsyncpa [#allocation8 + $0x1], 0  ;;  %s6436_s24 = smov 0   ;;  %s6438_s25 = smov 0  }
   0xd   :  { %s6440_s26 = smov 0   ;;  %s6442_s27 = smov 0  }
   0xe LB: > { %9701 = sst [smem:[#allocation20_spill]] %s6315_s24  ;;  %s6457_s28 = sadd.s32 4294967295, %s6327_s27   ;;  %s6327_s27 = sphi %s6442_s27, %s9946_s27   ;;  %s6323_s26 = sphi %s6440_s26, %s9949_s26   ;;  %s6319_s25 = sphi %s6438_s25, %s9948_s25   ;;  %s6315_s24 = sphi %s6436_s24, %s9947_s24  }
   0xf   : > { %9702 = sst [smem:[#allocation21_spill]] %s6319_s25  ;;  %s5059_s29 = sadd.s32 4294967294, %s6327_s27  }
  0x10   : > { %9703 = sst [smem:[#allocation22_spill]] %s6323_s26  ;;  %s6461_s0 = sadd.s32 1, %s6327_s27  }
  0x11   : > { %9704 = sst [smem:[#allocation23_spill]] %s6327_s27  ;;  %s402_s30 = sadd.s32 1, %s6323_s26 }
  0x12   : > { %9705 = sst [smem:[#allocation24_spill]] %s6461_s0  ;;  %s399_s18 = ssub.s32 %s6327_s27, %s6461_s0 }
  0x13   : > { %p412_p0 = scmp.ne.s32.totalorder %s6323_s26, %s6319_s25  ;;  %p400_p1 = scmp.eq.s32.totalorder %s399_s18, 0 }
  0x14   : > { %p413_p2 = scmp.eq.s32.totalorder %s6457_s28, 1  ;;  %p418_p3 = scmp.ne.s32.totalorder %s6319_s25, %s6315_s24 }
  0x15   : > { %p419_p4 = scmp.eq.s32.totalorder %s5059_s29, 1  ;;  %p5060_p7 = scmp.ge.s32.totalorder %s6327_s27, 1 }
  0x16   : > { %s6472_s19 = scalar_select %p400_p1, %s6323_s26, %s402_s30  }
  0x17   : > { %p6474_p5 = por %p413_p2, %p412_p0  ;;  %p6478_p6 = por %p419_p4, %p418_p3 }
  0x18   : > { %9706 = sst [smem:[#allocation25_spill]] %s6472_s19  ;;  %p426_p8 = scmp.lt.s32.totalorder %s6327_s27, 3 }
  0x19   : > { %s9707_s1 = scalar_select %p6474_p5, 1, 0 }
  0x1a   : > { %s9709_s20 = scalar_select %p6478_p6, 1, 0 }
  0x1b   : > { %9708 = sst [smem:[#allocation26_spill]] %s9707_s1  ;;  %p9556_p9 = scmp.eq.s32.totalorder %s6457_s28, 0 }
  0x1c   : > { %9710 = sst [smem:[#allocation27_spill]] %s9709_s20  ;;  %p6485_p10 = pnand %p5060_p7, %p426_p8 }
  0x1d   : > { %s6329_s22 = smov [#allocation9]   ;;  %s6330_s30 = smov [#allocation12]  }
  0x1e   : > { %s9711_s21 = scalar_select %p6485_p10, 1, 0 }
  0x1f   : > { %s469_s23 = sshll.u32 %s6329_s22, 4  ;;  %p5649_p11 = pneg %p6485_p10  ;;  %s6491_s23 = int_to_ptr.vmem [resolvable:$true] %s469_s23 }
  0x20   : > { %s507_s18 = sshll.u32 %s6330_s30, 4  ;;  %s6331_s19 = smov [#allocation6]   ;;  %s6499_s18 = int_to_ptr.vmem [resolvable:$true] %s507_s18 }
  0x21   : > { %p6495_p12 = pnand %p9556_p9, %p5649_p11  ;;  %s6501_s26 = sshll.u32 %s6331_s19, 4  ;;  %s454_s26 = int_to_ptr.vmem [resolvable:$true] %s6501_s26 }
  0x22   : > { %s9713_s8 = sld [smem:[#allocation98_spill]] }
  0x23   : > { %p6511_p0 = pneg %p6495_p12 }
  0x28   : > { %s6113_s22 = scalar_lea.hbm %s9713_s8, 512 }
  0x29   : > { %p6114_p13 = scmp.ne.s32.totalorder %s9713_s8, %s6113_s22  ;;  %p6120_p3 = scmp.lt.u32.totalorder %s6113_s22, %s9713_s8 }
  0x2b   : > { %p6116_p1 = pnand %p6511_p0, %p6114_p13 }
  0x2d   : > { %p6117_p2 = pneg %p6116_p1 }
  0x2f   : > { %p6122_p4 = pnand %p6120_p3, %p6117_p2 }
  0x31   : > { %6125 = shalt.err (!%p6122_p4)
}
  0x32   : > { %s6126_s24 = scalar_lea.vmem %s6491_s23, 512  ;;  %p6134_p9 = scmp.lt.s32.totalorder %s6491_s23, %s6491_s23 }
  0x33   : > { %p6127_p7 = scmp.ne.s32.totalorder %s6491_s23, %s6126_s24  ;;  %p6135_p6 = scmp.lt.s32.totalorder %s6126_s24, %s6126_s24 }
  0x35   : > { %p6129_p8 = pnand %p6127_p7, %p6511_p0  ;;  %p6136_p13 = por %p6135_p6, %p6134_p9 }
  0x37   : > { %p6130_p11 = pneg %p6129_p8 }
  0x39   : > { %p6137_p1 = pnand %p6136_p13, %p6130_p11 }
  0x3b   : > { %6140 = shalt.err (!%p6137_p1)
}
  0x3c   : > { %s9563_s27 = smov 64   ;;  %s9565_s0 = smov 4  }
  0x3d   : > { %5655 = dma.hbm_to_vmem [thread:$0]  (!%p6495_p12), %s9713_s8, 512, %s6491_s23, [#allocation10], %s9563_s27, %s9563_s27, %s9565_s0  }
  0x3e   : > { %s9715_s14 = sld [smem:[#allocation100_spill]] }
  0x44   : > { %s6141_s24 = scalar_lea.hbm %s9715_s14, 512 }
  0x45   : > { %p6142_p6 = scmp.ne.s32.totalorder %s9715_s14, %s6141_s24  ;;  %p6148_p3 = scmp.lt.u32.totalorder %s6141_s24, %s9715_s14 }
  0x47   : > { %p6144_p9 = pnand %p6142_p6, %p6511_p0 }
  0x49   : > { %p6145_p2 = pneg %p6144_p9 }
  0x4b   : > { %p6150_p4 = pnand %p6148_p3, %p6145_p2 }
  0x4d   : > { %6153 = shalt.err (!%p6150_p4)
}
  0x4e   : > { %s6154_s23 = scalar_lea.vmem %s6499_s18, 512  ;;  %p6162_p13 = scmp.lt.s32.totalorder %s6499_s18, %s6499_s18 }
  0x4f   : > { %p6155_p7 = scmp.ne.s32.totalorder %s6499_s18, %s6154_s23  ;;  %p6163_p1 = scmp.lt.s32.totalorder %s6154_s23, %s6154_s23 }
  0x51   : > { %p6157_p8 = pnand %p6155_p7, %p6511_p0  ;;  %p6164_p6 = por %p6163_p1, %p6162_p13 }
  0x53   : > { %p6158_p11 = pneg %p6157_p8 }
  0x55   : > { %p6165_p9 = pnand %p6164_p6, %p6158_p11 }
  0x57   : > { %6168 = shalt.err (!%p6165_p9)
}
  0x58   : > { %5661 = dma.hbm_to_vmem [thread:$0]  (!%p6495_p12), %s9715_s14, 512, %s6499_s18, [#allocation13], %s9563_s27, %s9563_s27, %s9565_s0  }
  0x59   : > { %s6169_s20 = scalar_lea.hbm %s9536_s6, 256 }
  0x5a   : > { %p6170_p2 = scmp.ne.s32.totalorder %s9536_s6, %s6169_s20  ;;  %p6176_p7 = scmp.lt.u32.totalorder %s6169_s20, %s9536_s6 }
  0x5c   : > { %p6172_p3 = pnand %p6170_p2, %p6511_p0 }
  0x5e   : > { %p6173_p4 = pneg %p6172_p3 }
  0x60   : > { %p6178_p8 = pnand %p6176_p7, %p6173_p4 }
  0x62   : > { %6181 = shalt.err (!%p6178_p8)
}
  0x63   : > { %s6182_s23 = scalar_lea.vmem %s454_s26, 256  ;;  %p6190_p6 = scmp.lt.s32.totalorder %s454_s26, %s454_s26 }
  0x64   : > { %p6183_p11 = scmp.ne.s32.totalorder %s454_s26, %s6182_s23  ;;  %p6191_p9 = scmp.lt.s32.totalorder %s6182_s23, %s6182_s23 }
  0x66   : > { %p6185_p13 = pnand %p6183_p11, %p6511_p0  ;;  %p6192_p5 = por %p6191_p9, %p6190_p6 }
  0x68   : > { %p6186_p1 = pneg %p6185_p13 }
  0x6a   : > { %p6193_p10 = pnand %p6192_p5, %p6186_p1 }
  0x6c   : > { %6196 = shalt.err (!%p6193_p10)
}
  0x6d   : > { %s6334_s18 = smov 128   ;;  %s6335_s13 = smov 8  }
  0x6e   : > { %5652 = dma.hbm_to_vmem [thread:$0]  (!%p6495_p12), %s9536_s6, 256, %s454_s26, [#allocation7], %s6334_s18, %s6334_s18, %s6335_s13  }
  0x6f   : > { %s6336_s1 = smov [#allocation11]   ;;  %s6337_s22 = smov [#allocation14]  }
  0x70   : > { %s485_s20 = sshll.u32 %s6336_s1, 4  ;;  %s520_s30 = sshll.u32 %s6337_s22, 4  ;;  %s486_s20 = int_to_ptr.vmem [resolvable:$true] %s485_s20  ;;  %s521_s30 = int_to_ptr.vmem [resolvable:$true] %s520_s30 }
  0x71   : > { %s6197_s23 = scalar_lea.hbm %s9540_s10, 512 }
  0x72   : > { %p6198_p5 = scmp.ne.s32.totalorder %s9540_s10, %s6197_s23  ;;  %p6204_p3 = scmp.lt.u32.totalorder %s6197_s23, %s9540_s10 }
  0x74   : > { %p6200_p10 = pnand %p6198_p5, %p6511_p0 }
  0x76   : > { %p6201_p2 = pneg %p6200_p10 }
  0x78   : > { %p6206_p4 = pnand %p6204_p3, %p6201_p2 }
  0x7a   : > { %6209 = shalt.err (!%p6206_p4)
}
  0x7b   : > { %s6210_s26 = scalar_lea.vmem %s486_s20, 512  ;;  %p6218_p13 = scmp.lt.s32.totalorder %s486_s20, %s486_s20 }
  0x7c   : > { %p6211_p7 = scmp.ne.s32.totalorder %s486_s20, %s6210_s26  ;;  %p6219_p1 = scmp.lt.s32.totalorder %s6210_s26, %s6210_s26 }
  0x7e   : > { %p6213_p8 = pnand %p6211_p7, %p6511_p0  ;;  %p6220_p6 = por %p6219_p1, %p6218_p13 }
  0x80   : > { %p6214_p11 = pneg %p6213_p8 }
  0x82   : > { %p6221_p9 = pnand %p6220_p6, %p6214_p11 }
  0x84   : > { %6224 = shalt.err (!%p6221_p9)
}
  0x85   : > { %s9716_s27 = smov 4   ;;  %s9717_s0 = smov 64  }
  0x86   : > { %5658 = dma.hbm_to_vmem [thread:$0]  (!%p6495_p12), %s9540_s10, 512, %s486_s20, [#allocation10], %s9717_s0, %s9717_s0, %s9716_s27  }
  0x87   : > { %s6225_s16 = scalar_lea.hbm %s9545_s15, 512 }
  0x88   : > { %p6226_p5 = scmp.ne.s32.totalorder %s9545_s15, %s6225_s16  ;;  %p6232_p3 = scmp.lt.u32.totalorder %s6225_s16, %s9545_s15 }
  0x8a   : > { %p6228_p10 = pnand %p6226_p5, %p6511_p0 }
  0x8c   : > { %p6229_p2 = pneg %p6228_p10 }
  0x8e   : > { %p6234_p4 = pnand %p6232_p3, %p6229_p2 }
  0x90   : > { %6237 = shalt.err (!%p6234_p4)
}
  0x91   : > { %s6238_s24 = scalar_lea.vmem %s521_s30, 512  ;;  %p6246_p13 = scmp.lt.s32.totalorder %s521_s30, %s521_s30 }
  0x92   : > { %p6239_p7 = scmp.ne.s32.totalorder %s521_s30, %s6238_s24  ;;  %p6247_p1 = scmp.lt.s32.totalorder %s6238_s24, %s6238_s24 }
  0x94   : > { %p6241_p8 = pnand %p6239_p7, %p6511_p0  ;;  %p6248_p6 = por %p6247_p1, %p6246_p13 }
  0x96   : > { %p6242_p11 = pneg %p6241_p8 }
  0x98   : > { %p6249_p9 = pnand %p6248_p6, %p6242_p11 }
  0x9a   : > { %6252 = shalt.err (!%p6249_p9)
}
  0x9b   : > { %5664 = dma.hbm_to_vmem [thread:$0]  (!%p6495_p12), %s9545_s15, 512, %s521_s30, [#allocation13], %s9717_s0, %s9717_s0, %s9716_s27  }
  0x9c   : > { %p9718_p5 = scmp.ne.s32.totalorder %s9711_s21, 0 }
  0x9e   : > { %547 = sbr.rel (%p9718_p5) target bundleno = 2847 (0xb1f), region = 88 }
  0xa5   : > { %p9719_p0 = scmp.eq.s32.totalorder %s6457_s28, 0 }
  0xa7   : > { %6298 = dma.done.wait (%p9719_p0), [#allocation7], 256   ;;  %p9720_p10 = pmov %p9719_p0 }
  0xa8   : > { %p9721_p2 = pmov %p9719_p0 }
  0xa9   : > { %6300 = vsyncadd (%p9720_p10), [#allocation7], 4294967040 }
  0xaa   : > { %6302 = dma.done.wait (%p9721_p2), [#allocation10], 1024   ;;  %p9722_p3 = pmov %p9719_p0 }
  0xab   : > { %p9723_p4 = pmov %p9719_p0 }
  0xac   : > { %6304 = vsyncadd (%p9722_p3), [#allocation10], 4294966272 }
  0xad   : > { %6306 = dma.done.wait (%p9723_p4), [#allocation13], 1024   ;;  %p9724_p12 = pmov %p9719_p0 }
  0xae   : > { %v9567_v0 = vmov 0.0   ;;  %vm6339_vm0 = vmmov 0   ;;  %p615_p7 = scmp.lt.s32.totalorder %s6457_s28, 1  ;;  %v5740_v1 = vld [vmem:[%s9532_s2] sm:$0xff]   ;;  %v5741_v2 = vld [vmem:[%s9532_s2 + $0x8] sm:$0xff]   ;;  %v5742_v3 = vld [vmem:[%s9532_s2 + $0x10] sm:$0xff]  }
  0xaf   : > { %6308 = vsyncadd (%p9724_p12), [#allocation13], 4294966272  ;;  %5292 = vmatprep.subr.bf16.mxu0 %v9567_v0  ;;  %5308 = vmatprep.mubr.msk.bf16.mxu0 %vm6339_vm0, %v9567_v0  ;;  %s9725_s13 = sld [smem:[#allocation96_spill]]  ;;  %v5743_v4 = vld [vmem:[%s9532_s2 + $0x18] sm:$0xff]   ;;  %v5744_v5 = vld [vmem:[%s9532_s2 + $0x20] sm:$0xff]   ;;  %vm986_vm1 = vcmask 523264  }
  0xb0   : > { %5344 = vmatprep.subr.bf16.mxu1 %v9567_v0  ;;  %5352 = vmatprep.mubr.msk.bf16.mxu1 %vm6339_vm0, %v9567_v0  ;;  %s616_s17 = scalar_select %p615_p7, %s6457_s28, 1  ;;  %v5745_v6 = vld [vmem:[%s9532_s2 + $0x28] sm:$0xff]   ;;  %v5746_v7 = vld [vmem:[%s9532_s2 + $0x30] sm:$0xff]   ;;  %v5747_v8 = vld [vmem:[%s9532_s2 + $0x38] sm:$0xff]   ;;  %vm1293_vm2 = vcmask 261120  }
  0xb1   : > { %5293 = vmatpush3.bf16.msra.mxu0 %v5740_v1  ;;  %v5757_v18 = vld [vmem:[%s9534_s4] sm:$0xff]   ;;  %v5758_v19 = vld [vmem:[%s9534_s4 + $0x8] sm:$0xff]   ;;  %v5759_v20 = vld [vmem:[%s9534_s4 + $0x10] sm:$0xff]   ;;  %s6340_s1 = smov 64   ;;  %s6342_s24 = smov 96  }
  0xb2   : > { %5294 = vmatprep.subr.bf16.mxu0 %v9567_v0  ;;  %s5625_s27 = smul.u32 72, %s616_s17  ;;  %5345 = vmatpush3.bf16.msra.mxu1 %v5757_v18  ;;  %v5760_v21 = vld [vmem:[%s9534_s4 + $0x18] sm:$0xff]   ;;  %v6723_v22 = vld [vmem:[%s9533_s3] ss:$0 sm:$0xff]  ;;  %s9756_s17 = sld [smem:[#allocation97_spill]] }
  0xb3   : > { %5346 = vmatprep.subr.bf16.mxu1 %v9567_v0  ;;  %s9937_s22 = sld [smem:[#allocation101_spill]]  ;;  %s9938_s19 = sld [smem:[#allocation21_spill]] }
  0xb4   : > { %s9939_s21 = sld [smem:[#allocation26_spill]]  ;;  %s5626_s29 = smul.u32 2304, %s6457_s28 }
  0xb5   : > { %5295 = vmatpush3.bf16.msra.mxu0 %v5741_v2  ;;  %s6658_s16 = scalar_lea.vmem %s9725_s13, %s5625_s27  ;;  %s9936_s13 = sld [smem:[#allocation99_spill]] }
  0xb6   : > { %5296 = vmatprep.subr.bf16.mxu0 %v9567_v0  ;;  %v5748_v9 = vld [vmem:[%s6658_s16] sm:$0xff]   ;;  %v5749_v10 = vld [vmem:[%s6658_s16 + $0x8] sm:$0xff]   ;;  %v5750_v11 = vld [vmem:[%s6658_s16 + $0x10] sm:$0xff]   ;;  %5347 = vmatpush3.bf16.msra.mxu1 %v5758_v19  ;;  %s9940_s0 = sld [smem:[#allocation102_spill]]  ;;  %s6343_s14 = smov [#allocation15]  }
  0xb7   : > { %v5751_v12 = vld [vmem:[%s6658_s16 + $0x18] sm:$0xff]   ;;  %v5752_v13 = vld [vmem:[%s6658_s16 + $0x20] sm:$0xff]   ;;  %v5753_v14 = vld [vmem:[%s6658_s16 + $0x28] sm:$0xff]   ;;  %5348 = vmatprep.subr.bf16.mxu1 %v9567_v0  ;;  %s6257_s18 = sshll.u32 %s6343_s14, 4  ;;  %s6258_s18 = int_to_ptr.vmem [resolvable:$false] %s6257_s18 }
  0xb8   : > { %v5754_v15 = vld [vmem:[%s6658_s16 + $0x30] sm:$0xff]   ;;  %v5755_v16 = vld [vmem:[%s6658_s16 + $0x38] sm:$0xff]   ;;  %v5756_v17 = vld [vmem:[%s6658_s16 + $0x40] sm:$0xff]  }
  0xb9   : > { %5297 = vmatpush3.bf16.msra.mxu0 %v5742_v3 }
  0xba   : > { %5298 = vmatprep.subr.bf16.mxu0 %v9567_v0  ;;  %5349 = vmatpush3.bf16.msra.mxu1 %v5759_v20  ;;  %p9941_p11 = scmp.ne.s32.totalorder %s9939_s21, 0 }
  0xbb   : > { %5350 = vmatprep.subr.bf16.mxu1 %v9567_v0 }
  0xbd   : > { %5299 = vmatpush3.bf16.msra.mxu0 %v5743_v4 }
  0xbe   : > { %5300 = vmatprep.subr.bf16.mxu0 %v9567_v0  ;;  %5351 = vmatpush3.bf16.msra.mxu1 %v5760_v21 }
  0xc1   : > { %5301 = vmatpush3.bf16.msra.mxu0 %v5744_v5 }
  0xc2   : > { %5302 = vmatprep.subr.bf16.mxu0 %v9567_v0 }
  0xc5   : > { %5303 = vmatpush3.bf16.msra.mxu0 %v5745_v6 }
  0xc6   : > { %5304 = vmatprep.subr.bf16.mxu0 %v9567_v0 }
  0xc9   : > { %5305 = vmatpush3.bf16.msra.mxu0 %v5746_v7 }
  0xca   : > { %5306 = vmatprep.subr.bf16.mxu0 %v9567_v0 }
  0xcd   : > { %5307 = vmatpush3.bf16.msra.mxu0 %v5747_v8 }
  0xd0   : > { %5309 = vmatmul.mubr.bf16.vlgmr.msra.gmra.mrb[0].mxu0 %v5748_v9 }
  0xd1   : > { %5312 = vmatprep.mubr.msk.bf16.mxu0 %vm6339_vm0, %v9567_v0 }
  0xd8   : > { %5313 = vmatmul.mubr.bf16.gmra.mrb[4].mxu0 %v5749_v10 }
  0xd9   : > { %5316 = vmatprep.mubr.msk.bf16.mxu0 %vm6339_vm0, %v9567_v0 }
  0xe0   : > { %5317 = vmatmul.mubr.bf16.gmra.mrb[8].mxu0 %v5750_v11 }
  0xe1   : > { %5320 = vmatprep.mubr.msk.bf16.mxu0 %vm6339_vm0, %v9567_v0 }
  0xe8   : > { %5321 = vmatmul.mubr.bf16.gmra.mrb[12].mxu0 %v5751_v12 }
  0xe9   : > { %5324 = vmatprep.mubr.msk.bf16.mxu0 %vm6339_vm0, %v9567_v0 }
  0xf0   : > { %5325 = vmatmul.mubr.bf16.gmra.mrb[16].mxu0 %v5752_v13 }
  0xf1   : > { %5328 = vmatprep.mubr.msk.bf16.mxu0 %vm6339_vm0, %v9567_v0 }
  0xf8   : > { %5329 = vmatmul.mubr.bf16.gmra.mrb[20].mxu0 %v5753_v14 }
  0xf9   : > { %5332 = vmatprep.mubr.msk.bf16.mxu0 %vm6339_vm0, %v9567_v0 }
 0x100   : > { %5333 = vmatmul.mubr.bf16.gmra.mrb[24].mxu0 %v5754_v15 }
 0x101   : > { %5336 = vmatprep.mubr.msk.bf16.mxu0 %vm6339_vm0, %v9567_v0 }
 0x108   : > { %5337 = vmatmul.mubr.bf16.gmra.mrb[28].mxu0 %v5755_v16 }
 0x109   : > { %5340 = vmatprep.mubr.msk.bf16.mxu0 %vm6339_vm0, %v9567_v0 }
 0x110   : > { %5341 = vmatmul.mubr.bf16.gmra.mrb[32].mxu0 %v5756_v17 }
 0x1a3   : > { %v798_v23 = vpop.f32.mrb[0].mxu0 }
 0x1a4   : > { %v799_v24 = vadd.f32 %v6723_v22, %v798_v23  ;;  %v5310_v25 = vpop.f32.mrb[1].mxu0 }
 0x1a5   : > { %v801_v26 = vpop.f32.mrb[2].mxu0 }
 0x1a6   : > { %v869_v27 = vsub.f32 0.0, %v799_v24  ;;  %v802_v28 = vadd.f32 %v6723_v22, %v801_v26  ;;  %v5311_v29 = vpop.f32.mrb[3].mxu0 }
 0x1a8   : > { %v887_v30 = vmul.f32 1.442695, %v869_v27  ;;  %v870_v31 = vsub.f32 0.0, %v802_v28 }
 0x1aa   : > { %5785 = vpow2.f32 %v887_v30  ;;  %v889_v32 = vmul.f32 1.442695, %v870_v31 }
 0x1ab   : > { %v806_v33 = vpop.f32.mrb[4].mxu0 }
 0x1ac   : > { %5787 = vpow2.f32 %v889_v32  ;;  %v6728_v34 = vadd.f32 %v6723_v22, %v806_v33  ;;  %v5314_v35 = vpop.f32.mrb[5].mxu0 }
 0x1ad   : > { %v809_v36 = vpop.f32.mrb[6].mxu0 }
 0x1ae   : > { %v871_v37 = vsub.f32 0.0, %v6728_v34  ;;  %v6732_v38 = vadd.f32 %v6723_v22, %v809_v36  ;;  %v5315_v39 = vpop.f32.mrb[7].mxu0 }
 0x1b0   : > { %v891_v40 = vmul.f32 1.442695, %v871_v37  ;;  %v872_v41 = vsub.f32 0.0, %v6732_v38 }
 0x1b2   : > { %5789 = vpow2.f32 %v891_v40  ;;  %v893_v42 = vmul.f32 1.442695, %v872_v41 }
 0x1b3   : > { %v814_v43 = vpop.f32.mrb[8].mxu0 }
 0x1b4   : > { %v5786_v44 = vpop.eup %5785  ;;  %5791 = vpow2.f32 %v893_v42  ;;  %v6736_v45 = vadd.f32 %v6723_v22, %v814_v43  ;;  %v5318_v46 = vpop.f32.mrb[9].mxu0 }
 0x1b5   : > { %v923_v47 = vadd.f32 1.0, %v5786_v44  ;;  %v817_v48 = vpop.f32.mrb[10].mxu0 }
 0x1b6   : > { %v5788_v49 = vpop.eup %5787  ;;  %v873_v50 = vsub.f32 0.0, %v6736_v45  ;;  %v6740_v51 = vadd.f32 %v6723_v22, %v817_v48  ;;  %v5319_v52 = vpop.f32.mrb[11].mxu0 }
 0x1b7   : > { %5793 = vrcp.f32 %v923_v47  ;;  %v924_v53 = vadd.f32 1.0, %v5788_v49 }
 0x1b8   : > { %v895_v54 = vmul.f32 1.442695, %v873_v50  ;;  %v874_v55 = vsub.f32 0.0, %v6740_v51 }
 0x1b9   : > { %5795 = vrcp.f32 %v924_v53 }
 0x1ba   : > { %5797 = vpow2.f32 %v895_v54  ;;  %v897_v56 = vmul.f32 1.442695, %v874_v55 }
 0x1bb   : > { %v822_v57 = vpop.f32.mrb[12].mxu0 }
 0x1bc   : > { %v5790_v58 = vpop.eup %5789  ;;  %5799 = vpow2.f32 %v897_v56  ;;  %v6744_v59 = vadd.f32 %v6723_v22, %v822_v57  ;;  %v5322_v60 = vpop.f32.mrb[13].mxu0 }
 0x1bd   : > { %v925_v61 = vadd.f32 1.0, %v5790_v58  ;;  %v825_v62 = vpop.f32.mrb[14].mxu0 }
 0x1be   : > { %v5792_v63 = vpop.eup %5791  ;;  %v875_v1 = vsub.f32 0.0, %v6744_v59  ;;  %v6748_v2 = vadd.f32 %v6723_v22, %v825_v62  ;;  %v5323_v3 = vpop.f32.mrb[15].mxu0 }
 0x1bf   : > { %5801 = vrcp.f32 %v925_v61  ;;  %v926_v4 = vadd.f32 1.0, %v5792_v63 }
 0x1c0   : > { %v899_v5 = vmul.f32 1.442695, %v875_v1  ;;  %v876_v6 = vsub.f32 0.0, %v6748_v2 }
 0x1c1   : > { %v5794_v7 = vpop.eup %5793  ;;  %5803 = vrcp.f32 %v926_v4 }
 0x1c2   : > { %5805 = vpow2.f32 %v899_v5  ;;  %v901_v8 = vmul.f32 1.442695, %v876_v6  ;;  %v6751_v12 = vmul.f32 %v5794_v7, %v799_v24 }
 0x1c3   : > { %v5796_v9 = vpop.eup %5795  ;;  %v830_v10 = vpop.f32.mrb[16].mxu0 }
 0x1c4   : > { %v5798_v11 = vpop.eup %5797  ;;  %9726 = vst [vmem:[#allocation28_spill] sm:$0xff] %v6751_v12  ;;  %v6753_v13 = vmul.f32 %v5796_v9, %v802_v28  ;;  %5807 = vpow2.f32 %v901_v8  ;;  %v6756_v14 = vadd.f32 %v6723_v22, %v830_v10  ;;  %v5326_v15 = vpop.f32.mrb[17].mxu0 }
 0x1c5   : > { %v927_v16 = vadd.f32 1.0, %v5798_v11  ;;  %v833_v17 = vpop.f32.mrb[18].mxu0 }
 0x1c6   : > { %9727 = vst [vmem:[#allocation29_spill] sm:$0xff] %v6753_v13  ;;  %v5800_v18 = vpop.eup %5799  ;;  %v877_v19 = vsub.f32 0.0, %v6756_v14  ;;  %v6760_v20 = vadd.f32 %v6723_v22, %v833_v17  ;;  %v5327_v21 = vpop.f32.mrb[19].mxu0  ;;  %v977_v23 = vpack.c.bf16 %v6753_v13, %v6751_v12 }
 0x1c7   : > { %5809 = vrcp.f32 %v927_v16  ;;  %v928_v24 = vadd.f32 1.0, %v5800_v18 }
 0x1c8   : > { %v903_v25 = vmul.f32 1.442695, %v877_v19  ;;  %v878_v26 = vsub.f32 0.0, %v6760_v20  ;;  %1110 = vrot.lane.b32.xlu0 %v977_v23, %s6340_s1  ;;  %987 = vst.msk [vmem:[#allocation2] sm:$0xff] %vm986_vm1, %v977_v23 }
 0x1c9   : > { %v5802_v27 = vpop.eup %5801  ;;  %5811 = vrcp.f32 %v928_v24 }
 0x1ca   : > { %5813 = vpow2.f32 %v903_v25  ;;  %v905_v28 = vmul.f32 1.442695, %v878_v26  ;;  %v6768_v32 = vmul.f32 %v5802_v27, %v6728_v34 }
 0x1cb   : > { %v5804_v29 = vpop.eup %5803  ;;  %v838_v30 = vpop.f32.mrb[20].mxu0 }
 0x1cc   : > { %v5806_v31 = vpop.eup %5805  ;;  %9728 = vst [vmem:[#allocation30_spill] sm:$0xff] %v6768_v32  ;;  %v6771_v33 = vmul.f32 %v5804_v29, %v6732_v38  ;;  %5815 = vpow2.f32 %v905_v28  ;;  %v6774_v35 = vadd.f32 %v6723_v22, %v838_v30  ;;  %v5330_v36 = vpop.f32.mrb[21].mxu0 }
 0x1cd   : > { %v929_v37 = vadd.f32 1.0, %v5806_v31  ;;  %v841_v39 = vpop.f32.mrb[22].mxu0 }
 0x1ce   : > { %9729 = vst [vmem:[#allocation31_spill] sm:$0xff] %v6771_v33  ;;  %v5808_v40 = vpop.eup %5807  ;;  %v879_v41 = vsub.f32 0.0, %v6774_v35  ;;  %v6778_v42 = vadd.f32 %v6723_v22, %v841_v39  ;;  %v5331_v43 = vpop.f32.mrb[23].mxu0  ;;  %v978_v34 = vpack.c.bf16 %v6771_v33, %v6768_v32 }
 0x1cf   : > { %5817 = vrcp.f32 %v929_v37  ;;  %v930_v38 = vadd.f32 1.0, %v5808_v40 }
 0x1d0   : > { %v907_v44 = vmul.f32 1.442695, %v879_v41  ;;  %v880_v46 = vsub.f32 0.0, %v6778_v42  ;;  %1112 = vrot.lane.b32.xlu0 %v978_v34, %s6340_s1  ;;  %988 = vst.msk [vmem:[#allocation2 + $0x8] sm:$0xff] %vm986_vm1, %v978_v34 }
 0x1d1   : > { %v5810_v47 = vpop.eup %5809  ;;  %5819 = vrcp.f32 %v930_v38 }
 0x1d2   : > { %5821 = vpow2.f32 %v907_v44  ;;  %v909_v48 = vmul.f32 1.442695, %v880_v46  ;;  %v6786_v53 = vmul.f32 %v5810_v47, %v6736_v45 }
 0x1d3   : > { %v5812_v49 = vpop.eup %5811  ;;  %v846_v50 = vpop.f32.mrb[24].mxu0 }
 0x1d4   : > { %v5814_v52 = vpop.eup %5813  ;;  %9730 = vst [vmem:[#allocation32_spill] sm:$0xff] %v6786_v53  ;;  %v6789_v54 = vmul.f32 %v5812_v49, %v6740_v51  ;;  %5823 = vpow2.f32 %v909_v48  ;;  %v6792_v55 = vadd.f32 %v6723_v22, %v846_v50  ;;  %v5334_v56 = vpop.f32.mrb[25].mxu0 }
 0x1d5   : > { %v931_v57 = vadd.f32 1.0, %v5814_v52  ;;  %v849_v58 = vpop.f32.mrb[26].mxu0 }
 0x1d6   : > { %9731 = vst [vmem:[#allocation33_spill] sm:$0xff] %v6789_v54  ;;  %v5816_v60 = vpop.eup %5815  ;;  %v881_v61 = vsub.f32 0.0, %v6792_v55  ;;  %v6796_v62 = vadd.f32 %v6723_v22, %v849_v58  ;;  %v5335_v63 = vpop.f32.mrb[27].mxu0  ;;  %v979_v45 = vpack.c.bf16 %v6789_v54, %v6786_v53 }
 0x1d7   : > { %5825 = vrcp.f32 %v931_v57  ;;  %v932_v51 = vadd.f32 1.0, %v5816_v60 }
 0x1d8   : > { %v911_v1 = vmul.f32 1.442695, %v881_v61  ;;  %v882_v3 = vsub.f32 0.0, %v6796_v62  ;;  %1114 = vrot.lane.b32.xlu1 %v979_v45, %s6340_s1  ;;  %989 = vst.msk [vmem:[#allocation2 + $0x10] sm:$0xff] %vm986_vm1, %v979_v45 }
 0x1d9   : > { %v5818_v4 = vpop.eup %5817  ;;  %5827 = vrcp.f32 %v932_v51 }
 0x1da   : > { %5829 = vpow2.f32 %v911_v1  ;;  %v913_v5 = vmul.f32 1.442695, %v882_v3  ;;  %v6804_v9 = vmul.f32 %v5818_v4, %v6744_v59 }
 0x1db   : > { %v5820_v6 = vpop.eup %5819  ;;  %v854_v7 = vpop.f32.mrb[28].mxu0 }
 0x1dc   : > { %v5822_v8 = vpop.eup %5821  ;;  %9732 = vst [vmem:[#allocation34_spill] sm:$0xff] %v6804_v9  ;;  %v6807_v10 = vmul.f32 %v5820_v6, %v6748_v2  ;;  %5831 = vpow2.f32 %v913_v5  ;;  %v6810_v11 = vadd.f32 %v6723_v22, %v854_v7  ;;  %v5338_v15 = vpop.f32.mrb[29].mxu0 }
 0x1dd   : > { %v933_v16 = vadd.f32 1.0, %v5822_v8  ;;  %v857_v17 = vpop.f32.mrb[30].mxu0 }
 0x1de   : > { %9733 = vst [vmem:[#allocation35_spill] sm:$0xff] %v6807_v10  ;;  %v5824_v18 = vpop.eup %5823  ;;  %v883_v19 = vsub.f32 0.0, %v6810_v11  ;;  %v6814_v21 = vadd.f32 %v6723_v22, %v857_v17  ;;  %v5339_v23 = vpop.f32.mrb[31].mxu0  ;;  %v980_v59 = vpack.c.bf16 %v6807_v10, %v6804_v9 }
 0x1df   : > { %5833 = vrcp.f32 %v933_v16  ;;  %v934_v2 = vadd.f32 1.0, %v5824_v18 }
 0x1e0   : > { %v915_v24 = vmul.f32 1.442695, %v883_v19  ;;  %v884_v25 = vsub.f32 0.0, %v6814_v21  ;;  %1116 = vrot.lane.b32.xlu1 %v980_v59, %s6340_s1  ;;  %990 = vst.msk [vmem:[#allocation2 + $0x18] sm:$0xff] %vm986_vm1, %v980_v59 }
 0x1e1   : > { %v5826_v26 = vpop.eup %5825  ;;  %5835 = vrcp.f32 %v934_v2 }
 0x1e2   : > { %5837 = vpow2.f32 %v915_v24  ;;  %v917_v27 = vmul.f32 1.442695, %v884_v25  ;;  %v6822_v31 = vmul.f32 %v5826_v26, %v6756_v14 }
 0x1e3   : > { %v5828_v28 = vpop.eup %5827  ;;  %v862_v29 = vpop.f32.mrb[32].mxu0 }
 0x1e4   : > { %v5830_v30 = vpop.eup %5829  ;;  %9734 = vst [vmem:[#allocation36_spill] sm:$0xff] %v6822_v31  ;;  %v6825_v36 = vmul.f32 %v5828_v28, %v6760_v20  ;;  %5839 = vpow2.f32 %v917_v27  ;;  %v863_v37 = vadd.f32 %v6723_v22, %v862_v29  ;;  %v5342_v39 = vpop.f32.mrb[33].mxu0  ;;  %v9569_v28 = vmov 0   ;;  %v6904_v29 = vld [vmem:[%s9535_s5] ss:$0 sm:$0xff] }
 0x1e5   : > { %v935_v40 = vadd.f32 1.0, %v5830_v30  ;;  %v865_v41 = vpop.f32.mrb[34].mxu0  ;;  %5729 = vset.pattern.permute.xlu0 %v9569_v28  ;;  %5728 = vset.pattern.permute.xlu1 %v9569_v28 }
 0x1e6   : > { %9735 = vst [vmem:[#allocation37_spill] sm:$0xff] %v6825_v36  ;;  %v5832_v43 = vpop.eup %5831  ;;  %v885_v34 = vsub.f32 0.0, %v863_v37  ;;  %v866_v38 = vadd.f32 %v6723_v22, %v865_v41  ;;  %v5343_v44 = vpop.f32.mrb[35].mxu0  ;;  %v981_v46 = vpack.c.bf16 %v6825_v36, %v6822_v31  ;;  %3068 = vmatprep.subr.bf16.mxu1 %v9569_v28  ;;  %3624 = vmatprep.subr.bf16.mxu0 %v9569_v28 }
 0x1e7   : > { %5841 = vrcp.f32 %v935_v40  ;;  %v936_v14 = vadd.f32 1.0, %v5832_v43 }
 0x1e8   : > { %v919_v47 = vmul.f32 1.442695, %v885_v34  ;;  %v886_v48 = vsub.f32 0.0, %v866_v38  ;;  %1118 = vrot.lane.b32.xlu0 %v981_v46, %s6340_s1  ;;  %991 = vst.msk [vmem:[#allocation2 + $0x20] sm:$0xff] %vm986_vm1, %v981_v46 }
 0x1e9   : > { %v5834_v20 = vpop.eup %5833  ;;  %5843 = vrcp.f32 %v936_v14 }
 0x1ea   : > { %5845 = vpow2.f32 %v919_v47  ;;  %v921_v49 = vmul.f32 1.442695, %v886_v48  ;;  %v6834_v22 = vmul.f32 %v5834_v20, %v6774_v35 }
 0x1eb   : > { %v5836_v50 = vpop.eup %5835 }
 0x1ec   : > { %v5838_v52 = vpop.eup %5837  ;;  %9736 = vst [vmem:[#allocation38_spill] sm:$0xff] %v6834_v22  ;;  %v6837_v56 = vmul.f32 %v5836_v50, %v6778_v42  ;;  %5847 = vpow2.f32 %v921_v49 }
 0x1ed   : > { %v937_v57 = vadd.f32 1.0, %v5838_v52 }
 0x1ee   : > { %9737 = vst [vmem:[#allocation39_spill] sm:$0xff] %v6837_v56  ;;  %v5840_v58 = vpop.eup %5839  ;;  %v982_v60 = vpack.c.bf16 %v6837_v56, %v6834_v22 }
 0x1ef   : > { %5849 = vrcp.f32 %v937_v57  ;;  %v938_v61 = vadd.f32 1.0, %v5840_v58 }
 0x1f0   : > { %1120 = vrot.lane.b32.xlu1 %v982_v60, %s6340_s1  ;;  %992 = vst.msk [vmem:[#allocation2 + $0x28] sm:$0xff] %vm986_vm1, %v982_v60 }
 0x1f1   : > { %v5842_v63 = vpop.eup %5841  ;;  %5851 = vrcp.f32 %v938_v61 }
 0x1f2   : > { %v6844_v51 = vmul.f32 %v5842_v63, %v6792_v55 }
 0x1f3   : > { %v5844_v45 = vpop.eup %5843 }
 0x1f4   : > { %v5846_v35 = vpop.eup %5845  ;;  %9738 = vst [vmem:[#allocation40_spill] sm:$0xff] %v6844_v51  ;;  %v6847_v42 = vmul.f32 %v5844_v45, %v6796_v62 }
 0x1f5   : > { %v939_v1 = vadd.f32 1.0, %v5846_v35 }
 0x1f6   : > { %9739 = vst [vmem:[#allocation41_spill] sm:$0xff] %v6847_v42  ;;  %v5848_v3 = vpop.eup %5847  ;;  %v983_v4 = vpack.c.bf16 %v6847_v42, %v6844_v51 }
 0x1f7   : > { %5853 = vrcp.f32 %v939_v1  ;;  %v940_v5 = vadd.f32 1.0, %v5848_v3 }
 0x1f8   : > { %1122 = vrot.lane.b32.xlu0 %v983_v4, %s6340_s1  ;;  %993 = vst.msk [vmem:[#allocation2 + $0x30] sm:$0xff] %vm986_vm1, %v983_v4 }
 0x1f9   : > { %v5850_v6 = vpop.eup %5849  ;;  %5855 = vrcp.f32 %v940_v5 }
 0x1fa   : > { %v6854_v55 = vmul.f32 %v5850_v6, %v6810_v11 }
 0x1fb   : > { %v5852_v7 = vpop.eup %5851 }
 0x1fc   : > { %9740 = vst [vmem:[#allocation42_spill] sm:$0xff] %v6854_v55  ;;  %v6857_v62 = vmul.f32 %v5852_v7, %v6814_v21 }
 0x1fe   : > { %9741 = vst [vmem:[#allocation43_spill] sm:$0xff] %v6857_v62  ;;  %v984_v8 = vpack.c.bf16 %v6857_v62, %v6854_v55 }
 0x200   : > { %1124 = vrot.lane.b32.xlu1 %v984_v8, %s6340_s1  ;;  %994 = vst.msk [vmem:[#allocation2 + $0x38] sm:$0xff] %vm986_vm1, %v984_v8 }
 0x201   : > { %v5854_v15 = vpop.eup %5853 }
 0x202   : > { %v6863_v17 = vmul.f32 %v5854_v15, %v863_v37 }
 0x203   : > { %v5856_v16 = vpop.eup %5855 }
 0x204   : > { %9742 = vst [vmem:[#allocation44_spill] sm:$0xff] %v6863_v17  ;;  %v6865_v18 = vmul.f32 %v5856_v16, %v866_v38 }
 0x206   : > { %9743 = vst [vmem:[#allocation45_spill] sm:$0xff] %v6865_v18  ;;  %v985_v11 = vpack.c.bf16 %v6865_v18, %v6863_v17 }
 0x208   : > { %1126 = vrot.lane.b32.xlu0 %v985_v11, %s6340_s1  ;;  %995 = vst.msk [vmem:[#allocation2 + $0x40] sm:$0xff] %vm986_vm1, %v985_v11 }
 0x23a   : > { %v1111_v19 = vpop.permute.xlu0 %1110 }
 0x23b   : > { %5353 = vmatmul.mubr.msk.bf16.vlgmr.msra.gmra.mrb[0].mxu1 %vm986_vm1, %v1111_v19 }
 0x23c   : > { %5356 = vmatprep.mubr.msk.bf16.mxu1 %vm6339_vm0, %v9567_v0 }
 0x242   : > { %v1113_v21 = vpop.permute.xlu0 %1112 }
 0x243   : > { %5357 = vmatmul.mubr.msk.bf16.gmra.mrb[4].mxu1 %vm986_vm1, %v1113_v21 }
 0x244   : > { %5360 = vmatprep.mubr.msk.bf16.mxu1 %vm6339_vm0, %v9567_v0 }
 0x24a   : > { %v1115_v23 = vpop.permute.xlu1 %1114 }
 0x24b   : > { %5361 = vmatmul.mubr.msk.bf16.gmra.mrb[8].mxu1 %vm986_vm1, %v1115_v23 }
 0x24c   : > { %5364 = vmatprep.mubr.msk.bf16.mxu1 %vm6339_vm0, %v9567_v0 }
 0x252   : > { %v1117_v59 = vpop.permute.xlu1 %1116 }
 0x253   : > { %5365 = vmatmul.mubr.msk.bf16.gmra.mrb[12].mxu1 %vm986_vm1, %v1117_v59 }
 0x254   : > { %5368 = vmatprep.mubr.msk.bf16.mxu1 %vm6339_vm0, %v9567_v0 }
 0x25a   : > { %v1119_v2 = vpop.permute.xlu0 %1118 }
 0x25b   : > { %5369 = vmatmul.mubr.msk.bf16.gmra.mrb[16].mxu1 %vm986_vm1, %v1119_v2 }
 0x25c   : > { %5372 = vmatprep.mubr.msk.bf16.mxu1 %vm6339_vm0, %v9567_v0 }
 0x262   : > { %v1121_v24 = vpop.permute.xlu1 %1120 }
 0x263   : > { %5373 = vmatmul.mubr.msk.bf16.gmra.mrb[20].mxu1 %vm986_vm1, %v1121_v24 }
 0x264   : > { %5376 = vmatprep.mubr.msk.bf16.mxu1 %vm6339_vm0, %v9567_v0 }
 0x26a   : > { %v1123_v25 = vpop.permute.xlu0 %1122 }
 0x26b   : > { %5377 = vmatmul.mubr.msk.bf16.gmra.mrb[24].mxu1 %vm986_vm1, %v1123_v25 }
 0x26c   : > { %5380 = vmatprep.mubr.msk.bf16.mxu1 %vm6339_vm0, %v9567_v0 }
 0x272   : > { %v1125_v26 = vpop.permute.xlu1 %1124 }
 0x273   : > { %5381 = vmatmul.mubr.msk.bf16.gmra.mrb[28].mxu1 %vm986_vm1, %v1125_v26 }
 0x274   : > { %5384 = vmatprep.mubr.msk.bf16.mxu1 %vm6339_vm0, %v9567_v0 }
 0x27a   : > { %v1127_v27 = vpop.permute.xlu0 %1126 }
 0x27b   : > { %5385 = vmatmul.mubr.msk.bf16.gmra.mrb[32].mxu1 %vm986_vm1, %v1127_v27 }
 0x27c   : > { %3100 = vmatprep.mubr.bf16.mxu1 %v9569_v28 }
 0x30e   : > { %v1213_v30 = vpop.f32.mrb[0].mxu1 }
 0x30f   : > { %v5354_v37 = vpop.f32.mrb[1].mxu1  ;;  %v6907_v40 = vadd.f32 %v6904_v29, %v1213_v30 }
 0x310   : > { %v1216_v39 = vpop.f32.mrb[2].mxu1 }
 0x311   : > { %v6910_v41 = vadd.f32 %v6904_v29, %v1216_v39  ;;  %v5355_v43 = vpop.f32.mrb[3].mxu1 }
 0x313   : > { %v6914_v34 = vpack.c.bf16 %v6910_v41, %v6907_v40 }
 0x315   : > { %1294 = vst.msk [vmem:[#allocation4] sm:$0xff] %vm1293_vm2, %v6914_v34  ;;  %2996 = vrot.lane.b32.xlu1 %v6914_v34, %s6342_s24 }
 0x316   : > { %v1221_v38 = vpop.f32.mrb[4].mxu1 }
 0x317   : > { %v5358_v44 = vpop.f32.mrb[5].mxu1  ;;  %v6921_v14 = vadd.f32 %v6904_v29, %v1221_v38 }
 0x318   : > { %v1224_v46 = vpop.f32.mrb[6].mxu1 }
 0x319   : > { %v6924_v47 = vadd.f32 %v6904_v29, %v1224_v46  ;;  %v5359_v48 = vpop.f32.mrb[7].mxu1 }
 0x31b   : > { %v1285_v20 = vpack.c.bf16 %v6924_v47, %v6921_v14 }
 0x31d   : > { %1295 = vst.msk [vmem:[#allocation4 + $0x8] sm:$0xff] %vm1293_vm2, %v1285_v20  ;;  %2998 = vrot.lane.b32.xlu0 %v1285_v20, %s6342_s24 }
 0x31e   : > { %v1229_v49 = vpop.f32.mrb[8].mxu1 }
 0x31f   : > { %v5362_v50 = vpop.f32.mrb[9].mxu1  ;;  %v6931_v57 = vadd.f32 %v6904_v29, %v1229_v49 }
 0x320   : > { %v1232_v52 = vpop.f32.mrb[10].mxu1 }
 0x321   : > { %v6934_v58 = vadd.f32 %v6904_v29, %v1232_v52  ;;  %v5363_v60 = vpop.f32.mrb[11].mxu1 }
 0x323   : > { %9744 = vst [vmem:[#allocation46_spill] sm:$0xff] %v6934_v58  ;;  %v6938_v61 = vpack.c.bf16 %v6934_v58, %v6931_v57 }
 0x325   : > { %1296 = vst.msk [vmem:[#allocation4 + $0x10] sm:$0xff] %vm1293_vm2, %v6938_v61  ;;  %3000 = vrot.lane.b32.xlu1 %v6938_v61, %s6342_s24 }
 0x326   : > { %v1237_v63 = vpop.f32.mrb[12].mxu1 }
 0x327   : > { %v5366_v45 = vpop.f32.mrb[13].mxu1  ;;  %v6945_v1 = vadd.f32 %v6904_v29, %v1237_v63 }
 0x328   : > { %v1240_v35 = vpop.f32.mrb[14].mxu1 }
 0x329   : > { %v6948_v3 = vadd.f32 %v6904_v29, %v1240_v35  ;;  %v5367_v4 = vpop.f32.mrb[15].mxu1 }
 0x32b   : > { %9745 = vst [vmem:[#allocation47_spill] sm:$0xff] %v6948_v3  ;;  %v1287_v5 = vpack.c.bf16 %v6948_v3, %v6945_v1 }
 0x32d   : > { %1297 = vst.msk [vmem:[#allocation4 + $0x18] sm:$0xff] %vm1293_vm2, %v1287_v5  ;;  %3002 = vrot.lane.b32.xlu0 %v1287_v5, %s6342_s24 }
 0x32e   : > { %v1245_v6 = vpop.f32.mrb[16].mxu1 }
 0x32f   : > { %v5370_v7 = vpop.f32.mrb[17].mxu1  ;;  %v6955_v15 = vadd.f32 %v6904_v29, %v1245_v6 }
 0x330   : > { %v1248_v8 = vpop.f32.mrb[18].mxu1 }
 0x331   : > { %9746 = vst [vmem:[#allocation48_spill] sm:$0xff] %v6955_v15  ;;  %v6958_v16 = vadd.f32 %v6904_v29, %v1248_v8  ;;  %v5371_v11 = vpop.f32.mrb[19].mxu1 }
 0x332   : > { %v1305_v11 = vlaneseq }
 0x333   : > { %9747 = vst [vmem:[#allocation49_spill] sm:$0xff] %v6958_v16  ;;  %v1288_v19 = vpack.c.bf16 %v6958_v16, %v6955_v15 }
 0x335   : > { %1298 = vst.msk [vmem:[#allocation4 + $0x20] sm:$0xff] %vm1293_vm2, %v1288_v19  ;;  %3004 = vrot.lane.b32.xlu1 %v1288_v19, %s6342_s24 }
 0x336   : > { %v1253_v21 = vpop.f32.mrb[20].mxu1 }
 0x337   : > { %v5374_v23 = vpop.f32.mrb[21].mxu1  ;;  %v6965_v2 = vadd.f32 %v6904_v29, %v1253_v21 }
 0x338   : > { %v1256_v59 = vpop.f32.mrb[22].mxu1  ;;  %v7010_v23 = vshrl.u32 %v1305_v11, 7 }
 0x339   : > { %9748 = vst [vmem:[#allocation50_spill] sm:$0xff] %v6965_v2  ;;  %v6968_v24 = vadd.f32 %v6904_v29, %v1256_v59  ;;  %v5375_v25 = vpop.f32.mrb[23].mxu1 }
 0x33a   : > { %v7019_v59 = vadd.s32 8, %v7010_v23  ;;  %v1859_v31 = vsub.s32 2, %v7010_v23  ;;  %v2511_v13 = vsub.s32 6, %v7010_v23 }
 0x33b   : > { %9749 = vst [vmem:[#allocation51_spill] sm:$0xff] %v6968_v24  ;;  %v1289_v26 = vpack.c.bf16 %v6968_v24, %v6965_v2 }
 0x33c   : > { %vm1343_vm3 = vcmp.ge.s32.totalorder %v7019_v59, 12 }
 0x33d   : > { %1299 = vst.msk [vmem:[#allocation4 + $0x28] sm:$0xff] %vm1293_vm2, %v1289_v26  ;;  %3006 = vrot.lane.b32.xlu0 %v1289_v26, %s6342_s24 }
 0x33e   : > { %v1261_v27 = vpop.f32.mrb[24].mxu1 }
 0x33f   : > { %v5378_v30 = vpop.f32.mrb[25].mxu1  ;;  %v6975_v39 = vadd.f32 %v6904_v29, %v1261_v27 }
 0x340   : > { %v1264_v37 = vpop.f32.mrb[26].mxu1  ;;  %v1327_v30 = vld [vmem:[%s9756_s17 + $0x18] sm:$0xff] }
 0x341   : > { %9750 = vst [vmem:[#allocation52_spill] sm:$0xff] %v6975_v39  ;;  %v6978_v43 = vadd.f32 %v6904_v29, %v1264_v37  ;;  %v5379_v38 = vpop.f32.mrb[27].mxu1  ;;  %v1326_v37 = vld [vmem:[%s9756_s17 + $0x10] sm:$0xff]  ;;  %vm1381_vm9 = vcmp.ge.s32.totalorder %v1327_v30, 1  ;;  %vm1399_vm12 = vcmp.le.s32.totalorder %v1327_v30, 10 }
 0x342   : > { %vm1380_vm10 = vcmp.ge.s32.totalorder %v1326_v37, 1  ;;  %v7060_v38 = vsel %vm1381_vm9, 1, %v9569_v28  ;;  %vm1398_vm13 = vcmp.le.s32.totalorder %v1326_v37, 10 }
 0x343   : > { %9751 = vst [vmem:[#allocation53_spill] sm:$0xff] %v6978_v43  ;;  %v1290_v44 = vpack.c.bf16 %v6978_v43, %v6975_v39 }
 0x345   : > { %1300 = vst.msk [vmem:[#allocation4 + $0x30] sm:$0xff] %vm1293_vm2, %v1290_v44  ;;  %3008 = vrot.lane.b32.xlu1 %v1290_v44, %s6342_s24 }
 0x346   : > { %v1269_v46 = vpop.f32.mrb[28].mxu1 }
 0x347   : > { %v5382_v48 = vpop.f32.mrb[29].mxu1  ;;  %v6985_v50 = vadd.f32 %v6904_v29, %v1269_v46 }
 0x348   : > { %v1272_v49 = vpop.f32.mrb[30].mxu1 }
 0x349   : > { %9752 = vst [vmem:[#allocation54_spill] sm:$0xff] %v6985_v50  ;;  %v6988_v52 = vadd.f32 %v6904_v29, %v1272_v49  ;;  %v5383_v60 = vpop.f32.mrb[31].mxu1  ;;  %v7071_v49 = vsel %vm1399_vm12, 1, %v9569_v28 }
 0x34a   : > { %v7074_v60 = vsel %vm1398_vm13, 1, %v9569_v28 }
 0x34b   : > { %9753 = vst [vmem:[#allocation55_spill] sm:$0xff] %v6988_v52  ;;  %v1291_v63 = vpack.c.bf16 %v6988_v52, %v6985_v50 }
 0x34d   : > { %1301 = vst.msk [vmem:[#allocation4 + $0x38] sm:$0xff] %vm1293_vm2, %v1291_v63  ;;  %3010 = vrot.lane.b32.xlu0 %v1291_v63, %s6342_s24 }
 0x34e   : > { %v1277_v45 = vpop.f32.mrb[32].mxu1 }
 0x34f   : > { %v6995_v35 = vadd.f32 %v6904_v29, %v1277_v45  ;;  %v5386_v4 = vpop.f32.mrb[33].mxu1 }
 0x350   : > { %v1280_v6 = vpop.f32.mrb[34].mxu1 }
 0x351   : > { %9754 = vst [vmem:[#allocation56_spill] sm:$0xff] %v6995_v35  ;;  %v6998_v7 = vadd.f32 %v6904_v29, %v1280_v6  ;;  %3572 = vrot.lane.b32.xlu0 %v1285_v20, %s6340_s1  ;;  %v5387_v8 = vpop.f32.mrb[35].mxu1  ;;  %v2210_v29 = vsub.s32 4, %v7010_v23  ;;  %v7016_v20 = vld [vmem:[#allocation6] sm:$0xff] }
 0x353   : > { %9755 = vst [vmem:[#allocation57_spill] sm:$0xff] %v6998_v7  ;;  %v7003_v21 = vpack.c.bf16 %v6998_v7, %v6995_v35  ;;  %v2211_v25 = vrot.slane %v7016_v20, %v2210_v29 }
 0x354   : > { %v2985_v18 = vld [vmem:[#allocation4 + $0x38] sm:$0xff] }
 0x355   : > { %3576 = vrot.lane.b32.xlu0 %v1287_v5, %s6340_s1  ;;  %3012 = vrot.lane.b32.xlu1 %v7003_v21, %s6342_s24  ;;  %1302 = vst.msk [vmem:[#allocation4 + $0x40] sm:$0xff] %vm1293_vm2, %v7003_v21  ;;  %v1325_v5 = vld [vmem:[%s9756_s17 + $0x8] sm:$0xff]  ;;  %s612_s24 = sand.u32 1, %s9938_s19  }
 0x356   : > { %vm1397_vm4 = vcmp.le.s32.totalorder %v1325_v5, 10  ;;  %vm1379_vm5 = vcmp.ge.s32.totalorder %v1325_v5, 1  ;;  %s5624_s20 = smul.u32 144, %s612_s24  ;;  %s9489_s8 = scalar_lea.sflag [#allocation8], %s612_s24 }
 0x357   : > { %vm1880_vm6 = vmand %vm1343_vm3, %vm1397_vm4  ;;  %v2384_v46 = vsel %vm1397_vm4, 1, %v9569_v28 }
 0x358   : > { %vm1546_vm7 = vmand %vm1343_vm3, %vm1379_vm5  ;;  %s9434_s23 = scalar_lea.vmem [#allocation15], %s5624_s20 }
 0x359   : > { %3580 = vrot.lane.b32.xlu0 %v1289_v26, %s6340_s1  ;;  %3570 = vrot.lane.b32.xlu1 %v6914_v34, %s6340_s1  ;;  %v1898_v34 = vsel %vm1880_vm6, 1, %v9569_v28  ;;  %v1324_v26 = vld [vmem:[%s9756_s17] sm:$0xff]  ;;  %vm1504_vm6 = vcmp.lt.s32.totalorder %v7010_v23, 5  ;;  %s4947_s30 = sshll.u32 %s9434_s23, 4  ;;  %s9478_s30 = int_to_ptr.vmem [resolvable:$true] %s4947_s30 }
 0x35a   : > { %vm1378_vm8 = vcmp.ge.s32.totalorder %v1324_v26, 1  ;;  %vm1396_vm11 = vcmp.le.s32.totalorder %v1324_v26, 10  ;;  %s6253_s28 = scalar_lea.vmem %s9478_s30, 2304  ;;  %p6260_p6 = scmp.lt.s32.totalorder %s9478_s30, %s6258_s18 }
 0x35b   : > { %v2082_v27 = vsel %vm1378_vm8, 1, %v9569_v28  ;;  %v2383_v48 = vsel %vm1396_vm11, 1, %v9569_v28  ;;  %vm1838_vm8 = vcmp.lt.s32.totalorder %v7010_v23, 3  ;;  %vm2041_vm11 = vcmp.lt.s32.totalorder %v7010_v23, 1  ;;  %p6254_p8 = scmp.ne.s32.totalorder %s9478_s30, %s6253_s28 }
 0x35d   : > { %3584 = vrot.lane.b32.xlu0 %v1291_v63, %s6340_s1  ;;  %3574 = vrot.lane.b32.xlu1 %v6938_v61, %s6340_s1  ;;  %v1564_v61 = vsel %vm1546_vm7, 1, %v9569_v28  ;;  %vm1707_vm7 = vcmp.lt.s32.totalorder %v7010_v23, 4  ;;  %p6255_p13 = pnand %p6254_p8, %p9941_p11 }
 0x35f   : > { %p6256_p1 = pneg %p6255_p13 }
 0x361   : > { %2213 = vrot.lane.b32.xlu0 %v2211_v25, %s6340_s1  ;;  %3578 = vrot.lane.b32.xlu1 %v1288_v19, %s6340_s1  ;;  %v2083_v19 = vsel %vm1379_vm5, 1, %v9569_v28 }
 0x365   : > { %5731 = vperm.xlu0 %5729, %v9569_v28   ;;  %3582 = vrot.lane.b32.xlu1 %v1290_v44, %s6340_s1  ;;  %v7063_v44 = vsel %vm1380_vm10, 1, %v9569_v28 }
 0x369   : > { %1919 = vperm.xlu0 %5729, %v1898_v34   ;;  %1585 = vperm.xlu1 %5728, %v1564_v61  }
 0x36d   : > { %1466 = vrot.lane.b32.xlu0 %v6998_v7, %s6340_s1  ;;  %1432 = vrot.lane.b32.xlu1 %v6907_v40, %s6340_s1 }
 0x371   : > { %2104 = vperm.xlu0 %5729, %v2083_v19   ;;  %2101 = vperm.xlu1 %5728, %v2082_v27  }
 0x375   : > { %1434 = vrot.lane.b32.xlu0 %v6910_v41, %s6340_s1  ;;  %1464 = vrot.lane.b32.xlu1 %v6995_v35, %s6340_s1 }
 0x379   : > { %1591 = vperm.xlu0 %5729, %v7060_v38   ;;  %1588 = vperm.xlu1 %5728, %v7063_v44  }
 0x37d   : > { %2405 = vperm.xlu0 %5729, %v2384_v46   ;;  %2402 = vperm.xlu1 %5728, %v2383_v48  }
 0x381   : > { %1925 = vperm.xlu0 %5729, %v7071_v49   ;;  %1922 = vperm.xlu1 %5728, %v7074_v60  }
 0x385   : > { %2571 = vperm.xlu0 %5729, %v2083_v19   ;;  %2568 = vperm.xlu1 %5728, %v2082_v27  }
 0x387   : > { %v2997_v63 = vpop.permute.xlu1 %2996 }
 0x388   : > { %v3042_v45 = vsel %vm1293_vm2, %v2997_v63, 0 }
 0x389   : > { %3069 = vmatpush1.bf16.xpose.msra.mxu1 %v3042_v45  ;;  %2107 = vperm.xlu0 %5729, %v7063_v44  }
 0x38a   : > { %1436 = vrot.lane.b32.xlu1 %v6921_v14, %s6340_s1  ;;  %3070 = vmatprep.subr.bf16.mxu1 %v9569_v28 }
 0x38d   : > { %1438 = vrot.lane.b32.xlu0 %v6924_v47, %s6340_s1 }
 0x38e   : > { %2110 = vperm.xlu1 %5728, %v7060_v38  }
 0x38f   : > { %v2999_v4 = vpop.permute.xlu0 %2998 }
 0x390   : > { %v3045_v6 = vsel %vm1293_vm2, %v2999_v4, 0 }
 0x391   : > { %2831 = vperm.xlu0 %5729, %v2384_v46   ;;  %3071 = vmatpush1.bf16.xpose.msra.mxu1 %v3045_v6 }
 0x392   : > { %2828 = vperm.xlu1 %5728, %v2383_v48   ;;  %3072 = vmatprep.subr.bf16.mxu1 %v9569_v28 }
 0x397   : > { %v3001_v8 = vpop.permute.xlu1 %3000 }
 0x398   : > { %v3048_v11 = vsel %vm1293_vm2, %v3001_v8, 0 }
 0x399   : > { %3073 = vmatpush1.bf16.xpose.msra.mxu1 %v3048_v11  ;;  %v2978_v11 = vld [vmem:[#allocation4] sm:$0xff] }
 0x39a   : > { %3074 = vmatprep.subr.bf16.mxu1 %v9569_v28 }
 0x39f   : > { %v3003_v29 = vpop.permute.xlu0 %3002 }
 0x3a0   : > { %v3051_v5 = vsel %vm1293_vm2, %v3003_v29, 0  ;;  %v1328_v29 = vld [vmem:[%s9756_s17 + $0x20] sm:$0xff] }
 0x3a1   : > { %3075 = vmatpush1.bf16.xpose.msra.mxu1 %v3051_v5  ;;  %v1329_v5 = vld [vmem:[%s9756_s17 + $0x28] sm:$0xff]  ;;  %vm1382_vm14 = vcmp.ge.s32.totalorder %v1328_v29, 1  ;;  %vm1400_vm4 = vcmp.le.s32.totalorder %v1328_v29, 10  ;;  %v1525_v29 = vsub.s32 0, %v7010_v23 }
 0x3a2   : > { %3076 = vmatprep.subr.bf16.mxu1 %v9569_v28  ;;  %vm1383_vm15 = vcmp.ge.s32.totalorder %v1329_v5, 1  ;;  %vm1401_vm5 = vcmp.le.s32.totalorder %v1329_v5, 10  ;;  %v1728_v5 = vsub.s32 1, %v7010_v23 }
 0x3a7   : > { %v3005_v25 = vpop.permute.xlu1 %3004 }
 0x3a8   : > { %v3054_v34 = vsel %vm1293_vm2, %v3005_v25, 0 }
 0x3a9   : > { %3077 = vmatpush1.bf16.xpose.msra.mxu1 %v3054_v34 }
 0x3aa   : > { %3078 = vmatprep.subr.bf16.mxu1 %v9569_v28 }
 0x3af   : > { %v3007_v61 = vpop.permute.xlu0 %3006 }
 0x3b0   : > { %v3057_v26 = vsel %vm1293_vm2, %v3007_v61, 0 }
 0x3b1   : > { %3079 = vmatpush1.bf16.xpose.msra.mxu1 %v3057_v26 }
 0x3b2   : > { %3080 = vmatprep.subr.bf16.mxu1 %v9569_v28 }
 0x3b7   : > { %v3009_v19 = vpop.permute.xlu1 %3008 }
 0x3b8   : > { %v3060_v27 = vsel %vm1293_vm2, %v3009_v19, 0  ;;  %v2979_v19 = vld [vmem:[#allocation4 + $0x8] sm:$0xff] }
 0x3b9   : > { %3081 = vmatpush1.bf16.xpose.msra.mxu1 %v3060_v27  ;;  %v7122_v27 = vsel %vm1382_vm14, 1, %v9569_v28 }
 0x3ba   : > { %3082 = vmatprep.subr.bf16.mxu1 %v9569_v28 }
 0x3bf   : > { %v3011_v30 = vpop.permute.xlu0 %3010 }
 0x3c0   : > { %v3063_v37 = vsel %vm1293_vm2, %v3011_v30, 0  ;;  %v7125_v30 = vsel %vm1383_vm15, 1, %v9569_v28 }
 0x3c1   : > { %3083 = vmatpush1.bf16.xpose.msra.mxu1 %v3063_v37  ;;  %9757 = vst [vmem:[#allocation58_spill] sm:$0xff] %v7125_v30  ;;  %v7136_v37 = vsel %vm1400_vm4, 1, %v9569_v28 }
 0x3c2   : > { %3084 = vmatprep.subr.bf16.mxu1 %v9569_v28 }
 0x3c3   : > { %v3573_v46 = vpop.permute.xlu0 %3572 }
 0x3c7   : > { %v3013_v48 = vpop.permute.xlu1 %3012  ;;  %v3577_v63 = vpop.permute.xlu0 %3576 }
 0x3c8   : > { %v3066_v45 = vsel %vm1293_vm2, %v3013_v48, 0 }
 0x3c9   : > { %3085 = vmatpush1.bf16.xpose.msra.mxu1 %v3066_v45  ;;  %v2981_v45 = vld [vmem:[#allocation4 + $0x18] sm:$0xff] }
 0x3ca   : > { %5616 = vmatprep.subr.bf16.mxu1 %v9567_v0 }
 0x3cb   : > { %v3571_v4 = vpop.permute.xlu1 %3570  ;;  %v3581_v6 = vpop.permute.xlu0 %3580 }
 0x3cc   : > { %3625 = vmatpush1.bf16.msra.mxu0 %v3571_v4 }
 0x3cd   : > { %3626 = vmatprep.subr.bf16.mxu0 %v9569_v28 }
 0x3cf   : > { %v3585_v8 = vpop.permute.xlu0 %3584  ;;  %v3575_v25 = vpop.permute.xlu1 %3574 }
 0x3d0   : > { %5108 = vmatmul.mubr.msk.bf16.vlgmr.msra.gmra.mrb[36].mxu1 %vm1293_vm2, %v2978_v11  ;;  %3627 = vmatpush1.bf16.msra.mxu0 %v3573_v46  ;;  %v7139_v46 = vsel %vm1401_vm5, 1, %v9569_v28 }
 0x3d1   : > { %3628 = vmatprep.subr.bf16.mxu0 %v9569_v28  ;;  %3110 = vmatprep.mubr.bf16.mxu1 %v9569_v28  ;;  %9758 = vst [vmem:[#allocation59_spill] sm:$0xff] %v7139_v46 }
 0x3d3   : > { %v7112_v34 = vpop.permute.xlu0 %2213 }
 0x3d4   : > { %3629 = vmatpush1.bf16.msra.mxu0 %v3575_v25  ;;  %v2217_v61 = vmul.f32 %v7112_v34, %v6910_v41  ;;  %v2216_v26 = vmul.f32 %v7112_v34, %v6907_v40  ;;  %v3579_v40 = vpop.permute.xlu1 %3578  ;;  %v2980_v41 = vld [vmem:[#allocation4 + $0x10] sm:$0xff] }
 0x3d5   : > { %3630 = vmatprep.subr.bf16.mxu0 %v9569_v28 }
 0x3d6   : > { %2254 = vrot.lane.b32.xlu0 %v2217_v61, %s6340_s1  ;;  %2252 = vrot.lane.b32.xlu1 %v2216_v26, %s6340_s1  ;;  %v7173_v61 = vrot.slane %v7016_v20, %v1525_v29 }
 0x3d8   : > { %5109 = vmatmul.mubr.msk.bf16.gmra.mrb[40].mxu1 %vm1293_vm2, %v2979_v19  ;;  %3631 = vmatpush1.bf16.msra.mxu0 %v3577_v63  ;;  %v3583_v48 = vpop.permute.xlu1 %3582 }
 0x3d9   : > { %3632 = vmatprep.subr.bf16.mxu0 %v9569_v28  ;;  %3120 = vmatprep.mubr.bf16.mxu1 %v9569_v28 }
 0x3da   : > { %1594 = vperm.xlu1 %5728, %v7122_v27   ;;  %1597 = vperm.xlu0 %5729, %v7125_v30  }
 0x3dc   : > { %3633 = vmatpush1.bf16.msra.mxu0 %v3579_v40 }
 0x3dd   : > { %3634 = vmatprep.subr.bf16.mxu0 %v9569_v28 }
 0x3de   : > { %2408 = vperm.xlu1 %5728, %v7074_v60   ;;  %2411 = vperm.xlu0 %5729, %v7071_v49  }
 0x3e0   : > { %5110 = vmatmul.mubr.msk.bf16.gmra.mrb[44].mxu1 %vm1293_vm2, %v2980_v41  ;;  %3635 = vmatpush1.bf16.msra.mxu0 %v3581_v6 }
 0x3e1   : > { %3636 = vmatprep.subr.bf16.mxu0 %v9569_v28  ;;  %3130 = vmatprep.mubr.bf16.mxu1 %v9569_v28 }
 0x3e2   : > { %1928 = vperm.xlu1 %5728, %v7136_v37   ;;  %1931 = vperm.xlu0 %5729, %v7139_v46  }
 0x3e4   : > { %3637 = vmatpush1.bf16.msra.mxu0 %v3583_v48  ;;  %v7146_v63 = vpop.permute.xlu0 %5731 }
 0x3e5   : > { %3638 = vmatprep.subr.bf16.mxu0 %v9569_v28 }
 0x3e6   : > { %2574 = vperm.xlu1 %5728, %v7063_v44   ;;  %2577 = vperm.xlu0 %5729, %v7060_v38   ;;  %v2982_v38 = vld [vmem:[#allocation4 + $0x20] sm:$0xff] }
 0x3e8   : > { %v7151_v4 = vpop.permute.xlu1 %1585  ;;  %5111 = vmatmul.mubr.msk.bf16.gmra.mrb[48].mxu1 %vm1293_vm2, %v2981_v45  ;;  %3639 = vmatpush1.bf16.msra.mxu0 %v3585_v8  ;;  %v7154_v6 = vpop.permute.xlu0 %1919 }
 0x3e9   : > { %3140 = vmatprep.mubr.bf16.mxu1 %v9569_v28  ;;  %3640 = vmatprep.subr.bf16.mxu0 %v9569_v28  ;;  %vm1636_vm14 = vcmp.eq.s32.totalorder %v7151_v4, 1  ;;  %vm1970_vm5 = vcmp.eq.s32.totalorder %v7154_v6, 1 }
 0x3ea   : > { %3586 = vrot.lane.b32.xlu1 %v7003_v21, %s6340_s1  ;;  %v7176_v21 = vrot.slane %v7016_v20, %v1728_v5 }
 0x3ec   : > { %v7160_v11 = vpop.permute.xlu1 %1432  ;;  %v7162_v44 = vpop.permute.xlu0 %1466 }
 0x3ed   : > { %9759 = vst [vmem:[#allocation60_spill] sm:$0xff] %v7160_v11  ;;  %9760 = vst [vmem:[#allocation61_spill] sm:$0xff] %v7162_v44  ;;  %v9574_v40 = vrot.slane %v7160_v11, 3  ;;  %v9576_v41 = vrot.slane %v7160_v11, 4  ;;  %v1837_v54 = vrot.slane %v7162_v44, 5  ;;  %v9772_v33 = vrot.slane %v7160_v11, 3 }
 0x3ee   : > { %v9782_v4 = vrot.slane %v7160_v11, 5 }
 0x3f0   : > { %v7166_v25 = vpop.permute.xlu1 %2101  ;;  %5112 = vmatmul.mubr.msk.bf16.gmra.mrb[52].mxu1 %vm1293_vm2, %v2982_v38  ;;  %v7169_v8 = vpop.permute.xlu0 %2104 }
 0x3f1   : > { %3150 = vmatprep.mubr.bf16.mxu1 %v9569_v28  ;;  %v2983_v28 = vld [vmem:[#allocation4 + $0x28] sm:$0xff] }
 0x3f4   : > { %v7178_v26 = vpop.permute.xlu1 %1464  ;;  %v7180_v19 = vpop.permute.xlu0 %1434 }
 0x3f5   : > { %9761 = vst [vmem:[#allocation62_spill] sm:$0xff] %v7178_v26  ;;  %v1487_v48 = vrot.slane %v7180_v19, 3  ;;  %v1690_v45 = vrot.slane %v7180_v19, 4  ;;  %v1821_v29 = vrot.slane %v7180_v19, 5  ;;  %v9601_v10 = vrot.slane %v7178_v26, 5 }
 0x3f7   : > { %v7194_v5 = vsel %vm1504_vm6, %v9574_v40, %v1487_v48  ;;  %v1724_v0 = vsel %vm1707_vm7, %v9576_v41, %v1690_v45  ;;  %v9763_v40 = vrot.slane %v7160_v11, 5  ;;  %v9765_v41 = vmov 0  }
 0x3f8   : > { %9762 = vst [vmem:[#allocation63_spill] sm:$0xff] %v7194_v5  ;;  %v1589_v17 = vpop.permute.xlu1 %1588  ;;  %v1529_v38 = vmul.f32 %v7173_v61, %v7194_v5  ;;  %v1732_v55 = vmul.f32 %v7176_v21, %v1724_v0  ;;  %5113 = vmatmul.mubr.msk.bf16.gmra.mrb[56].mxu1 %vm1293_vm2, %v2983_v28  ;;  %v1592_v51 = vpop.permute.xlu0 %1591  ;;  %v7218_v0 = vrot.slane %v7016_v20, %v1859_v31  ;;  %v2984_v28 = vld [vmem:[#allocation4 + $0x30] sm:$0xff]  ;;  %v2062_v31 = vsub.s32 3, %v7010_v23 }
 0x3f9   : > { %v7209_v22 = vsel %vm1838_vm8, %v9763_v40, %v1821_v29  ;;  %vm1637_vm9 = vcmp.eq.s32.totalorder %v1589_v17, 1  ;;  %3160 = vmatprep.mubr.bf16.mxu1 %v9765_v41 }
 0x3fa   : > { %9764 = vst [vmem:[#allocation64_spill] sm:$0xff] %v7209_v22  ;;  %v1655_v9 = vsel %vm1637_vm9, %v1529_v38, 0.0  ;;  %9766 = vst [vmem:[#allocation65_spill] sm:$0xff] %v7218_v0  ;;  %v1863_v40 = vmul.f32 %v7218_v0, %v7209_v22  ;;  %v2024_v22 = vrot.slane %v7180_v19, 7  ;;  %vm2342_vm9 = vcmp.lt.s32.totalorder %v7010_v23, 7 }
 0x3fb   : > { %v1804_v53 = vadd.f32 %v1732_v55, %v1655_v9 }
 0x3fc   : > { %v7213_v32 = vpop.permute.xlu1 %2402  ;;  %v7215_v5 = vpop.permute.xlu0 %2405 }
 0x400   : > { %v1923_v12 = vpop.permute.xlu1 %1922  ;;  %5114 = vmatmul.mubr.msk.bf16.gmra.mrb[60].mxu1 %vm1293_vm2, %v2984_v28  ;;  %v1926_v17 = vpop.permute.xlu0 %1925 }
 0x401   : > { %vm1971_vm10 = vcmp.eq.s32.totalorder %v1923_v12, 1  ;;  %3170 = vmatprep.mubr.bf16.mxu1 %v9765_v41  ;;  %v7236_v12 = vrot.slane %v7016_v20, %v2062_v31  ;;  %v2986_v31 = vld [vmem:[#allocation4 + $0x40] sm:$0xff]  ;;  %vm1972_vm13 = vcmp.eq.s32.totalorder %v1926_v17, 1 }
 0x402   : > { %v1989_v38 = vsel %vm1971_vm10, %v1863_v40, 0.0  ;;  %vm2154_vm10 = vcmp.eq.s32.totalorder %v7166_v25, 1 }
 0x403   : > { %v2007_v9 = vadd.f32 %v1989_v38, %v1804_v53  ;;  %9768 = vst [vmem:[#allocation67_spill] sm:$0xff] %v7236_v12 }
 0x404   : > { %v7224_v55 = vpop.permute.xlu1 %2568  ;;  %v7226_v35 = vpop.permute.xlu0 %2571 }
 0x408   : > { %v7229_v62 = vpop.permute.xlu1 %1436  ;;  %5115 = vmatmul.mubr.msk.bf16.gmra.mrb[64].mxu1 %vm1293_vm2, %v2985_v18  ;;  %v2108_v53 = vpop.permute.xlu0 %2107 }
 0x409   : > { %9767 = vst [vmem:[#allocation66_spill] sm:$0xff] %v7229_v62  ;;  %v9592_v28 = vrot.slane %v7229_v62, 7  ;;  %3180 = vmatprep.mubr.bf16.mxu1 %v9765_v41  ;;  %vm2156_vm12 = vcmp.eq.s32.totalorder %v2108_v53, 1  ;;  %v9594_v38 = vrot.slane %v7229_v62, 3  ;;  %v9595_v52 = vrot.slane %v7229_v62, 4 }
 0x40a   : > { %v9593_v42 = vrot.slane %v7229_v62, 5 }
 0x40b   : > { %v2057_v40 = vsel %vm2041_vm11, %v2024_v22, %v9592_v28  ;;  %v7260_v53 = vsel %vm1504_vm6, %v1487_v48, %v9594_v38 }
 0x40c   : > { %v2066_v18 = vmul.f32 %v7236_v12, %v2057_v40  ;;  %v7254_v28 = vsel %vm1838_vm8, %v1821_v29, %v9593_v42  ;;  %v7266_v40 = vsel %vm1707_vm7, %v1690_v45, %v9595_v52  ;;  %v1503_v45 = vrot.slane %v7162_v44, 3 }
 0x40d   : > { %v1864_v29 = vmul.f32 %v7218_v0, %v7254_v28  ;;  %v1733_v48 = vmul.f32 %v7176_v21, %v7266_v40  ;;  %v9599_v52 = vrot.slane %v7162_v44, 4 }
 0x40e   : > { %v2174_v56 = vsel %vm2156_vm12, %v2066_v18, 0.0  ;;  %v7287_v17 = vsel %vm1504_vm6, %v1503_v45, %v9772_v33  ;;  %v7309_v33 = vsel %vm1838_vm8, %v9601_v10, %v1837_v54  ;;  %v9615_v10 = vrot.slane %v7160_v11, 1 }
 0x40f   : > { %v7248_v36 = vadd.f32 %v2174_v56, %v2007_v9  ;;  %v9770_v56 = vmov 0.0   ;;  %v1530_v9 = vmul.f32 %v7173_v61, %v7260_v53  ;;  %v1990_v42 = vsel %vm1972_vm13, %v1864_v29, 0.0  ;;  %9773 = vst [vmem:[#allocation70_spill] sm:$0xff] %v7287_v17  ;;  %9777 = vst [vmem:[#allocation73_spill] sm:$0xff] %v7309_v33 }
 0x410   : > { %5116 = vmatmul.mubr.msk.bf16.gmra.mrb[68].mxu1 %vm1293_vm2, %v2986_v31  ;;  %vm1638_vm2 = vcmp.eq.s32.totalorder %v1592_v51, 1  ;;  %v9600_v51 = vrot.slane %v7178_v26, 3  ;;  %v9774_v29 = vrot.slane %v7160_v11, 4  ;;  %vm2455_vm12 = vcmp.eq.s32.totalorder %v7213_v32, 1 }
 0x411   : > { %9769 = vst [vmem:[#allocation68_spill] sm:$0xff] %v7248_v36  ;;  %5408 = vmatprep.mubr.msk.bf16.mxu1 %vm6339_vm0, %v9770_v56  ;;  %v1656_v18 = vsel %vm1638_vm2, %v1530_v9, 0.0  ;;  %v5734_v9 = vunpack.i.h.bf16 %v7146_v63  ;;  %vm2456_vm2 = vcmp.eq.s32.totalorder %v7215_v5, 1  ;;  %vm2621_vm13 = vcmp.eq.s32.totalorder %v7224_v55, 1 }
 0x412   : > { %v1805_v31 = vadd.f32 %v1733_v48, %v1656_v18  ;;  %v5733_v48 = vunpack.i.l.bf16 %v7146_v63  ;;  %v7303_v18 = vsel %vm1504_vm6, %v9600_v51, %v1503_v45  ;;  %v2023_v63 = vrot.slane %v7160_v11, 7 }
 0x413   : > { %9776 = vst [vmem:[#allocation72_spill] sm:$0xff] %v7303_v18  ;;  %v1527_v45 = vmul.f32 %v7173_v61, %v7303_v18  ;;  %v1861_v51 = vmul.f32 %v7218_v0, %v7309_v33  ;;  %vm7322_vm15 = vcmp.eq.s32.totalorder %v5734_v9, 1  ;;  %v7339_v33 = vpop.permute.xlu1 %2110  ;;  %v7341_v9 = vpop.permute.xlu0 %1438  ;;  %v9791_v32 = vrot.slane %v7229_v62, 5 }
 0x414   : > { %v7276_v38 = vadd.f32 %v1990_v42, %v1805_v31  ;;  %v7295_v42 = vsel %vm1707_vm7, %v9599_v52, %v9774_v29  ;;  %v1528_v31 = vmul.f32 %v7173_v61, %v7287_v17  ;;  %vm7326_vm4 = vcmp.eq.s32.totalorder %v5733_v48, 1  ;;  %9784 = vst [vmem:[#allocation75_spill] sm:$0xff] %v7339_v33 }
 0x415   : > { %9775 = vst [vmem:[#allocation71_spill] sm:$0xff] %v7295_v42  ;;  %v1731_v29 = vmul.f32 %v7176_v21, %v7295_v42  ;;  %v7334_v42 = vsel %vm1838_vm8, %v1837_v54, %v9782_v4  ;;  %v2058_v52 = vsel %vm2041_vm11, %v2023_v63, %v2024_v22  ;;  %v2363_v17 = vsub.s32 5, %v7010_v23 }
 0x416   : > { %9771 = vst [vmem:[#allocation69_spill] sm:$0xff] %v7276_v38  ;;  %9783 = vst [vmem:[#allocation74_spill] sm:$0xff] %v7334_v42  ;;  %v1654_v18 = vsel %vm1636_vm14, %v1528_v31, 0.0  ;;  %v9785_v54 = vrot.slane %v7162_v44, 7  ;;  %v9614_v22 = vrot.slane %v7229_v62, 1  ;;  %v1653_v7 = vsel %vm7326_vm4, %v1527_v45, 0.0 }
 0x417   : > { %v1785_v48 = vsel %vm1343_vm3, %v1731_v29, 0.0  ;;  %v1987_v31 = vsel %vm7322_vm15, %v1861_v51, 0.0  ;;  %v1862_v59 = vmul.f32 %v7218_v0, %v7334_v42  ;;  %v2065_v29 = vmul.f32 %v7236_v12, %v2058_v52  ;;  %v2829_v45 = vpop.permute.xlu1 %2828 }
 0x418   : > { %v2059_v4 = vsel %vm2041_vm11, %v9785_v54, %v2023_v63  ;;  %vm2155_vm3 = vcmp.eq.s32.totalorder %v7169_v8, 1  ;;  %v2325_v44 = vrot.slane %v7180_v19, 1  ;;  %v9616_v43 = vrot.slane %v7341_v9, 3 }
 0x419   : > { %v1803_v63 = vadd.f32 %v1785_v48, %v1654_v18  ;;  %v2677_v54 = vsub.s32 7, %v7010_v23  ;;  %v2064_v26 = vmul.f32 %v7236_v12, %v2059_v4  ;;  %v2005_v51 = vadd.f32 %v1987_v31, %v1653_v7  ;;  %v2832_v48 = vpop.permute.xlu0 %2831 }
 0x41a   : > { %v2358_v52 = vsel %vm2342_vm9, %v2325_v44, %v9614_v22  ;;  %v7372_v19 = vrot.slane %v7016_v20, %v2363_v17  ;;  %v7375_v18 = vrot.slane %v7016_v20, %v2511_v13  ;;  %v1988_v4 = vsel %vm1970_vm5, %v1862_v59, 0.0 }
 0x41b   : > { %v2173_v25 = vsel %vm2155_vm3, %v2065_v29, 0.0  ;;  %v2359_v7 = vsel %vm2342_vm9, %v9615_v10, %v2325_v44  ;;  %v9788_v13 = vrot.slane %v7229_v62, 3  ;;  %v2006_v22 = vadd.f32 %v1988_v4, %v1803_v63 }
 0x41c   : > { %9786 = vst [vmem:[#allocation76_spill] sm:$0xff] %v7372_v19  ;;  %9787 = vst [vmem:[#allocation77_spill] sm:$0xff] %v7375_v18  ;;  %v7393_v6 = vrot.slane %v7016_v20, %v2677_v54  ;;  %v2172_v8 = vsel %vm2154_vm10, %v2064_v26, 0.0  ;;  %v2366_v59 = vmul.f32 %v7372_v19, %v2358_v52  ;;  %v9618_v29 = vrot.slane %v7341_v9, 4 }
 0x41d   : > { %v1519_v17 = vsel %vm1504_vm6, %v9788_v13, %v9616_v43  ;;  %v2190_v44 = vadd.f32 %v2172_v8, %v2005_v51  ;;  %v2191_v10 = vadd.f32 %v2173_v25, %v2006_v22  ;;  %v2365_v31 = vmul.f32 %v7372_v19, %v2359_v7  ;;  %v5106_v7 = vld [vmem:[#allocation6 + $0x8] ss:$0 sm:$0xff] }
 0x41e   : > { %9789 = vst [vmem:[#allocation78_spill] sm:$0xff] %v7393_v6  ;;  %v2513_v20 = vmul.f32 %v7375_v18, %v7260_v53  ;;  %v2514_v63 = vmul.f32 %v7375_v18, %v1519_v17  ;;  %vm2622_vm14 = vcmp.eq.s32.totalorder %v7226_v35, 1  ;;  %v9790_v26 = vrot.slane %v7341_v9, 5 }
 0x41f   : > { %v2473_v52 = vsel %vm2455_vm12, %v2365_v31, 0.0  ;;  %v2474_v4 = vsel %vm2456_vm2, %v2366_v59, 0.0  ;;  %v9792_v53 = vrot.slane %v7229_v62, 4  ;;  %v2679_v8 = vmul.f32 %v7393_v6, %v7266_v40  ;;  %v5107_v40 = vld [vmem:[%s9537_s7] ss:$0 sm:$0xff] }
 0x420   : > { %v1853_v5 = vsel %vm1838_vm8, %v9791_v32, %v9790_v26  ;;  %vm2882_vm15 = vcmp.eq.s32.totalorder %v2832_v48, 1  ;;  %v2640_v31 = vsel %vm2622_vm14, %v2514_v63, 0.0  ;;  %vm2881_vm4 = vcmp.eq.s32.totalorder %v2829_v45, 1 }
 0x421   : > { %v1722_v25 = vsel %vm1707_vm7, %v9792_v53, %v9618_v29  ;;  %v2774_v11 = vmul.f32 %v5106_v7, %v1853_v5  ;;  %v1531_v45 = vmul.f32 %v7173_v61, %v1519_v17  ;;  %vm3227_vm10 = vcmask 130048  }
 0x448   : > { %v2253_v13 = vpop.permute.xlu1 %2252  ;;  %v2255_v54 = vpop.permute.xlu0 %2254 }
 0x449   : > { %v2306_v22 = vadd.f32 %v2253_v13, %v2190_v44  ;;  %v2307_v51 = vadd.f32 %v2255_v54, %v2191_v10  ;;  %v2639_v10 = vsel %vm2621_vm13, %v2513_v20, 0.0  ;;  %v2680_v13 = vmul.f32 %v7393_v6, %v1722_v25 }
 0x44a   : > { %v2773_v54 = vmul.f32 %v5106_v7, %v7254_v28  ;;  %v1734_v28 = vmul.f32 %v7176_v21, %v1722_v25  ;;  %v1865_v7 = vmul.f32 %v7218_v0, %v1853_v5 }
 0x44b   : > { %v2491_v35 = vadd.f32 %v2473_v52, %v2306_v22  ;;  %v2492_v43 = vadd.f32 %v2474_v4, %v2307_v51  ;;  %v2900_v52 = vsel %vm2882_vm15, %v2774_v11, 0.0 }
 0x44c   : > { %v2899_v22 = vsel %vm2881_vm4, %v2773_v54, 0.0 }
 0x44d   : > { %v2657_v59 = vadd.f32 %v2639_v10, %v2491_v35  ;;  %v2658_v44 = vadd.f32 %v2640_v31, %v2492_v43 }
 0x44f   : > { %v2751_v26 = vadd.f32 %v2679_v8, %v2657_v59  ;;  %v2752_v32 = vadd.f32 %v2680_v13, %v2658_v44 }
 0x451   : > { %v2917_v48 = vadd.f32 %v2899_v22, %v2751_v26  ;;  %v2918_v51 = vadd.f32 %v2900_v52, %v2752_v32 }
 0x453   : > { %v2942_v55 = vadd.f32 %v5107_v40, %v2917_v48  ;;  %v2943_v20 = vadd.f32 %v5107_v40, %v2918_v51 }
 0x455   : > { %2960 = vst.msk [vmem:[#allocation5] sm:$0xff] %vm986_vm1, %v2942_v55  ;;  %2961 = vst.msk [vmem:[#allocation5 + $0x8] sm:$0xff] %vm986_vm1, %v2943_v20 }
 0x459   : > { %v1595_v43 = vpop.permute.xlu1 %1594 }
 0x45a   : > { %vm1639_vm5 = vcmp.eq.s32.totalorder %v1595_v43, 1 }
 0x45b   : > { %v1657_v63 = vsel %vm1639_vm5, %v1531_v45, 0.0 }
 0x45c   : > { %v1806_v11 = vadd.f32 %v1734_v28, %v1657_v63 }
 0x45d   : > { %v7430_v4 = vpop.permute.xlu1 %2408 }
 0x45e   : > { %9793 = vst [vmem:[#allocation79_spill] sm:$0xff] %v7430_v4 }
 0x461   : > { %v1929_v53 = vpop.permute.xlu1 %1928 }
 0x462   : > { %vm1973_vm3 = vcmp.eq.s32.totalorder %v1929_v53, 1 }
 0x463   : > { %v1991_v35 = vsel %vm1973_vm3, %v1865_v7, 0.0 }
 0x464   : > { %v7433_v8 = vadd.f32 %v1991_v35, %v1806_v11 }
 0x465   : > { %v7435_v10 = vpop.permute.xlu1 %2574 }
 0x466   : > { %9794 = vst [vmem:[#allocation80_spill] sm:$0xff] %v7433_v8  ;;  %9795 = vst [vmem:[#allocation81_spill] sm:$0xff] %v7435_v10 }
 0x469   : > { %v3587_v31 = vpop.permute.xlu1 %3586 }
 0x46a   : > { %3641 = vmatpush1.bf16.msra.mxu0 %v3587_v31 }
 0x46b   : > { %5388 = vmatprep.subr.bf16.mxu0 %v9770_v56 }
 0x4a3   : > { %v3102_v17 = vpop.f32.mrb[36].mxu1 }
 0x4a4   : > { %v3104_v59 = vpop.f32.mrb[37].mxu1  ;;  %v7440_v13 = vmul.f32 0.17677669, %v3102_v17 }
 0x4a5   : > { %v7438_v25 = vmul.f32 0.17677669, %v3104_v59  ;;  %v3106_v44 = vpop.f32.mrb[38].mxu1 }
 0x4a6   : > { %v3108_v54 = vpop.f32.mrb[39].mxu1  ;;  %v7446_v32 = vmul.f32 0.17677669, %v3106_v44 }
 0x4a7   : > { %v7442_v5 = vmul.f32 0.17677669, %v3108_v54  ;;  %v3228_v26 = vsel %vm3227_vm10, %v7438_v25, -inf }
 0x4a8   : > { %v3229_v22 = vmax.f32 %v7440_v13, %v3228_v26 }
 0x4a9   : > { %v3232_v52 = vsel %vm3227_vm10, %v7442_v5, -inf }
 0x4aa   : > { %3230 = vmax.xlane.f32.xlu0 %v3229_v22  ;;  %v3233_v40 = vmax.f32 %v7446_v32, %v3232_v52 }
 0x4ab   : > { %v3112_v48 = vpop.f32.mrb[40].mxu1 }
 0x4ac   : > { %v3114_v51 = vpop.f32.mrb[41].mxu1  ;;  %3234 = vmax.xlane.f32.xlu1 %v3233_v40  ;;  %v7454_v43 = vmul.f32 0.17677669, %v3112_v48 }
 0x4ad   : > { %v7452_v55 = vmul.f32 0.17677669, %v3114_v51  ;;  %v3116_v20 = vpop.f32.mrb[42].mxu1 }
 0x4ae   : > { %v3118_v45 = vpop.f32.mrb[43].mxu1  ;;  %v7463_v7 = vmul.f32 0.17677669, %v3116_v20 }
 0x4af   : > { %v7456_v28 = vmul.f32 0.17677669, %v3118_v45  ;;  %v3236_v63 = vsel %vm3227_vm10, %v7452_v55, -inf }
 0x4b0   : > { %v3237_v11 = vmax.f32 %v7454_v43, %v3236_v63 }
 0x4b1   : > { %v3240_v53 = vsel %vm3227_vm10, %v7456_v28, -inf }
 0x4b2   : > { %3238 = vmax.xlane.f32.xlu0 %v3237_v11  ;;  %v3241_v17 = vmax.f32 %v7463_v7, %v3240_v53 }
 0x4b3   : > { %v3122_v35 = vpop.f32.mrb[44].mxu1 }
 0x4b4   : > { %v3124_v31 = vpop.f32.mrb[45].mxu1  ;;  %v7468_v54 = vmul.f32 0.17677669, %v3122_v35 }
 0x4b5   : > { %v7466_v59 = vmul.f32 0.17677669, %v3124_v31  ;;  %v3126_v44 = vpop.f32.mrb[46].mxu1 }
 0x4b6   : > { %v3128_v26 = vpop.f32.mrb[47].mxu1  ;;  %3242 = vmax.xlane.f32.xlu0 %v3241_v17  ;;  %v7474_v40 = vmul.f32 0.17677669, %v3126_v44 }
 0x4b7   : > { %v7470_v22 = vmul.f32 0.17677669, %v3128_v26  ;;  %v3244_v52 = vsel %vm3227_vm10, %v7466_v59, -inf }
 0x4b8   : > { %v3245_v48 = vmax.f32 %v7468_v54, %v3244_v52 }
 0x4b9   : > { %v3248_v51 = vsel %vm3227_vm10, %v7470_v22, -inf }
 0x4ba   : > { %3246 = vmax.xlane.f32.xlu1 %v3245_v48  ;;  %v3249_v20 = vmax.f32 %v7474_v40, %v3248_v51 }
 0x4bb   : > { %v3132_v45 = vpop.f32.mrb[48].mxu1 }
 0x4bc   : > { %v3134_v63 = vpop.f32.mrb[49].mxu1  ;;  %3250 = vmax.xlane.f32.xlu0 %v3249_v20  ;;  %v7482_v35 = vmul.f32 0.17677669, %v3132_v45 }
 0x4bd   : > { %v7480_v11 = vmul.f32 0.17677669, %v3134_v63  ;;  %v3136_v53 = vpop.f32.mrb[50].mxu1 }
 0x4be   : > { %v3138_v31 = vpop.f32.mrb[51].mxu1  ;;  %v7488_v26 = vmul.f32 0.17677669, %v3136_v53 }
 0x4bf   : > { %v7484_v17 = vmul.f32 0.17677669, %v3138_v31  ;;  %v3252_v44 = vsel %vm3227_vm10, %v7480_v11, -inf }
 0x4c0   : > { %v3253_v52 = vmax.f32 %v7482_v35, %v3252_v44 }
 0x4c1   : > { %v3256_v48 = vsel %vm3227_vm10, %v7484_v17, -inf }
 0x4c2   : > { %3254 = vmax.xlane.f32.xlu1 %v3253_v52  ;;  %v3257_v51 = vmax.f32 %v7488_v26, %v3256_v48 }
 0x4c3   : > { %v3142_v20 = vpop.f32.mrb[52].mxu1 }
 0x4c4   : > { %v3144_v63 = vpop.f32.mrb[53].mxu1  ;;  %3258 = vmax.xlane.f32.xlu0 %v3257_v51  ;;  %v7496_v29 = vmul.f32 0.17677669, %v3142_v20 }
 0x4c5   : > { %v7494_v45 = vmul.f32 0.17677669, %v3144_v63  ;;  %v3146_v31 = vpop.f32.mrb[54].mxu1 }
 0x4c6   : > { %v3148_v42 = vpop.f32.mrb[55].mxu1  ;;  %v7502_v44 = vmul.f32 0.17677669, %v3146_v31 }
 0x4c7   : > { %v7498_v24 = vmul.f32 0.17677669, %v3148_v42  ;;  %v3260_v53 = vsel %vm3227_vm10, %v7494_v45, -inf }
 0x4c8   : > { %v3261_v52 = vmax.f32 %v7496_v29, %v3260_v53 }
 0x4c9   : > { %v3264_v48 = vsel %vm3227_vm10, %v7498_v24, -inf }
 0x4ca   : > { %3262 = vmax.xlane.f32.xlu1 %v3261_v52  ;;  %v3265_v51 = vmax.f32 %v7502_v44, %v3264_v48 }
 0x4cb   : > { %v3152_v63 = vpop.f32.mrb[56].mxu1 }
 0x4cc   : > { %v3154_v8 = vpop.f32.mrb[57].mxu1  ;;  %3266 = vmax.xlane.f32.xlu0 %v3265_v51  ;;  %v7510_v50 = vmul.f32 0.17677669, %v3152_v63 }
 0x4cd   : > { %v7508_v20 = vmul.f32 0.17677669, %v3154_v8  ;;  %v3156_v42 = vpop.f32.mrb[58].mxu1 }
 0x4ce   : > { %v3158_v56 = vpop.f32.mrb[59].mxu1  ;;  %v7516_v53 = vmul.f32 0.17677669, %v3156_v42 }
 0x4cf   : > { %v7512_v38 = vmul.f32 0.17677669, %v3158_v56  ;;  %v3268_v31 = vsel %vm3227_vm10, %v7508_v20, -inf }
 0x4d0   : > { %v3269_v52 = vmax.f32 %v7510_v50, %v3268_v31 }
 0x4d1   : > { %v3272_v48 = vsel %vm3227_vm10, %v7512_v38, -inf }
 0x4d2   : > { %3270 = vmax.xlane.f32.xlu1 %v3269_v52  ;;  %v3273_v8 = vmax.f32 %v7516_v53, %v3272_v48 }
 0x4d3   : > { %v3162_v51 = vpop.f32.mrb[60].mxu1 }
 0x4d4   : > { %v3164_v16 = vpop.f32.mrb[61].mxu1  ;;  %3274 = vmax.xlane.f32.xlu0 %v3273_v8  ;;  %v7524_v6 = vmul.f32 0.17677669, %v3162_v51 }
 0x4d5   : > { %v7522_v63 = vmul.f32 0.17677669, %v3164_v16  ;;  %v3166_v56 = vpop.f32.mrb[62].mxu1 }
 0x4d6   : > { %v3168_v12 = vpop.f32.mrb[63].mxu1  ;;  %v7530_v31 = vmul.f32 0.17677669, %v3166_v56 }
 0x4d7   : > { %v7526_v10 = vmul.f32 0.17677669, %v3168_v12  ;;  %v3276_v42 = vsel %vm3227_vm10, %v7522_v63, -inf }
 0x4d8   : > { %v3277_v52 = vmax.f32 %v7524_v6, %v3276_v42 }
 0x4d9   : > { %v3280_v48 = vsel %vm3227_vm10, %v7526_v10, -inf }
 0x4da   : > { %3278 = vmax.xlane.f32.xlu1 %v3277_v52  ;;  %v3281_v16 = vmax.f32 %v7530_v31, %v3280_v48 }
 0x4db   : > { %v3172_v8 = vpop.f32.mrb[64].mxu1 }
 0x4dc   : > { %v3174_v36 = vpop.f32.mrb[65].mxu1  ;;  %3282 = vmax.xlane.f32.xlu0 %v3281_v16  ;;  %v7538_v19 = vmul.f32 0.17677669, %v3172_v8 }
 0x4dd   : > { %v7536_v51 = vmul.f32 0.17677669, %v3174_v36  ;;  %v3176_v12 = vpop.f32.mrb[66].mxu1 }
 0x4de   : > { %v3178_v33 = vpop.f32.mrb[67].mxu1  ;;  %v7544_v42 = vmul.f32 0.17677669, %v3176_v12 }
 0x4df   : > { %v7540_v18 = vmul.f32 0.17677669, %v3178_v33  ;;  %v3284_v56 = vsel %vm3227_vm10, %v7536_v51, -inf }
 0x4e0   : > { %v3285_v52 = vmax.f32 %v7538_v19, %v3284_v56 }
 0x4e1   : > { %v3288_v48 = vsel %vm3227_vm10, %v7540_v18, -inf }
 0x4e2   : > { %3286 = vmax.xlane.f32.xlu1 %v3285_v52  ;;  %v3289_v36 = vmax.f32 %v7544_v42, %v3288_v48 }
 0x4e3   : > { %v3182_v16 = vpop.f32.mrb[68].mxu1 }
 0x4e4   : > { %v3184_v4 = vpop.f32.mrb[69].mxu1  ;;  %3290 = vmax.xlane.f32.xlu0 %v3289_v36  ;;  %v7552_v62 = vmul.f32 0.17677669, %v3182_v16  ;;  %v7567_v16 = vpop.permute.xlu0 %1597 }
 0x4e5   : > { %v7550_v8 = vmul.f32 0.17677669, %v3184_v4  ;;  %v3186_v33 = vpop.f32.mrb[70].mxu1  ;;  %vm1640_vm12 = vcmp.eq.s32.totalorder %v7567_v16, 1 }
 0x4e6   : > { %9797 = vst [vmem:[#allocation83_spill] sm:$0xff] %v7552_v62  ;;  %v3188_v39 = vpop.f32.mrb[71].mxu1  ;;  %v7564_v48 = vmul.f32 0.17677669, %v3186_v33 }
 0x4e7   : > { %9796 = vst [vmem:[#allocation82_spill] sm:$0xff] %v7550_v8  ;;  %v3292_v12 = vsel %vm3227_vm10, %v7550_v8, -inf  ;;  %v7560_v52 = vmul.f32 0.17677669, %v3188_v39 }
 0x4e8   : > { %v3293_v56 = vmax.f32 %v7552_v62, %v3292_v12  ;;  %9799 = vst [vmem:[#allocation85_spill] sm:$0xff] %v7564_v48  ;;  %v7569_v3 = vpop.permute.xlu0 %2411 }
 0x4e9   : > { %9798 = vst [vmem:[#allocation84_spill] sm:$0xff] %v7560_v52  ;;  %v3296_v4 = vsel %vm3227_vm10, %v7560_v52, -inf  ;;  %9800 = vst [vmem:[#allocation86_spill] sm:$0xff] %v7569_v3 }
 0x4ea   : > { %3294 = vmax.xlane.f32.xlu1 %v3293_v56  ;;  %v3297_v36 = vmax.f32 %v7564_v48, %v3296_v4 }
 0x4ec   : > { %v7571_v12 = vpop.permute.xlu0 %1931 }
 0x4ed   : > { %vm1974_vm2 = vcmp.eq.s32.totalorder %v7571_v12, 1 }
 0x4f0   : > { %v7573_v56 = vpop.permute.xlu0 %2577 }
 0x4f1   : > { %9801 = vst [vmem:[#allocation87_spill] sm:$0xff] %v7573_v56 }
 0x4fa   : > { %2113 = vperm.xlu0 %5729, %v7122_v27  }
 0x4fb   : > { %1440 = vrot.lane.b32.xlu1 %v6931_v57, %s6340_s1 }
 0x519   : > { %3298 = vmax.xlane.f32.xlu0 %v3297_v36 }
 0x537   : > { %v3231_v46 = vpop.xlane.xlu0 %3230 }
 0x538   : > { %v3300_v39 = vsub.f32 %v7440_v13, %v3231_v46  ;;  %v3301_v2 = vsub.f32 %v7438_v25, %v3231_v46 }
 0x539   : > { %v3235_v15 = vpop.xlane.xlu1 %3234 }
 0x53a   : > { %v3336_v52 = vmul.f32 1.442695, %v3300_v39  ;;  %v3338_v33 = vmul.f32 1.442695, %v3301_v2  ;;  %v3302_v62 = vsub.f32 %v7446_v32, %v3235_v15  ;;  %v3303_v4 = vsub.f32 %v7442_v5, %v3235_v15 }
 0x53c   : > { %5857 = vpow2.f32 %v3336_v52  ;;  %v3340_v36 = vmul.f32 1.442695, %v3302_v62  ;;  %v3342_v48 = vmul.f32 1.442695, %v3303_v4 }
 0x53d   : > { %5859 = vpow2.f32 %v3338_v33 }
 0x53e   : > { %5861 = vpow2.f32 %v3340_v36 }
 0x53f   : > { %5863 = vpow2.f32 %v3342_v48  ;;  %v3239_v3 = vpop.xlane.xlu0 %3238 }
 0x540   : > { %v3304_v56 = vsub.f32 %v7454_v43, %v3239_v3  ;;  %v3305_v13 = vsub.f32 %v7452_v55, %v3239_v3 }
 0x542   : > { %v3344_v8 = vmul.f32 1.442695, %v3304_v56  ;;  %v3346_v46 = vmul.f32 1.442695, %v3305_v13 }
 0x543   : > { %v3243_v25 = vpop.xlane.xlu0 %3242 }
 0x544   : > { %5865 = vpow2.f32 %v3344_v8  ;;  %v3306_v2 = vsub.f32 %v7463_v7, %v3243_v25  ;;  %v3307_v32 = vsub.f32 %v7456_v28, %v3243_v25 }
 0x545   : > { %5867 = vpow2.f32 %v3346_v46 }
 0x546   : > { %v7583_v15 = vpop.eup %5857  ;;  %v3348_v62 = vmul.f32 1.442695, %v3306_v2  ;;  %v3350_v5 = vmul.f32 1.442695, %v3307_v32 }
 0x547   : > { %v7585_v52 = vpop.eup %5859  ;;  %v3247_v48 = vpop.xlane.xlu1 %3246 }
 0x548   : > { %v7587_v39 = vpop.eup %5861  ;;  %5869 = vpow2.f32 %v3348_v62  ;;  %v3308_v3 = vsub.f32 %v7468_v54, %v3247_v48  ;;  %v3309_v55 = vsub.f32 %v7466_v59, %v3247_v48  ;;  %v3408_v43 = vsel %vm3227_vm10, %v7585_v52, 0.0 }
 0x549   : > { %v7593_v7 = vpop.eup %5863  ;;  %5871 = vpow2.f32 %v3350_v5  ;;  %v3251_v28 = vpop.xlane.xlu0 %3250  ;;  %v3409_v8 = vadd.f32 %v7583_v15, %v3408_v43 }
 0x54a   : > { %v3352_v56 = vmul.f32 1.442695, %v3308_v3  ;;  %v3354_v33 = vmul.f32 1.442695, %v3309_v55  ;;  %v3310_v4 = vsub.f32 %v7474_v40, %v3251_v28  ;;  %v3311_v36 = vsub.f32 %v7470_v22, %v3251_v28 }
 0x54b   : > { %3410 = vadd.xlane.f32.xlu1 %v3409_v8  ;;  %v3412_v54 = vsel %vm3227_vm10, %v7593_v7, 0.0 }
 0x54c   : > { %5873 = vpow2.f32 %v3352_v56  ;;  %v3356_v59 = vmul.f32 1.442695, %v3310_v4  ;;  %v3358_v13 = vmul.f32 1.442695, %v3311_v36  ;;  %v3413_v46 = vadd.f32 %v7587_v39, %v3412_v54 }
 0x54d   : > { %5875 = vpow2.f32 %v3354_v33 }
 0x54e   : > { %v7601_v25 = vpop.eup %5865  ;;  %5877 = vpow2.f32 %v3356_v59  ;;  %3414 = vadd.xlane.f32.xlu0 %v3413_v46 }
 0x54f   : > { %v7603_v2 = vpop.eup %5867  ;;  %5879 = vpow2.f32 %v3358_v13  ;;  %v3255_v40 = vpop.xlane.xlu1 %3254 }
 0x550   : > { %v3312_v22 = vsub.f32 %v7482_v35, %v3255_v40  ;;  %v3313_v32 = vsub.f32 %v7480_v11, %v3255_v40  ;;  %v3416_v62 = vsel %vm3227_vm10, %v7603_v2, 0.0 }
 0x551   : > { %v3417_v5 = vadd.f32 %v7601_v25, %v3416_v62 }
 0x552   : > { %v7610_v48 = vpop.eup %5869  ;;  %v3360_v3 = vmul.f32 1.442695, %v3312_v22  ;;  %v3362_v55 = vmul.f32 1.442695, %v3313_v32 }
 0x553   : > { %v7612_v43 = vpop.eup %5871  ;;  %3418 = vadd.xlane.f32.xlu1 %v3417_v5 }
 0x554   : > { %5881 = vpow2.f32 %v3360_v3  ;;  %v3420_v28 = vsel %vm3227_vm10, %v7612_v43, 0.0 }
 0x555   : > { %5883 = vpow2.f32 %v3362_v55  ;;  %v3421_v35 = vadd.f32 %v7610_v48, %v3420_v28  ;;  %v3259_v55 = vpop.xlane.xlu0 %3258 }
 0x556   : > { %v7617_v11 = vpop.eup %5873 }
 0x557   : > { %9802 = vst [vmem:[#allocation88_spill] sm:$0xff] %v7617_v11  ;;  %v7619_v8 = vpop.eup %5875  ;;  %3422 = vadd.xlane.f32.xlu0 %v3421_v35  ;;  %v3263_v32 = vpop.xlane.xlu1 %3262  ;;  %v3315_v35 = vsub.f32 %v7484_v17, %v3259_v55  ;;  %v9805_v17 = vrot.slane %v7341_v9, 3 }
 0x558   : > { %v7621_v56 = vpop.eup %5877  ;;  %v3424_v33 = vsel %vm3227_vm10, %v7619_v8, 0.0 }
 0x559   : > { %v7625_v4 = vpop.eup %5879  ;;  %v3425_v36 = vadd.f32 %v7617_v11, %v3424_v33 }
 0x55a   : > { %v3428_v54 = vsel %vm3227_vm10, %v7625_v4, 0.0 }
 0x55b   : > { %3426 = vadd.xlane.f32.xlu1 %v3425_v36  ;;  %v3429_v59 = vadd.f32 %v7621_v56, %v3428_v54  ;;  %v3314_v36 = vsub.f32 %v7488_v26, %v3259_v55  ;;  %v3366_v54 = vmul.f32 1.442695, %v3315_v35  ;;  %v3316_v26 = vsub.f32 %v7496_v29, %v3263_v32 }
 0x55c   : > { %v9806_v55 = vrot.slane %v7341_v9, 5 }
 0x55d   : > { %3430 = vadd.xlane.f32.xlu0 %v3429_v59  ;;  %5885 = vpow2.f32 %v3366_v54 }
 0x55e   : > { %v7631_v13 = vpop.eup %5881 }
 0x55f   : > { %9803 = vst [vmem:[#allocation89_spill] sm:$0xff] %v7631_v13  ;;  %v7633_v46 = vpop.eup %5883  ;;  %v3271_v62 = vpop.xlane.xlu1 %3270 }
 0x560   : > { %9804 = vst [vmem:[#allocation90_spill] sm:$0xff] %v7633_v46  ;;  %v3432_v40 = vsel %vm3227_vm10, %v7633_v46, 0.0  ;;  %v3320_v12 = vsub.f32 %v7510_v50, %v3271_v62 }
 0x561   : > { %v3433_v22 = vadd.f32 %v7631_v13, %v3432_v40  ;;  %v3267_v13 = vpop.xlane.xlu0 %3266 }
 0x562   : > { %v3319_v29 = vsub.f32 %v7498_v24, %v3267_v13  ;;  %v3318_v24 = vsub.f32 %v7502_v44, %v3267_v13  ;;  %v3376_v13 = vmul.f32 1.442695, %v3320_v12 }
 0x563   : > { %3434 = vadd.xlane.f32.xlu1 %v3433_v22  ;;  %v3317_v22 = vsub.f32 %v7494_v45, %v3263_v32 }
 0x564   : > { %v3372_v16 = vmul.f32 1.442695, %v3318_v24 }
 0x565   : > { %v3370_v32 = vmul.f32 1.442695, %v3317_v22  ;;  %v3321_v22 = vsub.f32 %v7508_v20, %v3271_v62 }
 0x567   : > { %v3279_v5 = vpop.xlane.xlu1 %3278  ;;  %v7695_v44 = vpop.eup %5885 }
 0x56f   : > { %v7638_v3 = vpop.xlane.xlu1 %3286 }
 0x573   : > { %1442 = vrot.lane.b32.xlu0 %v6934_v58, %s6340_s1  ;;  %v3325_v58 = vsub.f32 %v7522_v63, %v3279_v5  ;;  %v9808_v63 = vrot.slane %v7341_v9, 4 }
 0x574   : > { %2116 = vperm.xlu1 %5728, %v7125_v30  }
 0x577   : > { %v7643_v28 = vpop.xlane.xlu1 %3294 }
 0x57b   : > { %v7646_v33 = vpop.permute.xlu1 %1440 }
 0x57c   : > { %v9657_v59 = vrot.slane %v7646_v33, 3  ;;  %v9660_v40 = vrot.slane %v7646_v33, 4  ;;  %v9659_v46 = vrot.slane %v7646_v33, 5 }
 0x57e   : > { %v7660_v30 = vsel %vm1504_vm6, %v9805_v17, %v9657_v59  ;;  %v7669_v45 = vsel %vm1838_vm8, %v9806_v55, %v9659_v46  ;;  %v7677_v35 = vsel %vm1707_vm7, %v9808_v63, %v9660_v40  ;;  %v3364_v17 = vmul.f32 1.442695, %v3314_v36 }
 0x57f   : > { %9807 = vst [vmem:[#allocation91_spill] sm:$0xff] %v7669_v45  ;;  %v3324_v59 = vsub.f32 %v7524_v6, %v3279_v5  ;;  %v1866_v11 = vmul.f32 %v7218_v0, %v7669_v45  ;;  %v1532_v55 = vmul.f32 %v7173_v61, %v7660_v30  ;;  %v3386_v46 = vmul.f32 1.442695, %v3325_v58  ;;  %v3275_v45 = vpop.xlane.xlu0 %3274 }
 0x580   : > { %v1735_v63 = vmul.f32 %v7176_v21, %v7677_v35  ;;  %v3368_v36 = vmul.f32 1.442695, %v3316_v26  ;;  %5887 = vpow2.f32 %v3364_v17  ;;  %v3374_v6 = vmul.f32 1.442695, %v3319_v29 }
 0x581   : > { %v1658_v54 = vsel %vm1640_vm12, %v1532_v55, 0.0  ;;  %5889 = vpow2.f32 %v3370_v32  ;;  %v3384_v40 = vmul.f32 1.442695, %v3324_v59  ;;  %v1992_v0 = vsel %vm1974_vm2, %v1866_v11, 0.0 }
 0x582   : > { %v1807_v5 = vadd.f32 %v1735_v63, %v1658_v54  ;;  %5891 = vpow2.f32 %v3386_v46  ;;  %v3378_v26 = vmul.f32 1.442695, %v3321_v22  ;;  %v3323_v17 = vsub.f32 %v7512_v38, %v3275_v45 }
 0x583   : > { %5893 = vpow2.f32 %v3368_v36  ;;  %v3322_v20 = vsub.f32 %v7516_v53, %v3275_v45 }
 0x584   : > { %v7691_v58 = vadd.f32 %v1992_v0, %v1807_v5  ;;  %5895 = vpow2.f32 %v3374_v6  ;;  %v3382_v11 = vmul.f32 1.442695, %v3323_v17  ;;  %v3436_v0 = vsel %vm3227_vm10, %v7695_v44, 0.0 }
 0x585   : > { %5897 = vpow2.f32 %v3384_v40  ;;  %v3380_v38 = vmul.f32 1.442695, %v3322_v20  ;;  %v1330_v20 = vld [vmem:[%s9756_s17 + $0x30] sm:$0xff] }
 0x586   : > { %9809 = vst [vmem:[#allocation92_spill] sm:$0xff] %v7691_v58  ;;  %5899 = vpow2.f32 %v3372_v16  ;;  %vm1384_vm13 = vcmp.ge.s32.totalorder %v1330_v20, 1  ;;  %vm1402_vm14 = vcmp.le.s32.totalorder %v1330_v20, 10 }
 0x587   : > { %5901 = vpow2.f32 %v3378_v26 }
 0x588   : > { %5903 = vpow2.f32 %v3376_v13 }
 0x589   : > { %5905 = vpow2.f32 %v3382_v11  ;;  %v2218_v11 = vmul.f32 %v7112_v34, %v6921_v14  ;;  %v2219_v14 = vmul.f32 %v7112_v34, %v6924_v47  ;;  %v1332_v47 = vld [vmem:[%s9756_s17 + $0x40] sm:$0xff] }
 0x58a   : > { %v7698_v46 = vpop.eup %5887  ;;  %5907 = vpow2.f32 %v3380_v38  ;;  %v7751_v38 = vsel %vm1402_vm14, 1, %v9765_v41  ;;  %vm1386_vm4 = vcmp.ge.s32.totalorder %v1332_v47, 1  ;;  %vm1404_vm5 = vcmp.le.s32.totalorder %v1332_v47, 10  ;;  %v9813_v47 = vld [vmem:[#allocation85_spill] sm:$0xff] }
 0x58b   : > { %v7702_v59 = vpop.eup %5889  ;;  %v3437_v40 = vadd.f32 %v7698_v46, %v3436_v0  ;;  %v7746_v0 = vsel %vm1384_vm13, 1, %v9765_v41 }
 0x58c   : > { %v7704_v50 = vpop.eup %5891  ;;  %v3440_v53 = vsel %vm3227_vm10, %v7702_v59, 0.0 }
 0x58d   : > { %v7706_v62 = vpop.eup %5893  ;;  %v3456_v32 = vsel %vm3227_vm10, %v7704_v50, 0.0 }
 0x58e   : > { %v7709_v29 = vpop.eup %5895  ;;  %v3441_v55 = vadd.f32 %v7706_v62, %v3440_v53 }
 0x58f   : > { %v7713_v45 = vpop.eup %5897  ;;  %v3444_v54 = vsel %vm3227_vm10, %v7709_v29, 0.0 }
 0x590   : > { %v7718_v63 = vpop.eup %5899  ;;  %v3457_v36 = vadd.f32 %v7713_v45, %v3456_v32 }
 0x591   : > { %v7723_v24 = vpop.eup %5901  ;;  %v3445_v6 = vadd.f32 %v7718_v63, %v3444_v54  ;;  %v2220_v54 = vmul.f32 %v7112_v34, %v6931_v57 }
 0x592   : > { %3438 = vadd.xlane.f32.xlu0 %v3437_v40  ;;  %v7726_v5 = vpop.eup %5903  ;;  %v3448_v22 = vsel %vm3227_vm10, %v7723_v24, 0.0 }
 0x593   : > { %v7730_v16 = vpop.eup %5905  ;;  %v3449_v12 = vadd.f32 %v7726_v5, %v3448_v22 }
 0x594   : > { %v7733_v26 = vpop.eup %5907  ;;  %v3452_v17 = vsel %vm3227_vm10, %v7730_v16, 0.0 }
 0x595   : > { %v3453_v13 = vadd.f32 %v7733_v26, %v3452_v17  ;;  %v9810_v17 = vld [vmem:[#allocation82_spill] sm:$0xff] }
 0x596   : > { %3442 = vadd.xlane.f32.xlu0 %v3441_v55  ;;  %v3329_v55 = vsub.f32 %v7536_v51, %v7638_v3 }
 0x598   : > { %3458 = vadd.xlane.f32.xlu1 %v3457_v36  ;;  %v3394_v22 = vmul.f32 1.442695, %v3329_v55 }
 0x59a   : > { %3446 = vadd.xlane.f32.xlu0 %v3445_v6 }
 0x59e   : > { %3450 = vadd.xlane.f32.xlu0 %v3449_v12 }
 0x5a2   : > { %3454 = vadd.xlane.f32.xlu0 %v3453_v13  ;;  %v3333_v13 = vsub.f32 %v9810_v17, %v7643_v28 }
 0x5a9   : > { %2834 = vperm.xlu1 %5728, %v7074_v60   ;;  %v7756_v60 = vld [vmem:[%s9756_s17 + $0x38] sm:$0xff] }
 0x5aa   : > { %vm1385_vm15 = vcmp.ge.s32.totalorder %v7756_v60, 1  ;;  %vm1403_vm14 = vcmp.le.s32.totalorder %v7756_v60, 10  ;;  %v9826_v60 = vld [vmem:[#allocation58_spill] sm:$0xff] }
 0x5ab   : > { %v7766_v40 = vsel %vm1385_vm15, 1, %v9765_v41 }
 0x5ad   : > { %2256 = vrot.lane.b32.xlu1 %v2218_v11, %s6340_s1 }
 0x5b1   : > { %1600 = vperm.xlu1 %5728, %v7746_v0  }
 0x5b5   : > { %2414 = vperm.xlu1 %5728, %v7136_v37  }
 0x5b8   : > { %2837 = vperm.xlu0 %5729, %v7071_v49   ;;  %v3283_v49 = vpop.xlane.xlu0 %3282 }
 0x5b9   : > { %1934 = vperm.xlu1 %5728, %v7751_v38   ;;  %v3327_v53 = vsub.f32 %v7526_v10, %v3283_v49  ;;  %v3326_v32 = vsub.f32 %v7530_v31, %v3283_v49  ;;  %v3328_v10 = vsub.f32 %v7538_v19, %v7638_v3 }
 0x5bb   : > { %v3388_v6 = vmul.f32 1.442695, %v3326_v32  ;;  %v3392_v57 = vmul.f32 1.442695, %v3328_v10 }
 0x5bc   : > { %2258 = vrot.lane.b32.xlu0 %v2219_v14, %s6340_s1  ;;  %v3291_v36 = vpop.xlane.xlu0 %3290  ;;  %v3402_v14 = vmul.f32 1.442695, %v3333_v13 }
 0x5bd   : > { %2580 = vperm.xlu1 %5728, %v7122_v27   ;;  %v3390_v27 = vmul.f32 1.442695, %v3327_v53  ;;  %v3331_v31 = vsub.f32 %v7540_v18, %v3291_v36  ;;  %v3330_v51 = vsub.f32 %v7544_v42, %v3291_v36  ;;  %v9811_v18 = vld [vmem:[#allocation83_spill] sm:$0xff]  ;;  %v9812_v42 = vld [vmem:[#allocation84_spill] sm:$0xff]  ;;  %v7800_v53 = vsel %vm1404_vm5, 1, %v9765_v41 }
 0x5be   : > { %v3332_v11 = vsub.f32 %v9811_v18, %v7643_v28 }
 0x5bf   : > { %5909 = vpow2.f32 %v3390_v27  ;;  %v3398_v19 = vmul.f32 1.442695, %v3331_v31  ;;  %v3396_v20 = vmul.f32 1.442695, %v3330_v51  ;;  %v7815_v31 = vld [vmem:[%s9756_s17 + $0x48] sm:$0xff] }
 0x5c0   : > { %1603 = vperm.xlu0 %5729, %v7766_v40   ;;  %v7789_v12 = vpop.permute.xlu0 %2113  ;;  %5911 = vpow2.f32 %v3388_v6  ;;  %v3400_v55 = vmul.f32 1.442695, %v3332_v11  ;;  %vm1387_vm3 = vcmp.ge.s32.totalorder %v7815_v31, 1 }
 0x5c1   : > { %1444 = vrot.lane.b32.xlu1 %v6945_v1, %s6340_s1  ;;  %5913 = vpow2.f32 %v3394_v22 }
 0x5c2   : > { %5915 = vpow2.f32 %v3392_v57 }
 0x5c3   : > { %5917 = vpow2.f32 %v3398_v19 }
 0x5c4   : > { %v3299_v3 = vpop.xlane.xlu0 %3298  ;;  %5919 = vpow2.f32 %v3396_v20  ;;  %v9817_v20 = vld [vmem:[#allocation48_spill] sm:$0xff] }
 0x5c5   : > { %2122 = vperm.xlu1 %5728, %v7766_v40   ;;  %v3335_v49 = vsub.f32 %v9812_v42, %v3299_v3  ;;  %5921 = vpow2.f32 %v3402_v14  ;;  %v3334_v36 = vsub.f32 %v9813_v47, %v3299_v3  ;;  %v7832_v14 = vsel %vm1387_vm3, 1, %v9765_v41 }
 0x5c6   : > { %vm1405_vm3 = vcmp.le.s32.totalorder %v7815_v31, 10 }
 0x5c7   : > { %v3406_v28 = vmul.f32 1.442695, %v3335_v49  ;;  %v3404_v51 = vmul.f32 1.442695, %v3334_v36 }
 0x5c9   : > { %2840 = vperm.xlu1 %5728, %v7136_v37   ;;  %v7787_v37 = vsel %vm1386_vm4, 1, %v9765_v41  ;;  %v7802_v32 = vpop.eup %5909 }
 0x5ca   : > { %v3460_v10 = vsel %vm3227_vm10, %v7802_v32, 0.0 }
 0x5cd   : > { %2260 = vrot.lane.b32.xlu1 %v2220_v54, %s6340_s1  ;;  %v7806_v54 = vpop.eup %5911 }
 0x5ce   : > { %v7810_v22 = vpop.eup %5913  ;;  %v3461_v57 = vadd.f32 %v7806_v54, %v3460_v10 }
 0x5cf   : > { %9814 = vst [vmem:[#allocation82_spill] sm:$0xff] %v7810_v22  ;;  %v7819_v17 = vpop.eup %5915  ;;  %v3464_v13 = vsel %vm3227_vm10, %v7810_v22, 0.0  ;;  %v9845_v22 = vrot.slane %v7646_v33, 4 }
 0x5d0   : > { %9815 = vst [vmem:[#allocation83_spill] sm:$0xff] %v7819_v17  ;;  %v7824_v19 = vpop.eup %5917  ;;  %v3465_v11 = vadd.f32 %v7819_v17, %v3464_v13  ;;  %v9838_v17 = vld [vmem:[#allocation75_spill] sm:$0xff] }
 0x5d1   : > { %1606 = vperm.xlu1 %5728, %v7787_v37   ;;  %9816 = vst [vmem:[#allocation84_spill] sm:$0xff] %v7824_v19  ;;  %v7828_v18 = vpop.eup %5919  ;;  %v3468_v49 = vsel %vm3227_vm10, %v7824_v19, 0.0 }
 0x5d2   : > { %9818 = vst [vmem:[#allocation85_spill] sm:$0xff] %v7828_v18  ;;  %v7834_v42 = vpop.eup %5921  ;;  %v3469_v36 = vadd.f32 %v7828_v18, %v3468_v49  ;;  %v1334_v49 = vld [vmem:[%s9756_s17 + $0x50] sm:$0xff] }
 0x5d3   : > { %9819 = vst [vmem:[#allocation48_spill] sm:$0xff] %v7834_v42  ;;  %vm1388_vm12 = vcmp.ge.s32.totalorder %v1334_v49, 1  ;;  %vm1406_vm2 = vcmp.le.s32.totalorder %v1334_v49, 10 }
 0x5d5   : > { %2420 = vperm.xlu1 %5728, %v7751_v38  }
 0x5d8   : > { %v3411_v27 = vpop.xlane.xlu1 %3410 }
 0x5d9   : > { %1940 = vperm.xlu1 %5728, %v7800_v53   ;;  %5923 = vrcp.f32 %v3411_v27 }
 0x5db   : > { %v3415_v6 = vpop.xlane.xlu0 %3414 }
 0x5dc   : > { %5925 = vrcp.f32 %v3415_v6 }
 0x5dd   : > { %5927 = vpow2.f32 %v3400_v55  ;;  %2586 = vperm.xlu1 %5728, %v7746_v0  }
 0x5de   : > { %5929 = vpow2.f32 %v3406_v28  ;;  %v3472_v28 = vsel %vm3227_vm10, %v7834_v42, 0.0 }
 0x5df   : > { %3462 = vadd.xlane.f32.xlu0 %v3461_v57  ;;  %5931 = vpow2.f32 %v3404_v51 }
 0x5e0   : > { %v3419_v3 = vpop.xlane.xlu1 %3418 }
 0x5e1   : > { %1448 = vrot.lane.b32.xlu1 %v9817_v20, %s6340_s1  ;;  %5933 = vrcp.f32 %v3419_v3 }
 0x5e3   : > { %v5924_v27 = vpop.eup %5923  ;;  %3466 = vadd.xlane.f32.xlu0 %v3465_v11 }
 0x5e4   : > { %v3423_v55 = vpop.xlane.xlu0 %3422  ;;  %v3481_v10 = vmul.f32 %v5924_v27, %v7583_v15  ;;  %v3482_v57 = vmul.f32 %v5924_v27, %v7585_v52 }
 0x5e5   : > { %5935 = vrcp.f32 %v3423_v55  ;;  %2128 = vperm.xlu1 %5728, %v7832_v14  }
 0x5e6   : > { %v5926_v47 = vpop.eup %5925 }
 0x5e7   : > { %v7842_v6 = vpop.eup %5927  ;;  %v3484_v51 = vmul.f32 %v5926_v47, %v7587_v39  ;;  %v3485_v13 = vmul.f32 %v5926_v47, %v7593_v7  ;;  %3470 = vadd.xlane.f32.xlu0 %v3469_v36  ;;  %v2222_v7 = vmul.f32 %v7112_v34, %v6945_v1  ;;  %v7865_v36 = vsel %vm1388_vm12, 1, %v9765_v41 }
 0x5e8   : > { %9820 = vst [vmem:[#allocation93_spill] sm:$0xff] %v7842_v6  ;;  %v7848_v3 = vpop.eup %5929  ;;  %v3427_v11 = vpop.xlane.xlu1 %3426  ;;  %v3473_v15 = vadd.f32 %v7842_v6, %v3472_v28 }
 0x5e9   : > { %9821 = vst [vmem:[#allocation94_spill] sm:$0xff] %v7848_v3  ;;  %2846 = vperm.xlu1 %5728, %v7751_v38   ;;  %v3535_v55 = vpack.c.bf16 %v3485_v13, %v3482_v57  ;;  %v3534_v58 = vpack.c.bf16 %v3484_v51, %v3481_v10  ;;  %5937 = vrcp.f32 %v3427_v11  ;;  %v7855_v39 = vpop.eup %5931  ;;  %v3476_v27 = vsel %vm3227_vm10, %v7848_v3, 0.0  ;;  %v9837_v3 = vld [vmem:[#allocation89_spill] sm:$0xff] }
 0x5ea   : > { %9822 = vst [vmem:[#allocation95_spill] sm:$0xff] %v7855_v39  ;;  %v3431_v52 = vpop.xlane.xlu0 %3430  ;;  %v3477_v47 = vadd.f32 %v7855_v39, %v3476_v27  ;;  %v7883_v27 = vld [vmem:[%s9756_s17 + $0x58] sm:$0xff]  ;;  %v9836_v39 = vld [vmem:[#allocation90_spill] sm:$0xff] }
 0x5eb   : > { %5117 = vmatprep.mubr.msk.bf16.mxu0 %vm3227_vm10, %v3535_v55  ;;  %5939 = vrcp.f32 %v3431_v52  ;;  %3474 = vadd.xlane.f32.xlu0 %v3473_v15  ;;  %v5934_v38 = vpop.eup %5933  ;;  %v9823_v52 = vld [vmem:[#allocation88_spill] sm:$0xff]  ;;  %vm1389_vm13 = vcmp.ge.s32.totalorder %v7883_v27, 1 }
 0x5ec   : > { %3657 = vmatmul.mubr.bf16.vlgmr.msra.gmra.mrb[36].mxu0 %v3534_v58  ;;  %v3488_v10 = vmul.f32 %v5934_v38, %v7603_v2  ;;  %v3487_v51 = vmul.f32 %v5934_v38, %v7601_v25  ;;  %v1907_v2 = vsel %vm1406_vm2, 1, %v9765_v41  ;;  %v7896_v38 = vsel %vm1403_vm14, 1, %v9765_v41 }
 0x5ed   : > { %2264 = vrot.lane.b32.xlu1 %v2222_v7, %s6340_s1 }
 0x5ef   : > { %v5936_v28 = vpop.eup %5935  ;;  %3478 = vadd.xlane.f32.xlu0 %v3477_v47  ;;  %v1336_v47 = vld [vmem:[%s9756_s17 + $0x60] sm:$0xff] }
 0x5f0   : > { %v3491_v1 = vmul.f32 %v5936_v28, %v7612_v43  ;;  %v3490_v57 = vmul.f32 %v5936_v28, %v7610_v48  ;;  %v2224_v28 = vmul.f32 %v7112_v34, %v9817_v20  ;;  %vm1390_vm15 = vcmp.ge.s32.totalorder %v1336_v47, 1  ;;  %v3435_v20 = vpop.xlane.xlu1 %3434 }
 0x5f1   : > { %1612 = vperm.xlu1 %5728, %v7865_v36   ;;  %vm1408_vm4 = vcmp.le.s32.totalorder %v1336_v47, 10  ;;  %5941 = vrcp.f32 %v3435_v20 }
 0x5f2   : > { %v3537_v58 = vpack.c.bf16 %v3491_v1, %v3488_v10  ;;  %v3536_v13 = vpack.c.bf16 %v3490_v57, %v3487_v51  ;;  %v7908_v10 = vsel %vm1390_vm15, 1, %v9765_v41  ;;  %v7915_v1 = vsel %vm1408_vm4, 1, %v9765_v41  ;;  %v7919_v51 = vpop.permute.xlu0 %1442  ;;  %v9828_v57 = vld [vmem:[#allocation46_spill] sm:$0xff] }
 0x5f3   : > { %v5938_v11 = vpop.eup %5937 }
 0x5f4   : > { %5118 = vmatprep.mubr.msk.bf16.mxu0 %vm3227_vm10, %v3537_v58  ;;  %v3494_v43 = vmul.f32 %v5938_v11, %v7619_v8  ;;  %v3493_v7 = vmul.f32 %v5938_v11, %v9823_v52  ;;  %v9824_v8 = vld [vmem:[#allocation50_spill] sm:$0xff]  ;;  %v2221_v58 = vmul.f32 %v7112_v34, %v9828_v57  ;;  %v7931_v11 = vpop.permute.xlu1 %2116  ;;  %v9672_v52 = vrot.slane %v7341_v9, 7 }
 0x5f5   : > { %2426 = vperm.xlu1 %5728, %v7800_v53   ;;  %3665 = vmatmul.mubr.bf16.gmra.mrb[40].mxu0 %v3536_v13  ;;  %v5940_v55 = vpop.eup %5939  ;;  %9829 = vst [vmem:[#allocation88_spill] sm:$0xff] %v7931_v11 }
 0x5f6   : > { %v3497_v25 = vmul.f32 %v5940_v55, %v7625_v4  ;;  %v3496_v48 = vmul.f32 %v5940_v55, %v7621_v56  ;;  %v7890_v56 = vsel %vm1389_vm13, 1, %v9765_v41  ;;  %v9825_v4 = vld [vmem:[#allocation59_spill] sm:$0xff]  ;;  %v9830_v55 = vld [vmem:[#allocation52_spill] sm:$0xff]  ;;  %vm2157_vm13 = vcmp.eq.s32.totalorder %v9838_v17, 1 }
 0x5f8   : > { %v3539_v15 = vpack.c.bf16 %v3497_v25, %v3494_v43  ;;  %v3538_v49 = vpack.c.bf16 %v3496_v48, %v3493_v7  ;;  %v7947_v7 = vsel %vm1405_vm3, 1, %v9765_v41 }
 0x5f9   : > { %1946 = vperm.xlu1 %5728, %v1907_v2  }
 0x5fa   : > { %5119 = vmatprep.mubr.msk.bf16.mxu0 %vm3227_vm10, %v3539_v15  ;;  %v9664_v15 = vrot.slane %v7341_v9, 1 }
 0x5fd   : > { %2592 = vperm.xlu1 %5728, %v7787_v37   ;;  %3673 = vmatmul.mubr.bf16.gmra.mrb[44].mxu0 %v3538_v49  ;;  %v7952_v49 = vld [vmem:[%s9756_s17 + $0x70] sm:$0xff] }
 0x5fe   : > { %vm1392_vm12 = vcmp.ge.s32.totalorder %v7952_v49, 1  ;;  %vm1410_vm15 = vcmp.le.s32.totalorder %v7952_v49, 10  ;;  %v9851_v49 = vrot.slane %v7341_v9, 1 }
 0x601   : > { %1452 = vrot.lane.b32.xlu1 %v9824_v8, %s6340_s1 }
 0x605   : > { %2134 = vperm.xlu1 %5728, %v7890_v56   ;;  %2417 = vperm.xlu0 %5729, %v9825_v4  }
 0x609   : > { %2852 = vperm.xlu1 %5728, %v7800_v53   ;;  %1937 = vperm.xlu0 %5729, %v7896_v38   ;;  %v9827_v53 = vld [vmem:[#allocation47_spill] sm:$0xff] }
 0x60d   : > { %2268 = vrot.lane.b32.xlu1 %v2224_v28, %s6340_s1  ;;  %2583 = vperm.xlu0 %5729, %v9826_v60   ;;  %v9831_v60 = vld [vmem:[#allocation66_spill] sm:$0xff] }
 0x60e   : > { %v9832_v20 = vrot.slane %v9831_v60, 1  ;;  %v9835_v11 = vrot.slane %v9831_v60, 7  ;;  %v7983_v60 = vsel %vm1392_vm12, 1, %v9765_v41 }
 0x610   : > { %v2357_v57 = vsel %vm2342_vm9, %v9832_v20, %v9664_v15  ;;  %v2056_v20 = vsel %vm2041_vm11, %v9835_v11, %v9672_v52  ;;  %v9840_v11 = vrot.slane %v7919_v51, 3  ;;  %v9844_v52 = vrot.slane %v7919_v51, 4 }
 0x611   : > { %1618 = vperm.xlu1 %5728, %v7908_v10   ;;  %2119 = vperm.xlu0 %5729, %v7746_v0   ;;  %v7926_v0 = vld [vmem:[%s9756_s17 + $0x68] sm:$0xff] }
 0x612   : > { %vm1391_vm5 = vcmp.ge.s32.totalorder %v7926_v0, 1 }
 0x613   : > { %v7937_v43 = vsel %vm1391_vm5, 1, %v9765_v41 }
 0x615   : > { %2432 = vperm.xlu1 %5728, %v1907_v2   ;;  %1446 = vrot.lane.b32.xlu0 %v9827_v53, %s6340_s1 }
 0x619   : > { %1952 = vperm.xlu1 %5728, %v7915_v1   ;;  %2843 = vperm.xlu0 %5729, %v9825_v4   ;;  %v5942_v4 = vpop.eup %5941 }
 0x61a   : > { %v3499_v42 = vmul.f32 %v5942_v4, %v9837_v3 }
 0x61d   : > { %2598 = vperm.xlu1 %5728, %v7865_v36   ;;  %2262 = vrot.lane.b32.xlu0 %v2221_v58, %s6340_s1  ;;  %v2226_v58 = vmul.f32 %v7112_v34, %v9824_v8  ;;  %v3500_v8 = vmul.f32 %v5942_v4, %v9836_v39  ;;  %v9841_v39 = vrot.slane %v7646_v33, 3 }
 0x61f   : > { %v3439_v13 = vpop.xlane.xlu0 %3438 }
 0x620   : > { %5943 = vrcp.f32 %v3439_v13 }
 0x621   : > { %1456 = vrot.lane.b32.xlu1 %v9830_v55, %s6340_s1  ;;  %1609 = vperm.xlu0 %5729, %v7832_v14  }
 0x623   : > { %v3443_v25 = vpop.xlane.xlu0 %3442 }
 0x624   : > { %5945 = vrcp.f32 %v3443_v25  ;;  %v9833_v25 = vld [vmem:[#allocation79_spill] sm:$0xff] }
 0x625   : > { %2140 = vperm.xlu1 %5728, %v7937_v43   ;;  %v7941_v48 = vpop.xlane.xlu1 %3458  ;;  %2423 = vperm.xlu0 %5729, %v7896_v38   ;;  %vm2457_vm2 = vcmp.eq.s32.totalorder %v9833_v25, 1 }
 0x627   : > { %v3447_v31 = vpop.xlane.xlu0 %3446 }
 0x628   : > { %5947 = vrcp.f32 %v3447_v31 }
 0x629   : > { %2858 = vperm.xlu1 %5728, %v1907_v2   ;;  %v2835_v47 = vpop.permute.xlu1 %2834  ;;  %1943 = vperm.xlu0 %5729, %v7947_v7   ;;  %v9834_v2 = vld [vmem:[#allocation77_spill] sm:$0xff] }
 0x62a   : > { %v5944_v13 = vpop.eup %5943  ;;  %v2515_v31 = vmul.f32 %v9834_v2, %v7660_v30  ;;  %v9839_v30 = vld [vmem:[#allocation76_spill] sm:$0xff]  ;;  %vm2883_vm4 = vcmp.eq.s32.totalorder %v2835_v47, 1 }
 0x62b   : > { %v3451_v15 = vpop.xlane.xlu0 %3450  ;;  %v3503_v6 = vmul.f32 %v5944_v13, %v7695_v44  ;;  %v3502_v18 = vmul.f32 %v5944_v13, %v7698_v46  ;;  %v2367_v28 = vmul.f32 %v9839_v30, %v2357_v57  ;;  %v7991_v44 = vsel %vm1504_vm6, %v9841_v39, %v9840_v11  ;;  %v9842_v46 = vld [vmem:[#allocation68_spill] sm:$0xff]  ;;  %v9843_v13 = vld [vmem:[#allocation81_spill] sm:$0xff] }
 0x62c   : > { %5949 = vrcp.f32 %v3451_v15  ;;  %vm2623_vm14 = vcmp.eq.s32.totalorder %v9843_v13, 1  ;;  %v8004_v11 = vsel %vm1707_vm7, %v9845_v22, %v9844_v52  ;;  %v9846_v15 = vld [vmem:[#allocation67_spill] sm:$0xff]  ;;  %v1533_v22 = vmul.f32 %v7173_v61, %v7991_v44 }
 0x62d   : > { %2272 = vrot.lane.b32.xlu1 %v2226_v58, %s6340_s1  ;;  %v2257_v19 = vpop.permute.xlu1 %2256  ;;  %2589 = vperm.xlu0 %5729, %v7766_v40   ;;  %v3541_v4 = vpack.c.bf16 %v3503_v6, %v3500_v8  ;;  %v3540_v57 = vpack.c.bf16 %v3502_v18, %v3499_v42  ;;  %v2475_v58 = vsel %vm2457_vm2, %v2367_v28, 0.0  ;;  %v2067_v39 = vmul.f32 %v9846_v15, %v2056_v20  ;;  %v9847_v40 = vld [vmem:[#allocation78_spill] sm:$0xff]  ;;  %v8019_v8 = vld [vmem:[#allocation6 + $0x8] ss:$0 sm:$0xff] }
 0x62e   : > { %v2308_v3 = vadd.f32 %v2257_v19, %v9842_v46  ;;  %v5946_v19 = vpop.eup %5945  ;;  %v2641_v46 = vsel %vm2623_vm14, %v2515_v31, 0.0  ;;  %v2681_v18 = vmul.f32 %v9847_v40, %v7677_v35  ;;  %v2328_v28 = vrot.slane %v7646_v33, 1 }
 0x62f   : > { %5120 = vmatprep.mubr.msk.bf16.mxu0 %vm3227_vm10, %v3541_v4  ;;  %v3455_v6 = vpop.xlane.xlu0 %3454  ;;  %v1825_v52 = vrot.slane %v7919_v51, 5  ;;  %v1736_v31 = vmul.f32 %v7176_v21, %v8004_v11  ;;  %v3505_v13 = vmul.f32 %v5946_v19, %v7706_v62 }
 0x630   : > { %v2493_v42 = vadd.f32 %v2475_v58, %v2308_v3  ;;  %5951 = vrcp.f32 %v3455_v6  ;;  %3681 = vmatmul.mubr.bf16.gmra.mrb[48].mxu0 %v3540_v57  ;;  %v9848_v3 = vld [vmem:[#allocation91_spill] sm:$0xff]  ;;  %v3506_v58 = vmul.f32 %v5946_v19, %v7702_v59  ;;  %v9849_v59 = vld [vmem:[#allocation49_spill] sm:$0xff] }
 0x631   : > { %1624 = vperm.xlu1 %5728, %v7983_v60   ;;  %v1601_v25 = vpop.permute.xlu1 %1600  ;;  %2125 = vperm.xlu0 %5729, %v7787_v37   ;;  %v2775_v4 = vmul.f32 %v8019_v8, %v9848_v3  ;;  %v8033_v3 = vsel %vm1410_vm15, 1, %v9765_v41  ;;  %vm1407_vm15 = vcmp.le.s32.totalorder %v7883_v27, 10  ;;  %5953 = vrcp.f32 %v7941_v48 }
 0x632   : > { %v2659_v35 = vadd.f32 %v2641_v46, %v2493_v42  ;;  %vm1641_vm5 = vcmp.eq.s32.totalorder %v1601_v25, 1  ;;  %v5948_v20 = vpop.eup %5947 }
 0x633   : > { %v1659_v57 = vsel %vm1641_vm5, %v1533_v22, 0.0  ;;  %v3509_v46 = vmul.f32 %v5948_v20, %v7709_v29  ;;  %v3508_v42 = vmul.f32 %v5948_v20, %v7718_v63  ;;  %v2901_v25 = vsel %vm2883_vm4, %v2775_v4, 0.0  ;;  %v8054_v20 = vld [vmem:[%s9537_s7] ss:$0 sm:$0xff] }
 0x634   : > { %v2753_v6 = vadd.f32 %v2681_v18, %v2659_v35  ;;  %v1808_v47 = vadd.f32 %v1736_v31, %v1659_v57  ;;  %v9850_v29 = vrot.slane %v7646_v33, 5  ;;  %v2175_v18 = vsel %vm2157_vm13, %v2067_v39, 0.0  ;;  %v9852_v39 = vld [vmem:[#allocation65_spill] sm:$0xff] }
 0x635   : > { %2438 = vperm.xlu1 %5728, %v7915_v1   ;;  %v8028_v37 = vpop.permute.xlu1 %2414  ;;  %1450 = vrot.lane.b32.xlu0 %v9849_v59, %s6340_s1  ;;  %v3543_v62 = vpack.c.bf16 %v3509_v46, %v3506_v58  ;;  %v3542_v19 = vpack.c.bf16 %v3508_v42, %v3505_v13  ;;  %v2356_v35 = vsel %vm2342_vm9, %v9851_v49, %v2328_v28  ;;  %v5761_v13 = vld [vmem:[#allocation9] sm:$0xff]   ;;  %vm2158_vm5 = vcmp.eq.s32.totalorder %v7789_v12, 1 }
 0x636   : > { %v2919_v22 = vadd.f32 %v2901_v25, %v2753_v6  ;;  %v1851_v63 = vsel %vm1838_vm8, %v9850_v29, %v1825_v52  ;;  %v5950_v31 = vpop.eup %5949  ;;  %v9853_v6 = vld [vmem:[#allocation69_spill] sm:$0xff]  ;;  %v2368_v42 = vmul.f32 %v9839_v30, %v2356_v35  ;;  %v2223_v25 = vmul.f32 %v7112_v34, %v9827_v53  ;;  %5389 = vmatpush3.bf16.msra.mxu0 %v5761_v13  ;;  %v8077_v53 = vld [vmem:[%s9756_s17 + $0x78] sm:$0xff] }
 0x637   : > { %5121 = vmatprep.mubr.msk.bf16.mxu0 %vm3227_vm10, %v3543_v62  ;;  %v2838_v57 = vpop.permute.xlu0 %2837  ;;  %v1867_v58 = vmul.f32 %v9852_v39, %v1851_v63  ;;  %v2193_v46 = vadd.f32 %v2175_v18, %v9853_v6  ;;  %v2516_v62 = vmul.f32 %v9834_v2, %v7991_v44  ;;  %v3511_v49 = vmul.f32 %v5950_v31, %v7726_v5 }
 0x638   : > { %v2944_v4 = vadd.f32 %v8054_v20, %v2919_v22  ;;  %3689 = vmatmul.mubr.bf16.gmra.mrb[52].mxu0 %v3542_v19  ;;  %v3512_v19 = vmul.f32 %v5950_v31, %v7723_v24  ;;  %5620 = vmatpush3.bf16.msra.mxu1 %v5761_v13  ;;  %v9854_v44 = vmov 0.0   ;;  %v9855_v24 = vld [vmem:[#allocation86_spill] sm:$0xff]  ;;  %v2027_v5 = vrot.slane %v7646_v33, 7  ;;  %v9856_v13 = vld [vmem:[#allocation87_spill] sm:$0xff] }
 0x639   : > { %1958 = vperm.xlu1 %5728, %v8033_v3   ;;  %v1935_v17 = vpop.permute.xlu1 %1934  ;;  %2849 = vperm.xlu0 %5729, %v7896_v38   ;;  %vm2458_vm12 = vcmp.eq.s32.totalorder %v9855_v24, 1  ;;  %vm2624_vm2 = vcmp.eq.s32.totalorder %v9856_v13, 1  ;;  %vm1393_vm13 = vcmp.ge.s32.totalorder %v8077_v53, 1  ;;  %vm2884_vm14 = vcmp.eq.s32.totalorder %v2838_v57, 1 }
 0x63a   : > { %2962 = vst.msk [vmem:[#allocation5 + $0x10] sm:$0xff] %vm986_vm1, %v2944_v4  ;;  %vm1975_vm3 = vcmp.eq.s32.totalorder %v1935_v17, 1  ;;  %v5952_v22 = vpop.eup %5951  ;;  %v5762_v4 = vld [vmem:[#allocation9 + $0x8] sm:$0xff]   ;;  %5390 = vmatprep.subr.bf16.mxu0 %v9854_v44  ;;  %5617 = vmatprep.subr.bf16.mxu1 %v9854_v44  ;;  %v8110_v57 = vsel %vm1393_vm13, 1, %v9765_v41  ;;  %v9860_v24 = vrot.slane %v7919_v51, 4 }
 0x63b   : > { %v1993_v29 = vsel %vm1975_vm3, %v1867_v58, 0.0  ;;  %v2259_v18 = vpop.permute.xlu0 %2258  ;;  %v3515_v35 = vmul.f32 %v5952_v22, %v7730_v16  ;;  %v3514_v17 = vmul.f32 %v5952_v22, %v7733_v26  ;;  %v2476_v16 = vsel %vm2458_vm12, %v2368_v42, 0.0  ;;  %5391 = vmatpush3.bf16.msra.mxu0 %v5762_v4 }
 0x63c   : > { %v8070_v38 = vadd.f32 %v1993_v29, %v1808_v47  ;;  %v2309_v47 = vadd.f32 %v2259_v18, %v2193_v46  ;;  %5621 = vmatpush3.bf16.msra.mxu1 %v5762_v4  ;;  %v2642_v22 = vsel %vm2624_vm2, %v2516_v62, 0.0  ;;  %5392 = vmatprep.subr.bf16.mxu0 %v9854_v44  ;;  %v2682_v46 = vmul.f32 %v9847_v40, %v8004_v11 }
 0x63d   : > { %2604 = vperm.xlu1 %5728, %v7908_v10   ;;  %v8084_v31 = vpop.permute.xlu1 %2580  ;;  %2266 = vrot.lane.b32.xlu0 %v2223_v25, %s6340_s1  ;;  %v3545_v26 = vpack.c.bf16 %v3515_v35, %v3512_v19  ;;  %v3544_v58 = vpack.c.bf16 %v3514_v17, %v3511_v49  ;;  %v9857_v25 = vld [vmem:[#allocation54_spill] sm:$0xff]  ;;  %v9858_v19 = vrot.slane %v7341_v9, 7  ;;  %v2776_v49 = vmul.f32 %v8019_v8, %v1851_v63 }
 0x63e   : > { %v2494_v6 = vadd.f32 %v2476_v16, %v2309_v47  ;;  %5618 = vmatprep.subr.bf16.mxu1 %v9854_v44  ;;  %v9859_v63 = vrot.slane %v7919_v51, 3  ;;  %vm2459_vm12 = vcmp.eq.s32.totalorder %v8028_v37, 1  ;;  %vm1411_vm2 = vcmp.le.s32.totalorder %v8077_v53, 10 }
 0x63f   : > { %5122 = vmatprep.mubr.msk.bf16.mxu0 %vm3227_vm10, %v3545_v26  ;;  %v2055_v62 = vsel %vm2041_vm11, %v9858_v19, %v2027_v5  ;;  %v2902_v9 = vsel %vm2884_vm14, %v2776_v49, 0.0  ;;  %v1604_v35 = vpop.permute.xlu0 %1603  ;;  %vm2625_vm13 = vcmp.eq.s32.totalorder %v8084_v31, 1 }
 0x640   : > { %v2660_v42 = vadd.f32 %v2642_v22, %v2494_v6  ;;  %3697 = vmatmul.mubr.bf16.gmra.mrb[56].mxu0 %v3544_v58  ;;  %v2068_v27 = vmul.f32 %v9846_v15, %v2055_v62  ;;  %v2329_v58 = vrot.slane %v7919_v51, 1  ;;  %vm1642_vm4 = vcmp.eq.s32.totalorder %v1604_v35, 1 }
 0x641   : > { %1460 = vrot.lane.b32.xlu1 %v9857_v25, %s6340_s1  ;;  %v8095_v29 = vpop.permute.xlu1 %1444  ;;  %1615 = vperm.xlu0 %5729, %v7890_v56   ;;  %v2228_v35 = vmul.f32 %v7112_v34, %v9830_v55 }
 0x642   : > { %v1492_v4 = vrot.slane %v8095_v29, 3  ;;  %v9675_v11 = vrot.slane %v8095_v29, 4  ;;  %v2754_v18 = vadd.f32 %v2682_v46, %v2660_v42  ;;  %v8136_v46 = vsel %vm1407_vm15, 1, %v9765_v41  ;;  %v8142_v42 = vld [vmem:[%s9756_s17 + $0x80] sm:$0xff] }
 0x643   : > { %v2176_v49 = vsel %vm2158_vm5, %v2068_v27, 0.0  ;;  %v2355_v12 = vsel %vm2342_vm9, %v2328_v28, %v2329_v58  ;;  %vm1394_vm3 = vcmp.ge.s32.totalorder %v8142_v42, 1  ;;  %vm1412_vm15 = vcmp.le.s32.totalorder %v8142_v42, 10  ;;  %v9864_v42 = vld [vmem:[#allocation53_spill] sm:$0xff] }
 0x644   : > { %v1516_v17 = vsel %vm1504_vm6, %v9859_v63, %v1492_v4  ;;  %v1719_v47 = vsel %vm1707_vm7, %v9860_v24, %v9675_v11  ;;  %v2920_v16 = vadd.f32 %v2902_v9, %v2754_v18  ;;  %v5763_v9 = vld [vmem:[#allocation9 + $0x10] sm:$0xff]   ;;  %v9676_v63 = vrot.slane %v8095_v29, 5  ;;  %v9861_v24 = vld [vmem:[#allocation80_spill] sm:$0xff] }
 0x645   : > { %2146 = vperm.xlu1 %5728, %v8110_v57   ;;  %v8127_v26 = vpop.permute.xlu1 %2122  ;;  %2429 = vperm.xlu0 %5729, %v7947_v7   ;;  %v1534_v13 = vmul.f32 %v7173_v61, %v1516_v17  ;;  %v1737_v6 = vmul.f32 %v7176_v21, %v1719_v47  ;;  %v2369_v28 = vmul.f32 %v9839_v30, %v2355_v12  ;;  %v1579_v37 = vsel %vm1394_vm3, 1, %v9765_v41 }
 0x646   : > { %v2945_v22 = vadd.f32 %v8054_v20, %v2920_v16  ;;  %5393 = vmatpush3.bf16.msra.mxu0 %v5763_v9  ;;  %5622 = vmatpush3.bf16.msra.mxu1 %v5763_v9  ;;  %v2194_v16 = vadd.f32 %v2176_v49, %v9861_v24  ;;  %v2517_v27 = vmul.f32 %v9834_v2, %v1516_v17  ;;  %v8187_v49 = vsel %vm1411_vm2, 1, %v9765_v41 }
 0x647   : > { %v1660_v19 = vsel %vm1642_vm4, %v1534_v13, 0.0  ;;  %5394 = vmatprep.subr.bf16.mxu0 %v9854_v44  ;;  %5619 = vmatprep.subr.bf16.mxu1 %v9854_v44  ;;  %v8178_v17 = vsel %vm1838_vm8, %v1825_v52, %v9676_v63  ;;  %v2683_v31 = vmul.f32 %v9847_v40, %v1719_v47  ;;  %vm1409_vm4 = vcmp.le.s32.totalorder %v7926_v0, 10 }
 0x648   : > { %2963 = vst.msk [vmem:[#allocation5 + $0x18] sm:$0xff] %vm986_vm1, %v2945_v22  ;;  %v8146_v18 = vadd.f32 %v1737_v6, %v1660_v19  ;;  %v2477_v6 = vsel %vm2459_vm12, %v2369_v28, 0.0  ;;  %v2643_v22 = vsel %vm2625_vm13, %v2517_v27, 0.0  ;;  %v2777_v52 = vmul.f32 %v8019_v8, %v8178_v17 }
 0x649   : > { %2864 = vperm.xlu1 %5728, %v7915_v1   ;;  %v2841_v62 = vpop.permute.xlu1 %2840  ;;  %1949 = vperm.xlu0 %5729, %v8136_v46   ;;  %v5764_v1 = vld [vmem:[#allocation9 + $0x18] sm:$0xff]  }
 0x64a   : > { %5395 = vmatpush3.bf16.msra.mxu0 %v5764_v1  ;;  %5623 = vmatpush3.bf16.msra.mxu1 %v5764_v1  ;;  %vm2885_vm14 = vcmp.eq.s32.totalorder %v2841_v62, 1  ;;  %v9862_v1 = vld [vmem:[#allocation51_spill] sm:$0xff] }
 0x64b   : > { %5432 = vmatprep.subr.bf16.mxu0 %v9854_v44  ;;  %5476 = vmatprep.subr.bf16.mxu1 %v9854_v44  ;;  %v2903_v12 = vsel %vm2885_vm14, %v2777_v52, 0.0  ;;  %v9865_v52 = vld [vmem:[#allocation57_spill] sm:$0xff] }
 0x64d   : > { %2276 = vrot.lane.b32.xlu1 %v2228_v35, %s6340_s1  ;;  %v2261_v55 = vpop.permute.xlu1 %2260  ;;  %2595 = vperm.xlu0 %5729, %v7832_v14  }
 0x64e   : > { %v2310_v13 = vadd.f32 %v2261_v55, %v2194_v16  ;;  %v2225_v16 = vmul.f32 %v7112_v34, %v9849_v59  ;;  %v2230_v59 = vmul.f32 %v7112_v34, %v9857_v25 }
 0x650   : > { %v2495_v14 = vadd.f32 %v2477_v6, %v2310_v13  ;;  %v8225_v13 = vsel %vm1409_vm4, 1, %v9765_v41 }
 0x651   : > { %1630 = vperm.xlu1 %5728, %v1579_v37   ;;  %v8182_v53 = vpop.permute.xlu1 %1606  ;;  %2131 = vperm.xlu0 %5729, %v7865_v36   ;;  %v1913_v36 = vsel %vm1412_vm15, 1, %v9765_v41 }
 0x652   : > { %v2661_v19 = vadd.f32 %v2643_v22, %v2495_v14 }
 0x654   : > { %v2755_v9 = vadd.f32 %v2683_v31, %v2661_v19 }
 0x655   : > { %2447 = vperm.xlu1 %5728, %v8187_v49   ;;  %v8193_v35 = vpop.permute.xlu1 %2420  ;;  %1454 = vrot.lane.b32.xlu0 %v9862_v1, %s6340_s1 }
 0x656   : > { %v2921_v62 = vadd.f32 %v2903_v12, %v2755_v9  ;;  %v2233_v9 = vmul.f32 %v7112_v34, %v9865_v52  ;;  %v9869_v52 = vld [vmem:[#allocation84_spill] sm:$0xff]  ;;  %vm2461_vm4 = vcmp.eq.s32.totalorder %v8193_v35, 1 }
 0x658   : > { %v2946_v47 = vadd.f32 %v8054_v20, %v2921_v62 }
 0x659   : > { %1964 = vperm.xlu1 %5728, %v1913_v36   ;;  %v8201_v24 = vpop.permute.xlu1 %1940  ;;  %2855 = vperm.xlu0 %5729, %v7947_v7   ;;  %v8220_v7 = vadd.s32 128, %v7010_v23 }
 0x65a   : > { %2964 = vst.msk [vmem:[#allocation5 + $0x20] sm:$0xff] %vm986_vm1, %v2946_v47 }
 0x65b   : > { %9863 = vst [vmem:[#allocation50_spill] sm:$0xff] %v8220_v7  ;;  %vm1376_vm5 = vcmp.lt.s32.totalorder %v8220_v7, 132  ;;  %v9888_v7 = vrot.slane %v8095_v29, 4 }
 0x65c   : > { %vm2547_vm12 = vmand %vm1376_vm5, %vm1394_vm3 }
 0x65d   : > { %2613 = vperm.xlu1 %5728, %v8110_v57   ;;  %v8208_v28 = vpop.permute.xlu1 %2586  ;;  %2270 = vrot.lane.b32.xlu0 %v2225_v16, %s6340_s1  ;;  %v2565_v6 = vsel %vm2547_vm12, 1, %v9765_v41  ;;  %vm2807_vm2 = vmand %vm1376_vm5, %vm1412_vm15 }
 0x65e   : > { %v2825_v48 = vsel %vm2807_vm2, 1, %v9765_v41  ;;  %vm2627_vm12 = vcmp.eq.s32.totalorder %v8208_v28, 1 }
 0x661   : > { %2149 = vperm.xlu1 %5728, %v1579_v37   ;;  %v8211_v55 = vpop.permute.xlu1 %1448  ;;  %1621 = vperm.xlu0 %5729, %v7937_v43  }
 0x662   : > { %v9679_v11 = vrot.slane %v8211_v55, 5 }
 0x665   : > { %2870 = vperm.xlu1 %5728, %v8033_v3   ;;  %v8216_v27 = vpop.permute.xlu1 %2128  ;;  %2435 = vperm.xlu0 %5729, %v8136_v46  }
 0x669   : > { %2280 = vrot.lane.b32.xlu1 %v2230_v59, %s6340_s1  ;;  %v8228_v37 = vpop.permute.xlu1 %2846  ;;  %1955 = vperm.xlu0 %5729, %v8225_v13  }
 0x66c   : > { %v3463_v0 = vpop.xlane.xlu0 %3462 }
 0x66d   : > { %2450 = vperm.xlu1 %5728, %v1913_v36   ;;  %v8237_v25 = vpop.permute.xlu1 %2264  ;;  %5955 = vrcp.f32 %v3463_v0  ;;  %2601 = vperm.xlu0 %5729, %v7890_v56   ;;  %v5954_v56 = vpop.eup %5953 }
 0x66e   : > { %v3518_v36 = vmul.f32 %v5954_v56, %v7704_v50  ;;  %v3517_v16 = vmul.f32 %v5954_v56, %v7713_v45 }
 0x670   : > { %v3467_v14 = vpop.xlane.xlu0 %3466 }
 0x671   : > { %2616 = vperm.xlu1 %5728, %v2565_v6   ;;  %v8245_v22 = vpop.permute.xlu1 %1612  ;;  %2137 = vperm.xlu0 %5729, %v7908_v10   ;;  %5957 = vrcp.f32 %v3467_v14  ;;  %v2227_v14 = vmul.f32 %v7112_v34, %v9862_v1  ;;  %v9868_v1 = vld [vmem:[#allocation82_spill] sm:$0xff] }
 0x674   : > { %v3471_v19 = vpop.xlane.xlu0 %3470 }
 0x675   : > { %2876 = vperm.xlu1 %5728, %v2825_v48   ;;  %v8249_v31 = vpop.permute.xlu1 %2426  ;;  %5959 = vrcp.f32 %v3471_v19  ;;  %1458 = vrot.lane.b32.xlu0 %v9864_v42, %s6340_s1  ;;  %v9866_v19 = vld [vmem:[#allocation29_spill] sm:$0xff] }
 0x677   : > { %v5956_v12 = vpop.eup %5955 }
 0x678   : > { %v3475_v62 = vpop.xlane.xlu0 %3474  ;;  %v3521_v47 = vmul.f32 %v5956_v12, %v7802_v32  ;;  %v3520_v59 = vmul.f32 %v5956_v12, %v7806_v54  ;;  %v9867_v54 = vld [vmem:[#allocation31_spill] sm:$0xff] }
 0x679   : > { %2286 = vrot.lane.b32.xlu1 %v2233_v9, %s6340_s1  ;;  %v8256_v10 = vpop.permute.xlu1 %1946  ;;  %2861 = vperm.xlu0 %5729, %v8136_v46   ;;  %5961 = vrcp.f32 %v3475_v62  ;;  %v9870_v12 = vld [vmem:[#allocation83_spill] sm:$0xff] }
 0x67a   : > { %v3547_v0 = vpack.c.bf16 %v3521_v47, %v3518_v36  ;;  %v3546_v6 = vpack.c.bf16 %v3520_v59, %v3517_v16  ;;  %v9871_v36 = vld [vmem:[#allocation85_spill] sm:$0xff] }
 0x67b   : > { %v5958_v32 = vpop.eup %5957 }
 0x67c   : > { %5123 = vmatprep.mubr.msk.bf16.mxu0 %vm3227_vm10, %v3547_v0  ;;  %v3479_v48 = vpop.xlane.xlu0 %3478  ;;  %v3524_v56 = vmul.f32 %v5958_v32, %v9868_v1  ;;  %v3523_v62 = vmul.f32 %v5958_v32, %v9870_v12  ;;  %v1868_v32 = vmul.f32 %v9852_v39, %v8178_v17  ;;  %v9875_v1 = vld [vmem:[#allocation48_spill] sm:$0xff]  ;;  %v9877_v12 = vld [vmem:[#allocation93_spill] sm:$0xff] }
 0x67d   : > { %1016 = vrot.lane.b32.xlu1 %v9866_v19, %s6340_s1  ;;  %v8268_v50 = vpop.permute.xlu1 %2592  ;;  %5963 = vrcp.f32 %v3479_v48  ;;  %2274 = vrot.lane.b32.xlu0 %v2227_v14, %s6340_s1 }
 0x67e   : > { %3705 = vmatmul.mubr.bf16.gmra.mrb[60].mxu0 %v3546_v6  ;;  %v9872_v6 = vld [vmem:[#allocation33_spill] sm:$0xff] }
 0x67f   : > { %v5960_v45 = vpop.eup %5959 }
 0x680   : > { %v3527_v9 = vmul.f32 %v5960_v45, %v9869_v52  ;;  %v3526_v47 = vmul.f32 %v5960_v45, %v9871_v36  ;;  %v9874_v45 = vld [vmem:[#allocation35_spill] sm:$0xff]  ;;  %v9876_v52 = vld [vmem:[#allocation94_spill] sm:$0xff] }
 0x681   : > { %1020 = vrot.lane.b32.xlu1 %v9867_v54, %s6340_s1  ;;  %v8273_v46 = vpop.permute.xlu1 %1452  ;;  %1627 = vperm.xlu0 %5729, %v8110_v57   ;;  %v9878_v36 = vld [vmem:[#allocation95_spill] sm:$0xff] }
 0x682   : > { %v3549_v16 = vpack.c.bf16 %v3527_v9, %v3524_v56  ;;  %v3548_v59 = vpack.c.bf16 %v3526_v47, %v3523_v62 }
 0x683   : > { %v5962_v48 = vpop.eup %5961 }
 0x684   : > { %5124 = vmatprep.mubr.msk.bf16.mxu0 %vm3227_vm10, %v3549_v16  ;;  %v8281_v0 = vpop.permute.xlu0 %2417  ;;  %v3530_v56 = vmul.f32 %v5962_v48, %v9875_v1  ;;  %v3529_v62 = vmul.f32 %v5962_v48, %v9877_v12  ;;  %v9879_v1 = vld [vmem:[#allocation37_spill] sm:$0xff]  ;;  %v9674_v48 = vrot.slane %v8095_v29, 7  ;;  %v2330_v12 = vrot.slane %v8095_v29, 1 }
 0x685   : > { %1024 = vrot.lane.b32.xlu1 %v9872_v6, %s6340_s1  ;;  %v8285_v14 = vpop.permute.xlu1 %2134  ;;  %2441 = vperm.xlu0 %5729, %v8225_v13   ;;  %vm2460_vm15 = vcmp.eq.s32.totalorder %v8281_v0, 1 }
 0x686   : > { %9873 = vst [vmem:[#allocation59_spill] sm:$0xff] %v8285_v14  ;;  %3713 = vmatmul.mubr.bf16.gmra.mrb[64].mxu0 %v3548_v59 }
 0x687   : > { %v5964_v19 = vpop.eup %5963 }
 0x688   : > { %v1938_v57 = vpop.permute.xlu0 %1937  ;;  %v3533_v9 = vmul.f32 %v5964_v19, %v9876_v52  ;;  %v3532_v47 = vmul.f32 %v5964_v19, %v9878_v36  ;;  %v2028_v19 = vrot.slane %v7919_v51, 7 }
 0x689   : > { %1028 = vrot.lane.b32.xlu1 %v9874_v45, %s6340_s1  ;;  %v8292_v54 = vpop.permute.xlu1 %2852  ;;  %vm1976_vm3 = vcmp.eq.s32.totalorder %v1938_v57, 1  ;;  %1961 = vperm.xlu0 %5729, %v8187_v49   ;;  %v9880_v57 = vld [vmem:[#allocation39_spill] sm:$0xff] }
 0x68a   : > { %v1994_v16 = vsel %vm1976_vm3, %v1868_v32, 0.0  ;;  %v3551_v59 = vpack.c.bf16 %v3533_v9, %v3530_v56  ;;  %v3550_v17 = vpack.c.bf16 %v3532_v47, %v3529_v62  ;;  %v9881_v9 = vld [vmem:[#allocation88_spill] sm:$0xff] }
 0x68b   : > { %v8300_v6 = vadd.f32 %v1994_v16, %v8146_v18  ;;  %v2053_v18 = vsel %vm2041_vm11, %v2028_v19, %v9674_v48  ;;  %vm2159_vm13 = vcmp.eq.s32.totalorder %v9881_v9, 1  ;;  %v9882_v16 = vld [vmem:[#allocation41_spill] sm:$0xff] }
 0x68c   : > { %5125 = vmatprep.mubr.msk.bf16.mxu0 %vm3227_vm10, %v3551_v59  ;;  %v8303_v45 = vpop.permute.xlu0 %2583  ;;  %v2070_v62 = vmul.f32 %v9846_v15, %v2053_v18 }
 0x68d   : > { %1032 = vrot.lane.b32.xlu1 %v9879_v1, %s6340_s1  ;;  %v8307_v52 = vpop.permute.xlu1 %2268  ;;  %2607 = vperm.xlu0 %5729, %v7937_v43   ;;  %v2054_v43 = vsel %vm2041_vm11, %v2027_v5, %v2028_v19  ;;  %v9677_v19 = vrot.slane %v8211_v55, 3  ;;  %vm2626_vm2 = vcmp.eq.s32.totalorder %v8303_v45, 1 }
 0x68e   : > { %3721 = vmatmul.mubr.bf16.gmra.mrb[68].mxu0 %v3550_v17  ;;  %v2069_v36 = vmul.f32 %v9846_v15, %v2054_v43  ;;  %v9883_v17 = vld [vmem:[#allocation55_spill] sm:$0xff] }
 0x68f   : > { %5396 = vmatprep.mubr.msk.bf16.mxu0 %vm6339_vm0, %v9854_v44 }
 0x690   : > { %v2120_v32 = vpop.permute.xlu0 %2119  ;;  %v2177_v1 = vsel %vm2159_vm13, %v2069_v36, 0.0  ;;  %v9884_v36 = vld [vmem:[#allocation43_spill] sm:$0xff] }
 0x691   : > { %1036 = vrot.lane.b32.xlu1 %v9880_v57, %s6340_s1  ;;  %v8320_v56 = vpop.permute.xlu1 %1618  ;;  %2143 = vperm.xlu0 %5729, %v7983_v60   ;;  %vm2160_vm10 = vcmp.eq.s32.totalorder %v2120_v32, 1  ;;  %v2354_v32 = vsel %vm2342_vm9, %v2329_v58, %v2330_v12  ;;  %v8349_v57 = vld [vmem:[%s9756_s17 + $0x88] sm:$0xff] }
 0x692   : > { %v2178_v59 = vsel %vm2160_vm10, %v2070_v62, 0.0  ;;  %v2370_v63 = vmul.f32 %v9839_v30, %v2354_v32  ;;  %vm1395_vm14 = vcmp.ge.s32.totalorder %v8349_v57, 1  ;;  %vm2887_vm10 = vcmp.eq.s32.totalorder %v8228_v37, 1 }
 0x693   : > { %v2196_v43 = vadd.f32 %v2178_v59, %v8070_v38  ;;  %v9885_v59 = vld [vmem:[#allocation92_spill] sm:$0xff]  ;;  %vm1413_vm13 = vcmp.le.s32.totalorder %v8349_v57, 10 }
 0x694   : > { %v8331_v47 = vpop.permute.xlu0 %1446  ;;  %v2195_v48 = vadd.f32 %v2177_v1, %v9885_v59 }
 0x695   : > { %1040 = vrot.lane.b32.xlu1 %v9882_v16, %s6340_s1  ;;  %v8335_v33 = vpop.permute.xlu1 %2432  ;;  %v1493_v5 = vrot.slane %v8331_v47, 3  ;;  %1462 = vrot.lane.b32.xlu0 %v9883_v17, %s6340_s1  ;;  %v9678_v18 = vrot.slane %v8331_v47, 1  ;;  %v1827_v9 = vrot.slane %v8331_v47, 5  ;;  %v1696_v58 = vrot.slane %v8331_v47, 4 }
 0x697   : > { %v8361_v51 = vsel %vm1504_vm6, %v1493_v5, %v9677_v19  ;;  %v1515_v38 = vsel %vm1504_vm6, %v1492_v4, %v1493_v5  ;;  %v2353_v19 = vsel %vm2342_vm9, %v2330_v12, %v9678_v18  ;;  %v2312_v5 = vadd.f32 %v8237_v25, %v2196_v43  ;;  %v9886_v12 = vld [vmem:[#allocation45_spill] sm:$0xff] }
 0x698   : > { %v2844_v62 = vpop.permute.xlu0 %2843  ;;  %v2371_v4 = vmul.f32 %v9839_v30, %v2353_v19  ;;  %v2518_v1 = vmul.f32 %v9834_v2, %v1515_v38  ;;  %v8395_v19 = vsel %vm1838_vm8, %v1827_v9, %v9679_v11  ;;  %v9887_v18 = vrot.slane %v8095_v29, 5 }
 0x699   : > { %1044 = vrot.lane.b32.xlu1 %v9884_v36, %s6340_s1  ;;  %v8355_v16 = vpop.permute.xlu1 %1952  ;;  %2867 = vperm.xlu0 %5729, %v8225_v13   ;;  %v2229_v36 = vmul.f32 %v7112_v34, %v9864_v42  ;;  %v9681_v13 = vrot.slane %v8211_v55, 4  ;;  %v2519_v42 = vmul.f32 %v9834_v2, %v8361_v51  ;;  %v2478_v11 = vsel %vm2460_vm15, %v2370_v63, 0.0 }
 0x69a   : > { %v1849_v35 = vsel %vm1838_vm8, %v9887_v18, %v1827_v9  ;;  %v1718_v18 = vsel %vm1707_vm7, %v9888_v7, %v1696_v58  ;;  %vm2886_vm3 = vcmp.eq.s32.totalorder %v2844_v62, 1 }
 0x69b   : > { %v8406_v43 = vsel %vm1707_vm7, %v1696_v58, %v9681_v13  ;;  %v2644_v13 = vsel %vm2626_vm2, %v2518_v1, 0.0  ;;  %v2684_v7 = vmul.f32 %v9847_v40, %v1718_v18  ;;  %v1580_v58 = vsel %vm1395_vm14, 1, %v9765_v41 }
 0x69c   : > { %v2263_v32 = vpop.permute.xlu0 %2262  ;;  %v2685_v63 = vmul.f32 %v9847_v40, %v8406_v43  ;;  %vm1643_vm14 = vcmp.eq.s32.totalorder %v8182_v53, 1  ;;  %vm1645_vm2 = vcmp.eq.s32.totalorder %v8245_v22, 1 }
 0x69d   : > { %1048 = vrot.lane.b32.xlu1 %v9886_v12, %s6340_s1  ;;  %v8389_v59 = vpop.permute.xlu1 %2598  ;;  %v2311_v25 = vadd.f32 %v2263_v32, %v2195_v48  ;;  %2278 = vrot.lane.b32.xlu0 %v2229_v36, %s6340_s1  ;;  %v2479_v12 = vsel %vm2461_vm4, %v2371_v4, 0.0  ;;  %v2645_v36 = vsel %vm2627_vm12, %v2519_v42, 0.0  ;;  %v2779_v32 = vmul.f32 %v8019_v8, %v8395_v19 }
 0x69e   : > { %v2497_v48 = vadd.f32 %v2479_v12, %v2312_v5  ;;  %v2778_v4 = vmul.f32 %v8019_v8, %v1849_v35  ;;  %vm1977_vm4 = vcmp.eq.s32.totalorder %v8201_v24, 1  ;;  %vm2161_vm12 = vcmp.eq.s32.totalorder %v8127_v26, 1 }
 0x69f   : > { %v2496_v9 = vadd.f32 %v2478_v11, %v2311_v25  ;;  %v2905_v5 = vsel %vm2887_vm10, %v2779_v32, 0.0  ;;  %v1535_v32 = vmul.f32 %v7173_v61, %v1515_v38  ;;  %vm2463_vm10 = vcmp.eq.s32.totalorder %v8249_v31, 1 }
 0x6a0   : > { %v2663_v28 = vadd.f32 %v2645_v36, %v2497_v48  ;;  %v8421_v0 = vpop.permute.xlu0 %1609  ;;  %v2904_v1 = vsel %vm2886_vm3, %v2778_v4, 0.0  ;;  %v8446_v36 = vsel %vm1413_vm13, 1, %v9765_v41  ;;  %v2030_v4 = vrot.slane %v8331_v47, 7 }
 0x6a1   : > { %v8423_v14 = vpop.permute.xlu1 %1456  ;;  %v2662_v45 = vadd.f32 %v2644_v13, %v2496_v9  ;;  %2444 = vperm.xlu0 %5729, %v8033_v3   ;;  %vm2629_vm13 = vcmp.eq.s32.totalorder %v8268_v50, 1 }
 0x6a2   : > { %v2757_v11 = vadd.f32 %v2685_v63, %v2663_v28  ;;  %v9684_v63 = vrot.slane %v8211_v55, 7 }
 0x6a3   : > { %v2756_v42 = vadd.f32 %v2684_v7, %v2662_v45  ;;  %v1738_v7 = vmul.f32 %v7176_v21, %v1718_v18  ;;  %v1869_v45 = vmul.f32 %v9852_v39, %v1849_v35  ;;  %v2332_v18 = vrot.slane %v8211_v55, 1 }
 0x6a4   : > { %v8431_v25 = vpop.permute.xlu0 %2423  ;;  %v2923_v62 = vadd.f32 %v2905_v5, %v2757_v11  ;;  %v2051_v38 = vsel %vm2041_vm11, %v2030_v4, %v9684_v63  ;;  %v9890_v5 = vrot.slane %v8095_v29, 7  ;;  %v2231_v35 = vmul.f32 %v7112_v34, %v9883_v17 }
 0x6a5   : > { %v8433_v12 = vpop.permute.xlu1 %2140  ;;  %v2922_v48 = vadd.f32 %v2904_v1, %v2756_v42  ;;  %1633 = vperm.xlu0 %5729, %v1580_v58   ;;  %v9891_v29 = vrot.slane %v8331_v47, 1  ;;  %vm2462_vm3 = vcmp.eq.s32.totalorder %v8431_v25, 1 }
 0x6a6   : > { %9889 = vst [vmem:[#allocation58_spill] sm:$0xff] %v8433_v12  ;;  %v2948_v13 = vadd.f32 %v8054_v20, %v2923_v62  ;;  %v2052_v53 = vsel %vm2041_vm11, %v9890_v5, %v2030_v4  ;;  %v2072_v62 = vmul.f32 %v9846_v15, %v2051_v38 }
 0x6a7   : > { %v2947_v3 = vadd.f32 %v8054_v20, %v2922_v48  ;;  %v2071_v48 = vmul.f32 %v9846_v15, %v2052_v53 }
 0x6a8   : > { %2966 = vst.msk [vmem:[#allocation5 + $0x30] sm:$0xff] %vm986_vm1, %v2948_v13  ;;  %v8439_v37 = vpop.permute.xlu0 %1943  ;;  %v2352_v13 = vsel %vm2342_vm9, %v9891_v29, %v2332_v18 }
 0x6a9   : > { %v8441_v9 = vpop.permute.xlu1 %2858  ;;  %2965 = vst.msk [vmem:[#allocation5 + $0x28] sm:$0xff] %vm986_vm1, %v2947_v3  ;;  %2610 = vperm.xlu0 %5729, %v7983_v60   ;;  %v1661_v60 = vsel %vm1643_vm14, %v1535_v32, 0.0  ;;  %v1995_v3 = vsel %vm1977_vm4, %v1869_v45, 0.0  ;;  %v2372_v38 = vmul.f32 %v9839_v30, %v2352_v13  ;;  %v2179_v5 = vsel %vm2161_vm12, %v2071_v48, 0.0 }
 0x6aa   : > { %v1810_v1 = vadd.f32 %v1738_v7, %v1661_v60  ;;  %v9682_v7 = vrot.slane %v8273_v46, 3  ;;  %v9685_v48 = vrot.slane %v8273_v46, 4  ;;  %vm1979_vm4 = vcmp.eq.s32.totalorder %v8256_v10, 1 }
 0x6ab   : > { %v2480_v13 = vsel %vm2462_vm3, %v2372_v38, 0.0  ;;  %vm2889_vm12 = vcmp.eq.s32.totalorder %v8292_v54, 1  ;;  %vm1644_vm3 = vcmp.eq.s32.totalorder %v8421_v0, 1  ;;  %v3556_v0 = vld [vmem:[#allocation5 + $0x20] sm:$0xff] }
 0x6ac   : > { %v8450_v28 = vpop.permute.xlu0 %2589  ;;  %v2013_v24 = vadd.f32 %v1995_v3, %v1810_v1  ;;  %v9893_v3 = vrot.slane %v8211_v55, 5 }
 0x6ad   : > { %v8452_v57 = vpop.permute.xlu1 %2272  ;;  %1967 = vperm.xlu0 %5729, %v8446_v36   ;;  %vm2628_vm14 = vcmp.eq.s32.totalorder %v8450_v28, 1  ;;  %v9895_v28 = vld [vmem:[#allocation56_spill] sm:$0xff] }
 0x6b0   : > { %v2126_v11 = vpop.permute.xlu0 %2125 }
 0x6b1   : > { %v8463_v42 = vpop.permute.xlu1 %1624  ;;  %vm2162_vm15 = vcmp.eq.s32.totalorder %v2126_v11, 1  ;;  %2152 = vperm.xlu0 %5729, %v1580_v58  }
 0x6b2   : > { %v2180_v58 = vsel %vm2162_vm15, %v2072_v62, 0.0  ;;  %v9892_v62 = vrot.slane %v8211_v55, 3 }
 0x6b3   : > { %v2198_v45 = vadd.f32 %v2180_v58, %v2013_v24  ;;  %v2197_v24 = vadd.f32 %v2179_v5, %v8300_v6 }
 0x6b4   : > { %v8480_v32 = vpop.permute.xlu0 %1450 }
 0x6b5   : > { %v8482_v4 = vpop.permute.xlu1 %2438  ;;  %v1495_v17 = vrot.slane %v8480_v32, 3  ;;  %2873 = vperm.xlu0 %5729, %v8187_v49   ;;  %v1829_v47 = vrot.slane %v8480_v32, 5  ;;  %v9683_v60 = vrot.slane %v8480_v32, 1  ;;  %v1698_v11 = vrot.slane %v8480_v32, 4 }
 0x6b7   : > { %v2351_v49 = vsel %vm2342_vm9, %v2332_v18, %v9683_v60  ;;  %v1513_v29 = vsel %vm1504_vm6, %v9892_v62, %v1495_v17  ;;  %v8510_v26 = vsel %vm1504_vm6, %v1495_v17, %v9682_v7  ;;  %v9686_v18 = vrot.slane %v8273_v46, 5 }
 0x6b8   : > { %v2850_v53 = vpop.permute.xlu0 %2849  ;;  %v1847_v58 = vsel %vm1838_vm8, %v9893_v3, %v1829_v47  ;;  %v2373_v17 = vmul.f32 %v9839_v30, %v2351_v49  ;;  %v2314_v62 = vadd.f32 %v8307_v52, %v2198_v45  ;;  %v9894_v7 = vrot.slane %v8211_v55, 4 }
 0x6b9   : > { %v8500_v1 = vpop.permute.xlu1 %1958  ;;  %2282 = vrot.lane.b32.xlu0 %v2231_v35, %s6340_s1  ;;  %v2520_v35 = vmul.f32 %v9834_v2, %v1513_v29  ;;  %v2521_v38 = vmul.f32 %v9834_v2, %v8510_v26  ;;  %v8539_v6 = vsel %vm1707_vm7, %v1698_v11, %v9685_v48  ;;  %v1537_v45 = vmul.f32 %v7173_v61, %v1513_v29 }
 0x6ba   : > { %v1716_v25 = vsel %vm1707_vm7, %v9894_v7, %v1698_v11  ;;  %v2481_v52 = vsel %vm2463_vm10, %v2373_v17, 0.0  ;;  %v8547_v7 = vsel %vm1838_vm8, %v1829_v47, %v9686_v18  ;;  %v1871_v49 = vmul.f32 %v9852_v39, %v1847_v58 }
 0x6bb   : > { %v2499_v11 = vadd.f32 %v2481_v52, %v2314_v62  ;;  %v2780_v48 = vmul.f32 %v8019_v8, %v1847_v58  ;;  %v2647_v17 = vsel %vm2629_vm13, %v2521_v38, 0.0  ;;  %v1663_v47 = vsel %vm1645_vm2, %v1537_v45, 0.0  ;;  %v3553_v62 = vld [vmem:[#allocation5 + $0x8] sm:$0xff] }
 0x6bc   : > { %v2267_v60 = vpop.permute.xlu0 %2266  ;;  %v1740_v18 = vmul.f32 %v7176_v21, %v1716_v25  ;;  %vm2888_vm15 = vcmp.eq.s32.totalorder %v2850_v53, 1  ;;  %v2646_v58 = vsel %vm2628_vm14, %v2520_v35, 0.0  ;;  %v2686_v50 = vmul.f32 %v9847_v40, %v1716_v25 }
 0x6bd   : > { %v8533_v63 = vpop.permute.xlu1 %2604  ;;  %v2313_v3 = vadd.f32 %v2267_v60, %v2197_v24  ;;  %2453 = vperm.xlu0 %5729, %v8446_v36   ;;  %v2665_v5 = vadd.f32 %v2647_v17, %v2499_v11  ;;  %v2687_v60 = vmul.f32 %v9847_v40, %v8539_v6  ;;  %v2781_v36 = vmul.f32 %v8019_v8, %v8547_v7  ;;  %v3552_v24 = vld [vmem:[#allocation5] sm:$0xff] }
 0x6be   : > { %v2232_v25 = vmul.f32 %v7112_v34, %v9895_v28  ;;  %v9896_v35 = vrot.slane %v8480_v32, 7  ;;  %vm2163_vm2 = vcmp.eq.s32.totalorder %v8216_v27, 1  ;;  %v9898_v27 = vld [vmem:[#allocation28_spill] sm:$0xff]  ;;  %vm1978_vm10 = vcmp.eq.s32.totalorder %v8439_v37, 1 }
 0x6bf   : > { %v3658_v31 = vpop.f32.mrb[36].mxu0  ;;  %v2498_v29 = vadd.f32 %v2480_v13, %v2313_v3  ;;  %v1812_v13 = vadd.f32 %v1740_v18, %v1663_v47  ;;  %v2759_v45 = vadd.f32 %v2687_v60, %v2665_v5  ;;  %v9897_v18 = vrot.slane %v8211_v55, 7 }
 0x6c0   : > { %v3660_v12 = vpop.f32.mrb[37].mxu0  ;;  %v8566_v22 = vpop.permute.xlu0 %1615  ;;  %v3659_v52 = vadd.f32 %v3658_v31, %v3552_v24  ;;  %v2907_v47 = vsel %vm2889_vm12, %v2781_v36, 0.0  ;;  %vm1647_vm14 = vcmp.eq.s32.totalorder %v8320_v56, 1  ;;  %vm2631_vm12 = vcmp.eq.s32.totalorder %v8389_v59, 1 }
 0x6c1   : > { %v3661_v38 = vpop.f32.mrb[38].mxu0  ;;  %v2664_v12 = vadd.f32 %v2646_v58, %v2498_v29  ;;  %v8568_v11 = vpop.permute.xlu1 %1460  ;;  %5736 = vperm.xlu0 %5729, %v9765_v41   ;;  %v2050_v5 = vsel %vm2041_vm11, %v9897_v18, %v9896_v35  ;;  %v1997_v29 = vsel %vm1979_vm4, %v1871_v49, 0.0  ;;  %v2906_v41 = vsel %vm2888_vm15, %v2780_v48, 0.0  ;;  %v9899_v35 = vld [vmem:[#allocation30_spill] sm:$0xff] }
 0x6c2   : > { %v3662_v3 = vadd.f32 %v3661_v38, %v3553_v62  ;;  %v3663_v8 = vpop.f32.mrb[39].mxu0  ;;  %v2925_v10 = vadd.f32 %v2907_v47, %v2759_v45  ;;  %v2015_v54 = vadd.f32 %v1997_v29, %v1812_v13  ;;  %v2073_v34 = vmul.f32 %v9846_v15, %v2050_v5  ;;  %v3554_v62 = vld [vmem:[#allocation5 + $0x10] sm:$0xff]  ;;  %v3555_v13 = vld [vmem:[#allocation5 + $0x18] sm:$0xff] }
 0x6c3   : > { %v2758_v31 = vadd.f32 %v2686_v50, %v2664_v12  ;;  %v9900_v18 = vrot.slane %v8480_v32, 7  ;;  %vm2465_vm15 = vcmp.eq.s32.totalorder %v8335_v33, 1  ;;  %vm1981_vm4 = vcmp.eq.s32.totalorder %v8355_v16, 1 }
 0x6c4   : > { %v3747_v17 = vpack.c.bf16 %v3662_v3, %v3659_v52  ;;  %v8582_v60 = vpop.permute.xlu0 %2429  ;;  %v2950_v55 = vadd.f32 %v8054_v20, %v2925_v10  ;;  %v8594_v49 = vsel %vm2163_vm2, %v2073_v34, 0.0  ;;  %v2033_v3 = vrot.slane %v8273_v46, 7 }
 0x6c5   : > { %v2924_v58 = vadd.f32 %v2906_v41, %v2758_v31  ;;  %v8584_v24 = vpop.permute.xlu1 %2146  ;;  %2284 = vrot.lane.b32.xlu0 %v2232_v25, %s6340_s1  ;;  %v1536_v31 = vmul.f32 %v7173_v61, %v8361_v51  ;;  %v1739_v10 = vmul.f32 %v7176_v21, %v8406_v43  ;;  %v9901_v51 = vld [vmem:[#allocation32_spill] sm:$0xff]  ;;  %v2334_v43 = vrot.slane %v8273_v46, 1 }
 0x6c6   : > { %5397 = vmatmul.mubr.msk.bf16.vlgmr.msra.gmra.mrb[72].mxu0 %vm986_vm1, %v3747_v17  ;;  %2968 = vst.msk [vmem:[#allocation5 + $0x40] sm:$0xff] %vm986_vm1, %v2950_v55  ;;  %v2049_v5 = vsel %vm2041_vm11, %v9900_v18, %v2033_v3  ;;  %v3557_v55 = vld [vmem:[#allocation5 + $0x28] sm:$0xff]  ;;  %v9903_v18 = vrot.slane %v8480_v32, 1  ;;  %v9689_v32 = vrot.slane %v8423_v14, 3  ;;  %vm2464_vm2 = vcmp.eq.s32.totalorder %v8582_v60, 1 }
 0x6c7   : > { %5400 = vmatprep.mubr.msk.bf16.mxu0 %vm6339_vm0, %v9854_v44  ;;  %v2949_v53 = vadd.f32 %v8054_v20, %v2924_v58  ;;  %v2074_v47 = vmul.f32 %v9846_v15, %v2049_v5  ;;  %v1662_v58 = vsel %vm1644_vm3, %v1536_v31, 0.0 }
 0x6c8   : > { %v3666_v48 = vpop.f32.mrb[40].mxu0  ;;  %v8597_v36 = vpop.permute.xlu0 %1949  ;;  %v1811_v37 = vadd.f32 %v1739_v10, %v1662_v58  ;;  %v9905_v10 = vrot.slane %v8273_v46, 3 }
 0x6c9   : > { %v3668_v50 = vpop.f32.mrb[41].mxu0  ;;  %2967 = vst.msk [vmem:[#allocation5 + $0x38] sm:$0xff] %vm986_vm1, %v2949_v53  ;;  %v8600_v38 = vpop.permute.xlu1 %2864  ;;  %1014 = vrot.lane.b32.xlu0 %v9898_v27, %s6340_s1  ;;  %v3667_v52 = vadd.f32 %v3666_v48, %v3554_v62  ;;  %v1870_v48 = vmul.f32 %v9852_v39, %v8395_v19  ;;  %v2350_v19 = vsel %vm2342_vm9, %v9903_v18, %v2334_v43 }
 0x6ca   : > { %v3669_v12 = vpop.f32.mrb[42].mxu0 }
 0x6cb   : > { %v3670_v20 = vadd.f32 %v3669_v12, %v3555_v13  ;;  %v3671_v45 = vpop.f32.mrb[43].mxu0 }
 0x6cc   : > { %v8605_v28 = vpop.permute.xlu0 %2595 }
 0x6cd   : > { %v3748_v8 = vpack.c.bf16 %v3670_v20, %v3667_v52  ;;  %v8607_v25 = vpop.permute.xlu1 %2276  ;;  %1018 = vrot.lane.b32.xlu0 %v9899_v35, %s6340_s1  ;;  %v1996_v52 = vsel %vm1978_vm10, %v1870_v48, 0.0  ;;  %vm2630_vm3 = vcmp.eq.s32.totalorder %v8605_v28, 1 }
 0x6cf   : > { %5401 = vmatmul.mubr.msk.bf16.gmra.mrb[76].mxu0 %vm986_vm1, %v3748_v8  ;;  %v9902_v8 = vld [vmem:[#allocation72_spill] sm:$0xff] }
 0x6d0   : > { %v3674_v17 = vpop.f32.mrb[44].mxu0  ;;  %5404 = vmatprep.mubr.msk.bf16.mxu0 %vm6339_vm0, %v9854_v44  ;;  %v2132_v29 = vpop.permute.xlu0 %2131  ;;  %v2528_v35 = vmul.f32 %v9834_v2, %v9902_v8 }
 0x6d1   : > { %v3676_v41 = vpop.f32.mrb[45].mxu0  ;;  %vm2164_vm13 = vcmp.eq.s32.totalorder %v2132_v29, 1  ;;  %v8627_v34 = vpop.permute.xlu1 %1630  ;;  %1022 = vrot.lane.b32.xlu0 %v9901_v51, %s6340_s1  ;;  %v3675_v62 = vadd.f32 %v3674_v17, %v3556_v0  ;;  %v2374_v0 = vmul.f32 %v9839_v30, %v2350_v19 }
 0x6d2   : > { %v3677_v53 = vpop.f32.mrb[46].mxu0  ;;  %v2182_v50 = vsel %vm2164_vm13, %v2074_v47, 0.0  ;;  %v9904_v47 = vld [vmem:[#allocation34_spill] sm:$0xff]  ;;  %v2014_v41 = vadd.f32 %v1996_v52, %v1811_v37 }
 0x6d3   : > { %v3678_v27 = vadd.f32 %v3677_v53, %v3557_v55  ;;  %v3679_v13 = vpop.f32.mrb[47].mxu0  ;;  %v2200_v12 = vadd.f32 %v2182_v50, %v2015_v54  ;;  %v9906_v55 = vrot.slane %v8273_v46, 5  ;;  %v1701_v50 = vrot.slane %v8423_v14, 4 }
 0x6d4   : > { %v8634_v45 = vpop.permute.xlu0 %1454  ;;  %v9907_v13 = vld [vmem:[#allocation36_spill] sm:$0xff]  ;;  %v2199_v18 = vadd.f32 %v8594_v49, %v2014_v41 }
 0x6d5   : > { %v3749_v20 = vpack.c.bf16 %v3678_v27, %v3675_v62  ;;  %v1497_v5 = vrot.slane %v8634_v45, 3  ;;  %v1700_v31 = vrot.slane %v8634_v45, 4  ;;  %v1831_v17 = vrot.slane %v8634_v45, 5  ;;  %v8645_v54 = vpop.permute.xlu1 %2447  ;;  %1026 = vrot.lane.b32.xlu0 %v9904_v47, %s6340_s1 }
 0x6d6   : > { %v2335_v29 = vrot.slane %v8634_v45, 1  ;;  %v9688_v62 = vrot.slane %v8423_v14, 5  ;;  %v2316_v8 = vadd.f32 %v8452_v57, %v2200_v12  ;;  %v2034_v19 = vrot.slane %v8634_v45, 7 }
 0x6d7   : > { %5405 = vmatmul.mubr.msk.bf16.gmra.mrb[80].mxu0 %vm986_vm1, %v3749_v20  ;;  %v1511_v58 = vsel %vm1504_vm6, %v9905_v10, %v1497_v5  ;;  %v1845_v60 = vsel %vm1838_vm8, %v9906_v55, %v1831_v17  ;;  %v8676_v48 = vsel %vm1504_vm6, %v1497_v5, %v9689_v32  ;;  %v2482_v20 = vsel %vm2464_vm2, %v2374_v0, 0.0  ;;  %v8697_v55 = vld [vmem:[#allocation6 + $0x8] ss:$0 sm:$0xff] }
 0x6d8   : > { %5440 = vmatprep.mubr.msk.bf16.mxu0 %vm6339_vm0, %v9854_v44  ;;  %v2349_v51 = vsel %vm2342_vm9, %v2334_v43, %v2335_v29  ;;  %v2856_v53 = vpop.permute.xlu0 %2855  ;;  %v9908_v43 = vrot.slane %v8273_v46, 4  ;;  %v2522_v52 = vmul.f32 %v9834_v2, %v1511_v58  ;;  %v1873_v5 = vmul.f32 %v9852_v39, %v1845_v60 }
 0x6d9   : > { %v8680_v27 = vpop.permute.xlu1 %1964  ;;  %1030 = vrot.lane.b32.xlu0 %v9907_v13, %s6340_s1  ;;  %v2375_v47 = vmul.f32 %v9839_v30, %v2349_v51  ;;  %v2523_v10 = vmul.f32 %v9834_v2, %v8676_v48  ;;  %v2782_v13 = vmul.f32 %v8697_v55, %v1845_v60  ;;  %v8704_v57 = vsel %vm1838_vm8, %v1831_v17, %v9688_v62 }
 0x6da   : > { %v1714_v37 = vsel %vm1707_vm7, %v9908_v43, %v1700_v31  ;;  %v1539_v49 = vmul.f32 %v7173_v61, %v1511_v58  ;;  %v2648_v12 = vsel %vm2630_vm3, %v2522_v52, 0.0  ;;  %v9909_v43 = vld [vmem:[#allocation38_spill] sm:$0xff]  ;;  %v8714_v60 = vsel %vm1707_vm7, %v1700_v31, %v1701_v50 }
 0x6db   : > { %v1742_v28 = vmul.f32 %v7176_v21, %v1714_v37  ;;  %v2483_v17 = vsel %vm2465_vm15, %v2375_v47, 0.0  ;;  %v2649_v58 = vsel %vm2631_vm12, %v2523_v10, 0.0  ;;  %v2689_v33 = vmul.f32 %v9847_v40, %v8714_v60 }
 0x6dc   : > { %v2271_v0 = vpop.permute.xlu0 %2270  ;;  %v2501_v62 = vadd.f32 %v2483_v17, %v2316_v8  ;;  %v1665_v52 = vsel %vm1647_vm14, %v1539_v49, 0.0  ;;  %v1999_v59 = vsel %vm1981_vm4, %v1873_v5, 0.0  ;;  %v2048_v56 = vsel %vm2041_vm11, %v2033_v3, %v2034_v19  ;;  %v9910_v8 = vld [vmem:[#allocation40_spill] sm:$0xff]  ;;  %v9911_v49 = vld [vmem:[#allocation59_spill] sm:$0xff] }
 0x6dd   : > { %v2315_v41 = vadd.f32 %v2271_v0, %v2199_v18  ;;  %v2614_v51 = vpop.permute.xlu1 %2613  ;;  %1034 = vrot.lane.b32.xlu0 %v9909_v43, %s6340_s1  ;;  %v2783_v43 = vmul.f32 %v8697_v55, %v8704_v57  ;;  %v1814_v32 = vadd.f32 %v1742_v28, %v1665_v52  ;;  %vm2890_vm13 = vcmp.eq.s32.totalorder %v2856_v53, 1 }
 0x6de   : > { %vm2636_vm10 = vcmp.eq.s32.totalorder %v2614_v51, 1  ;;  %v2667_v31 = vadd.f32 %v2649_v58, %v2501_v62  ;;  %vm2891_vm14 = vcmp.eq.s32.totalorder %v8441_v9, 1  ;;  %v2075_v5 = vmul.f32 %v9846_v15, %v2048_v56  ;;  %v8757_v9 = vld [vmem:[%s9537_s7] ss:$0 sm:$0xff] }
 0x6df   : > { %v2500_v18 = vadd.f32 %v2482_v20, %v2315_v41  ;;  %v8722_v0 = vsel %vm2636_vm10, %v2528_v35, 0.0  ;;  %v2688_v35 = vmul.f32 %v9847_v40, %v1714_v37  ;;  %v2017_v10 = vadd.f32 %v1999_v59, %v1814_v32  ;;  %v9912_v32 = vld [vmem:[#allocation42_spill] sm:$0xff] }
 0x6e0   : > { %v8728_v47 = vpop.permute.xlu0 %1621  ;;  %v2761_v16 = vadd.f32 %v2689_v33, %v2667_v31  ;;  %vm2165_vm15 = vcmp.eq.s32.totalorder %v9911_v49, 1  ;;  %v2909_v28 = vsel %vm2891_vm14, %v2783_v43, 0.0  ;;  %v2908_v3 = vsel %vm2890_vm13, %v2782_v13, 0.0  ;;  %v5765_v43 = vld [vmem:[#allocation11] sm:$0xff]   ;;  %v5766_v33 = vld [vmem:[#allocation11 + $0x8] sm:$0xff]  }
 0x6e1   : > { %v2666_v20 = vadd.f32 %v2648_v12, %v2500_v18  ;;  %v8739_v62 = vpop.permute.xlu1 %2149  ;;  %1038 = vrot.lane.b32.xlu0 %v9910_v8, %s6340_s1  ;;  %v8748_v12 = vsel %vm2165_vm15, %v2075_v5, 0.0  ;;  %v9913_v18 = vld [vmem:[#allocation44_spill] sm:$0xff]  ;;  %v9692_v31 = vrot.slane %v8423_v14, 7  ;;  %5433 = vmatpush3.bf16.msra.mxu0 %v5765_v43  ;;  %vm1646_vm4 = vcmp.eq.s32.totalorder %v8566_v22, 1  ;;  %v9914_v5 = vld [vmem:[#allocation70_spill] sm:$0xff] }
 0x6e2   : > { %v2927_v37 = vadd.f32 %v2909_v28, %v2761_v16  ;;  %5434 = vmatprep.subr.bf16.mxu0 %v9854_v44  ;;  %v1538_v16 = vmul.f32 %v7173_v61, %v8510_v26  ;;  %vm1980_vm12 = vcmp.eq.s32.totalorder %v8597_v36, 1  ;;  %v2529_v49 = vmul.f32 %v9834_v2, %v9914_v5 }
 0x6e3   : > { %v2760_v46 = vadd.f32 %v2688_v35, %v2666_v20  ;;  %v2047_v35 = vsel %vm2041_vm11, %v2034_v19, %v9692_v31  ;;  %v1872_v19 = vmul.f32 %v9852_v39, %v8547_v7  ;;  %v2336_v22 = vrot.slane %v8423_v14, 1 }
 0x6e4   : > { %v8746_v53 = vpop.permute.xlu0 %2435  ;;  %v2952_v17 = vadd.f32 %v8757_v9, %v2927_v37  ;;  %v2076_v20 = vmul.f32 %v9846_v15, %v2047_v35  ;;  %vm2467_vm10 = vcmp.eq.s32.totalorder %v8482_v4, 1  ;;  %v1741_v26 = vmul.f32 %v7176_v21, %v8539_v6 }
 0x6e5   : > { %v2926_v41 = vadd.f32 %v2908_v3, %v2760_v46  ;;  %v8750_v51 = vpop.permute.xlu1 %2870  ;;  %1042 = vrot.lane.b32.xlu0 %v9912_v32, %s6340_s1  ;;  %5435 = vmatpush3.bf16.msra.mxu0 %v5766_v33  ;;  %v1664_v3 = vsel %vm1646_vm4, %v1538_v16, 0.0  ;;  %v1998_v36 = vsel %vm1980_vm12, %v1872_v19, 0.0  ;;  %vm1649_vm13 = vcmp.eq.s32.totalorder %v8463_v42, 1 }
 0x6e6   : > { %2970 = vst.msk [vmem:[#allocation5 + $0x50] sm:$0xff] %vm986_vm1, %v2952_v17  ;;  %5436 = vmatprep.subr.bf16.mxu0 %v9854_v44  ;;  %v9915_v17 = vld [vmem:[#allocation74_spill] sm:$0xff]  ;;  %v2348_v7 = vsel %vm2342_vm9, %v2335_v29, %v2336_v22  ;;  %vm2633_vm14 = vcmp.eq.s32.totalorder %v8533_v63, 1  ;;  %v1813_v33 = vadd.f32 %v1741_v26, %v1664_v3  ;;  %vm1983_vm4 = vcmp.eq.s32.totalorder %v8500_v1, 1 }
 0x6e7   : > { %v2951_v13 = vadd.f32 %v8757_v9, %v2926_v41  ;;  %v9691_v45 = vrot.slane %v8568_v11, 3  ;;  %vm2466_vm12 = vcmp.eq.s32.totalorder %v8746_v53, 1  ;;  %v9693_v16 = vrot.slane %v8568_v11, 4 }
 0x6e8   : > { %v8762_v58 = vpop.permute.xlu0 %1955  ;;  %v2016_v5 = vadd.f32 %v1998_v36, %v1813_v33  ;;  %v1834_v53 = vrot.slane %v8568_v11, 5  ;;  %v9918_v3 = vrot.slane %v8423_v14, 5  ;;  %v9919_v4 = vrot.slane %v8423_v14, 7 }
 0x6e9   : > { %2969 = vst.msk [vmem:[#allocation5 + $0x48] sm:$0xff] %vm986_vm1, %v2951_v13  ;;  %v8765_v52 = vpop.permute.xlu1 %2280  ;;  %1046 = vrot.lane.b32.xlu0 %v9913_v18, %s6340_s1  ;;  %v2789_v13 = vmul.f32 %v8697_v55, %v9915_v17  ;;  %s9484_s1 = scalar_lea.hbm %s9940_s0, %s5626_s29 }
 0x6ec   : > { %v8770_v59 = vpop.permute.xlu0 %2601 }
 0x6ed   : > { %v8773_v56 = vpop.permute.xlu1 %2450 }
 0x6f0   : > { %v2138_v8 = vpop.permute.xlu0 %2137 }
 0x6f1   : > { %vm2166_vm2 = vcmp.eq.s32.totalorder %v2138_v8, 1  ;;  %v2617_v46 = vpop.permute.xlu1 %2616 }
 0x6f2   : > { %v2184_v28 = vsel %vm2166_vm2, %v2076_v20, 0.0  ;;  %vm2637_vm3 = vcmp.eq.s32.totalorder %v2617_v46, 1  ;;  %v9916_v20 = vrot.slane %v8423_v14, 3 }
 0x6f3   : > { %v2202_v37 = vadd.f32 %v2184_v28, %v2017_v10  ;;  %v8792_v41 = vsel %vm2637_vm3, %v2529_v49, 0.0  ;;  %v2376_v49 = vmul.f32 %v9839_v30, %v2348_v7  ;;  %v9917_v28 = vld [vmem:[#allocation58_spill] sm:$0xff]  ;;  %vm2632_vm3 = vcmp.eq.s32.totalorder %v8770_v59, 1 }
 0x6f4   : > { %v8797_v32 = vpop.permute.xlu0 %1458  ;;  %vm2167_vm2 = vcmp.eq.s32.totalorder %v9917_v28, 1  ;;  %v2201_v7 = vadd.f32 %v8748_v12, %v2016_v5 }
 0x6f5   : > { %v1499_v10 = vrot.slane %v8797_v32, 3  ;;  %v1702_v18 = vrot.slane %v8797_v32, 4  ;;  %v1833_v43 = vrot.slane %v8797_v32, 5  ;;  %v2877_v6 = vpop.permute.xlu1 %2876  ;;  %v9690_v35 = vrot.slane %v8797_v32, 1 }
 0x6f6   : > { %vm2897_vm15 = vcmp.eq.s32.totalorder %v2877_v6, 1  ;;  %v2318_v33 = vadd.f32 %v8607_v25, %v2202_v37 }
 0x6f7   : > { %v8814_v29 = vsel %vm2897_vm15, %v2789_v13, 0.0  ;;  %v1509_v8 = vsel %vm1504_vm6, %v9916_v20, %v1499_v10  ;;  %v2347_v46 = vsel %vm2342_vm9, %v2336_v22, %v9690_v35  ;;  %v1843_v26 = vsel %vm1838_vm8, %v9918_v3, %v1833_v43 }
 0x6f8   : > { %v2862_v19 = vpop.permute.xlu0 %2861  ;;  %v1712_v36 = vsel %vm1707_vm7, %v1701_v50, %v1702_v18  ;;  %v8842_v22 = vsel %vm1504_vm6, %v1499_v10, %v9691_v45  ;;  %v2484_v13 = vsel %vm2466_vm12, %v2376_v49, 0.0  ;;  %v2524_v6 = vmul.f32 %v9834_v2, %v1509_v8 }
 0x6f9   : > { %v8832_v17 = vpop.permute.xlu1 %2286  ;;  %v2036_v20 = vrot.slane %v8797_v32, 7  ;;  %v2377_v3 = vmul.f32 %v9839_v30, %v2347_v46  ;;  %v2525_v50 = vmul.f32 %v9834_v2, %v8842_v22  ;;  %v1875_v35 = vmul.f32 %v9852_v39, %v1843_v26 }
 0x6fa   : > { %v8857_v49 = vsel %vm1838_vm8, %v1833_v43, %v1834_v53  ;;  %v1541_v12 = vmul.f32 %v7173_v61, %v1509_v8  ;;  %v1744_v25 = vmul.f32 %v7176_v21, %v1712_v36  ;;  %v2784_v37 = vmul.f32 %v8697_v55, %v1843_v26 }
 0x6fb   : > { %v8866_v45 = vsel %vm1707_vm7, %v1702_v18, %v9693_v16  ;;  %v2485_v31 = vsel %vm2467_vm10, %v2377_v3, 0.0  ;;  %v2650_v43 = vsel %vm2632_vm3, %v2524_v6, 0.0  ;;  %v2651_v26 = vsel %vm2633_vm14, %v2525_v50, 0.0 }
 0x6fc   : > { %v2275_v10 = vpop.permute.xlu0 %2274  ;;  %v2503_v8 = vadd.f32 %v2485_v31, %v2318_v33  ;;  %v2785_v18 = vmul.f32 %v8697_v55, %v8857_v49  ;;  %v2046_v59 = vsel %vm2041_vm11, %v9919_v4, %v2036_v20  ;;  %v2691_v63 = vmul.f32 %v9847_v40, %v8866_v45 }
 0x6fd   : > { %v2317_v5 = vadd.f32 %v2275_v10, %v2201_v7  ;;  %v1017_v46 = vpop.permute.xlu1 %1016  ;;  %v1667_v7 = vsel %vm1649_vm13, %v1541_v12, 0.0  ;;  %v2001_v42 = vsel %vm1983_vm4, %v1875_v35, 0.0  ;;  %vm2892_vm10 = vcmp.eq.s32.totalorder %v2862_v19, 1 }
 0x6fe   : > { %1069 = vst.msk [vmem:[#allocation3 + $0x8] sm:$0xff] %vm986_vm1, %v1017_v46  ;;  %v1816_v16 = vadd.f32 %v1744_v25, %v1667_v7  ;;  %v2669_v6 = vadd.f32 %v2651_v26, %v2503_v8  ;;  %v2690_v33 = vmul.f32 %v9847_v40, %v1712_v36  ;;  %vm2893_vm13 = vcmp.eq.s32.totalorder %v8600_v38, 1  ;;  %v3558_v26 = vld [vmem:[#allocation5 + $0x30] sm:$0xff]  ;;  %v3559_v7 = vld [vmem:[#allocation5 + $0x38] sm:$0xff] }
 0x6ff   : > { %v2502_v10 = vadd.f32 %v2484_v13, %v2317_v5  ;;  %v2077_v13 = vmul.f32 %v9846_v15, %v2046_v59  ;;  %v2911_v35 = vsel %vm2893_vm13, %v2785_v18, 0.0  ;;  %v2910_v46 = vsel %vm2892_vm10, %v2784_v37, 0.0 }
 0x700   : > { %v8887_v31 = vpop.permute.xlu0 %1627  ;;  %v2019_v14 = vadd.f32 %v2001_v42, %v1816_v16  ;;  %v2763_v12 = vadd.f32 %v2691_v63, %v2669_v6  ;;  %v2037_v42 = vrot.slane %v8568_v11, 7  ;;  %vm1648_vm14 = vcmp.eq.s32.totalorder %v8728_v47, 1 }
 0x701   : > { %v2668_v3 = vadd.f32 %v2650_v43, %v2502_v10  ;;  %v1021_v50 = vpop.permute.xlu1 %1020  ;;  %v8897_v25 = vsel %vm2167_vm2, %v2077_v13, 0.0  ;;  %vm1982_vm4 = vcmp.eq.s32.totalorder %v8762_v58, 1  ;;  %v1874_v47 = vmul.f32 %v9852_v39, %v8704_v57 }
 0x702   : > { %1071 = vst.msk [vmem:[#allocation3 + $0x18] sm:$0xff] %vm986_vm1, %v1021_v50  ;;  %v2929_v36 = vadd.f32 %v2911_v35, %v2763_v12  ;;  %v3560_v50 = vld [vmem:[#allocation5 + $0x40] sm:$0xff]  ;;  %v2045_v35 = vsel %vm2041_vm11, %v2036_v20, %v2037_v42  ;;  %vm2169_vm2 = vcmp.eq.s32.totalorder %v8584_v24, 1  ;;  %vm1651_vm3 = vcmp.eq.s32.totalorder %v8627_v34, 1  ;;  %v5768_v34 = vld [vmem:[#allocation11 + $0x18] sm:$0xff]  }
 0x703   : > { %v2762_v5 = vadd.f32 %v2690_v33, %v2668_v3  ;;  %v3682_v1 = vpop.f32.mrb[48].mxu0  ;;  %vm1985_vm10 = vcmp.eq.s32.totalorder %v8680_v27, 1 }
 0x704   : > { %v8899_v8 = vpop.permute.xlu0 %2441  ;;  %v3684_v19 = vpop.f32.mrb[49].mxu0  ;;  %v3683_v10 = vadd.f32 %v3682_v1, %v3558_v26  ;;  %v2954_v59 = vadd.f32 %v8757_v9, %v2929_v36  ;;  %v2078_v26 = vmul.f32 %v9846_v15, %v2045_v35 }
 0x705   : > { %v2928_v43 = vadd.f32 %v2910_v46, %v2762_v5  ;;  %v1025_v16 = vpop.permute.xlu1 %1024  ;;  %v3685_v38 = vpop.f32.mrb[50].mxu0  ;;  %v3561_v5 = vld [vmem:[#allocation5 + $0x48] sm:$0xff]  ;;  %vm2468_vm12 = vcmp.eq.s32.totalorder %v8899_v8, 1  ;;  %v9921_v8 = vrot.slane %v8568_v11, 3 }
 0x706   : > { %1073 = vst.msk [vmem:[#allocation3 + $0x28] sm:$0xff] %vm986_vm1, %v1025_v16  ;;  %v3686_v4 = vadd.f32 %v3685_v38, %v3559_v7  ;;  %v3687_v28 = vpop.f32.mrb[51].mxu0  ;;  %2972 = vst.msk [vmem:[#allocation5 + $0x60] sm:$0xff] %vm986_vm1, %v2954_v59  ;;  %v1540_v7 = vmul.f32 %v7173_v61, %v8676_v48  ;;  %v2338_v48 = vrot.slane %v8568_v11, 1  ;;  %v1743_v59 = vmul.f32 %v7176_v21, %v8714_v60 }
 0x707   : > { %v2953_v6 = vadd.f32 %v8757_v9, %v2928_v43 }
 0x708   : > { %v3750_v18 = vpack.c.bf16 %v3686_v4, %v3683_v10  ;;  %v8905_v37 = vpop.permute.xlu0 %1961  ;;  %v1666_v20 = vsel %vm1648_vm14, %v1540_v7, 0.0 }
 0x709   : > { %2971 = vst.msk [vmem:[#allocation5 + $0x58] sm:$0xff] %vm986_vm1, %v2953_v6  ;;  %v1029_v63 = vpop.permute.xlu1 %1028 }
 0x70a   : > { %1075 = vst.msk [vmem:[#allocation3 + $0x38] sm:$0xff] %vm986_vm1, %v1029_v63  ;;  %5409 = vmatmul.mubr.msk.bf16.vlgmr.msra.gmra.mrb[72].mxu1 %vm986_vm1, %v3750_v18  ;;  %v2000_v18 = vsel %vm1982_vm4, %v1874_v47, 0.0  ;;  %v3562_v63 = vld [vmem:[#allocation5 + $0x50] sm:$0xff]  ;;  %vm2170_vm4 = vcmp.eq.s32.totalorder %v8739_v62, 1 }
 0x70b   : > { %v3690_v13 = vpop.f32.mrb[52].mxu0  ;;  %5412 = vmatprep.mubr.msk.bf16.mxu1 %vm6339_vm0, %v9854_v44  ;;  %v9922_v47 = vld [vmem:[#allocation62_spill] sm:$0xff] }
 0x70c   : > { %v8913_v33 = vpop.permute.xlu0 %2607  ;;  %v3692_v3 = vpop.f32.mrb[53].mxu0  ;;  %v3691_v46 = vadd.f32 %v3690_v13, %v3560_v50  ;;  %v9924_v27 = vrot.slane %v9922_v47, 3 }
 0x70d   : > { %v1033_v12 = vpop.permute.xlu1 %1032  ;;  %v3693_v1 = vpop.f32.mrb[54].mxu0  ;;  %vm2634_vm13 = vcmp.eq.s32.totalorder %v8913_v33, 1 }
 0x70e   : > { %1077 = vst.msk [vmem:[#allocation3 + $0x48] sm:$0xff] %vm986_vm1, %v1033_v12  ;;  %v3694_v19 = vadd.f32 %v3693_v1, %v3561_v5  ;;  %v3695_v36 = vpop.f32.mrb[55].mxu0  ;;  %v1815_v12 = vadd.f32 %v1743_v59, %v1666_v20  ;;  %v9920_v5 = vrot.slane %v8797_v32, 1  ;;  %v9923_v59 = vrot.slane %v8568_v11, 4 }
 0x710   : > { %v3751_v43 = vpack.c.bf16 %v3694_v19, %v3691_v46  ;;  %v2144_v16 = vpop.permute.xlu0 %2143  ;;  %v2346_v1 = vsel %vm2342_vm9, %v9920_v5, %v2338_v48  ;;  %v2018_v36 = vadd.f32 %v2000_v18, %v1815_v12 }
 0x711   : > { %vm2168_vm15 = vcmp.eq.s32.totalorder %v2144_v16, 1  ;;  %v1037_v38 = vpop.permute.xlu1 %1036  ;;  %v2378_v7 = vmul.f32 %v9839_v30, %v2346_v1 }
 0x712   : > { %v2186_v10 = vsel %vm2168_vm15, %v2078_v26, 0.0  ;;  %1079 = vst.msk [vmem:[#allocation3 + $0x58] sm:$0xff] %vm986_vm1, %v1037_v38  ;;  %5413 = vmatmul.mubr.msk.bf16.gmra.mrb[76].mxu1 %vm986_vm1, %v3751_v43  ;;  %v2203_v18 = vadd.f32 %v8897_v25, %v2018_v36 }
 0x713   : > { %v2204_v4 = vadd.f32 %v2186_v10, %v2019_v14  ;;  %v3698_v28 = vpop.f32.mrb[56].mxu0  ;;  %5416 = vmatprep.mubr.msk.bf16.mxu1 %vm6339_vm0, %v9854_v44  ;;  %v3563_v14 = vld [vmem:[#allocation5 + $0x58] sm:$0xff] }
 0x714   : > { %v8936_v58 = vpop.permute.xlu0 %1462  ;;  %v3700_v6 = vpop.f32.mrb[57].mxu0  ;;  %v3699_v35 = vadd.f32 %v3698_v28, %v3562_v63  ;;  %v2039_v28 = vrot.slane %v9922_v47, 7 }
 0x715   : > { %v1501_v13 = vrot.slane %v8936_v58, 3  ;;  %v1835_v3 = vrot.slane %v8936_v58, 5  ;;  %v1041_v57 = vpop.permute.xlu1 %1040  ;;  %v3701_v50 = vpop.f32.mrb[58].mxu0  ;;  %v1704_v19 = vrot.slane %v8936_v58, 4  ;;  %v2038_v43 = vrot.slane %v8936_v58, 7 }
 0x716   : > { %1081 = vst.msk [vmem:[#allocation3 + $0x68] sm:$0xff] %vm986_vm1, %v1041_v57  ;;  %v3702_v60 = vadd.f32 %v3701_v50, %v3563_v14  ;;  %v3703_v46 = vpop.f32.mrb[59].mxu0  ;;  %v2339_v32 = vrot.slane %v8936_v58, 1  ;;  %v2320_v11 = vadd.f32 %v8765_v52, %v2204_v4 }
 0x717   : > { %v1841_v38 = vsel %vm1838_vm8, %v1834_v53, %v1835_v3  ;;  %v1507_v20 = vsel %vm1504_vm6, %v9921_v8, %v1501_v13  ;;  %v2486_v53 = vsel %vm2468_vm12, %v2378_v7, 0.0  ;;  %v1710_v6 = vsel %vm1707_vm7, %v9923_v59, %v1704_v19  ;;  %v5767_v7 = vld [vmem:[#allocation11 + $0x10] sm:$0xff]  }
 0x718   : > { %v3752_v26 = vpack.c.bf16 %v3702_v60, %v3699_v35  ;;  %v2868_v16 = vpop.permute.xlu0 %2867  ;;  %v1877_v63 = vmul.f32 %v9852_v39, %v1841_v38  ;;  %v2526_v57 = vmul.f32 %v9834_v2, %v1507_v20  ;;  %v2044_v50 = vsel %vm2041_vm11, %v2037_v42, %v2038_v43  ;;  %5437 = vmatpush3.bf16.msra.mxu0 %v5767_v7  ;;  %v9926_v7 = vld [vmem:[#allocation61_spill] sm:$0xff] }
 0x719   : > { %v1045_v10 = vpop.permute.xlu1 %1044  ;;  %v2345_v25 = vsel %vm2342_vm9, %v2338_v48, %v2339_v32  ;;  %v2079_v1 = vmul.f32 %v9846_v15, %v2044_v50  ;;  %v1543_v35 = vmul.f32 %v7173_v61, %v1507_v20  ;;  %v2786_v60 = vmul.f32 %v8697_v55, %v1841_v38  ;;  %5438 = vmatprep.subr.bf16.mxu0 %v9854_v44 }
 0x71a   : > { %1083 = vst.msk [vmem:[#allocation3 + $0x78] sm:$0xff] %vm986_vm1, %v1045_v10  ;;  %5417 = vmatmul.mubr.msk.bf16.gmra.mrb[80].mxu1 %vm986_vm1, %v3752_v26  ;;  %v1746_v46 = vmul.f32 %v7176_v21, %v1710_v6  ;;  %v2043_v42 = vsel %vm2041_vm11, %v2038_v43, %v2039_v28  ;;  %vm2894_vm14 = vcmp.eq.s32.totalorder %v2868_v16, 1  ;;  %v2652_v52 = vsel %vm2634_vm13, %v2526_v57, 0.0 }
 0x71b   : > { %5420 = vmatprep.mubr.msk.bf16.mxu1 %vm6339_vm0, %v9854_v44  ;;  %v9000_v48 = vsel %vm2169_vm2, %v2079_v1, 0.0  ;;  %v1669_v26 = vsel %vm1651_vm3, %v1543_v35, 0.0  ;;  %v2379_v4 = vmul.f32 %v9839_v30, %v2345_v25  ;;  %v2080_v8 = vmul.f32 %v9846_v15, %v2043_v42 }
 0x71c   : > { %v2279_v14 = vpop.permute.xlu0 %2278  ;;  %v1818_v10 = vadd.f32 %v1746_v46, %v1669_v26  ;;  %v2692_v43 = vmul.f32 %v9847_v40, %v1710_v6  ;;  %v2003_v24 = vsel %vm1985_vm10, %v1877_v63, 0.0  ;;  %v1506_v62 = vsel %vm1504_vm6, %v1501_v13, %v9924_v27  ;;  %5439 = vmatpush3.bf16.msra.mxu0 %v5768_v34 }
 0x71d   : > { %v2319_v12 = vadd.f32 %v2279_v14, %v2203_v18  ;;  %v1049_v5 = vpop.permute.xlu1 %1048  ;;  %v2188_v57 = vsel %vm2170_vm4, %v2080_v8, 0.0  ;;  %v2912_v14 = vsel %vm2894_vm14, %v2786_v60, 0.0  ;;  %v1705_v63 = vrot.slane %v9922_v47, 4  ;;  %5528 = vmatprep.subr.bf16.mxu0 %v9854_v44 }
 0x71e   : > { %1085 = vst.msk [vmem:[#allocation3 + $0x88] sm:$0xff] %vm986_vm1, %v1049_v5  ;;  %v2021_v33 = vadd.f32 %v2003_v24, %v1818_v10  ;;  %v9925_v16 = vrot.slane %v9922_v47, 5  ;;  %v2527_v13 = vmul.f32 %v9834_v2, %v1506_v62  ;;  %v1544_v60 = vmul.f32 %v7173_v61, %v1506_v62  ;;  %v9928_v62 = vld [vmem:[#allocation60_spill] sm:$0xff] }
 0x71f   : > { %v2504_v36 = vadd.f32 %v2486_v53, %v2319_v12  ;;  %v1709_v1 = vsel %vm1707_vm7, %v1704_v19, %v1705_v63  ;;  %vm1650_vm2 = vcmp.eq.s32.totalorder %v8887_v31, 1  ;;  %vm1984_vm10 = vcmp.eq.s32.totalorder %v8905_v37, 1 }
 0x720   : > { %v2445_v38 = vpop.permute.xlu0 %2444  ;;  %v9014_v6 = vadd.f32 %v2188_v57, %v2021_v33  ;;  %v1840_v25 = vsel %vm1838_vm8, %v1835_v3, %v9925_v16  ;;  %v2693_v42 = vmul.f32 %v9847_v40, %v1709_v1  ;;  %vm2895_vm8 = vcmp.eq.s32.totalorder %v8750_v51, 1 }
 0x721   : > { %v2670_v20 = vadd.f32 %v2652_v52, %v2504_v36  ;;  %vm2469_vm15 = vcmp.eq.s32.totalorder %v2445_v38, 1  ;;  %v2787_v46 = vmul.f32 %v8697_v55, %v1840_v25  ;;  %v1878_v19 = vmul.f32 %v9852_v39, %v1840_v25 }
 0x722   : > { %v2487_v53 = vsel %vm2469_vm15, %v2379_v4, 0.0  ;;  %v9927_v52 = vrot.slane %v9926_v7, 7  ;;  %v1747_v38 = vmul.f32 %v7176_v21, %v1709_v1  ;;  %v1542_v51 = vmul.f32 %v7173_v61, %v8842_v22 }
 0x723   : > { %v2764_v59 = vadd.f32 %v2692_v43, %v2670_v20  ;;  %v2505_v18 = vadd.f32 %v2487_v53, %v2320_v11  ;;  %v2913_v8 = vsel %vm2895_vm8, %v2787_v46, 0.0  ;;  %v2340_v34 = vrot.slane %v9922_v47, 1 }
 0x724   : > { %v1634_v50 = vpop.permute.xlu0 %1633  ;;  %v2042_v4 = vsel %vm2041_vm11, %v2039_v28, %v9927_v52  ;;  %v1668_v53 = vsel %vm1650_vm2, %v1542_v51, 0.0  ;;  %v1876_v28 = vmul.f32 %v9852_v39, %v8857_v49  ;;  %v2341_v49 = vrot.slane %v9926_v7, 1  ;;  %v9932_v52 = vld [vmem:[#allocation63_spill] sm:$0xff] }
 0x725   : > { %v2930_v12 = vadd.f32 %v2912_v14, %v2764_v59  ;;  %vm1652_vm6 = vcmp.eq.s32.totalorder %v1634_v50, 1  ;;  %v2081_v31 = vmul.f32 %v9846_v15, %v2042_v4  ;;  %v1745_v59 = vmul.f32 %v7176_v21, %v8866_v45 }
 0x726   : > { %v1670_v36 = vsel %vm1652_vm6, %v1544_v60, 0.0  ;;  %v2344_v39 = vsel %vm2342_vm9, %v2339_v32, %v2340_v34  ;;  %vm2470_vm13 = vcmp.eq.s32.totalorder %v8645_v54, 1  ;;  %v9930_v32 = vrot.slane %v9926_v7, 4 }
 0x727   : > { %v2955_v5 = vadd.f32 %v8757_v9, %v2930_v12  ;;  %v1819_v20 = vadd.f32 %v1747_v38, %v1670_v36  ;;  %v1817_v57 = vadd.f32 %v1745_v59, %v1668_v53  ;;  %v2380_v45 = vmul.f32 %v9839_v30, %v2344_v39 }
 0x728   : > { %v2611_v35 = vpop.permute.xlu0 %2610  ;;  %v1708_v16 = vsel %vm1707_vm7, %v1705_v63, %v9930_v32  ;;  %v2343_v63 = vsel %vm2342_vm9, %v2340_v34, %v2341_v49  ;;  %v2530_v4 = vmul.f32 %v9834_v2, %v9932_v52  ;;  %vm2471_vm7 = vcmp.eq.s32.totalorder %v8773_v56, 1  ;;  %v9934_v34 = vld [vmem:[#allocation71_spill] sm:$0xff] }
 0x729   : > { %2973 = vst.msk [vmem:[#allocation5 + $0x68] sm:$0xff] %vm986_vm1, %v2955_v5  ;;  %vm2635_vm12 = vcmp.eq.s32.totalorder %v2611_v35, 1  ;;  %v9929_v5 = vrot.slane %v9928_v62, 1  ;;  %v2488_v25 = vsel %vm2470_vm13, %v2380_v45, 0.0  ;;  %v9931_v35 = vld [vmem:[#allocation73_spill] sm:$0xff]  ;;  %v2381_v38 = vmul.f32 %v9839_v30, %v2343_v63 }
 0x72a   : > { %v2653_v11 = vsel %vm2635_vm12, %v2527_v13, 0.0  ;;  %v2788_v60 = vmul.f32 %v8697_v55, %v9931_v35  ;;  %v2695_v56 = vmul.f32 %v9847_v40, %v9934_v34  ;;  %v9125_v63 = vld [vmem:[%s9539_s9] ss:$0 sm:$0xff] }
 0x72b   : > { %v2671_v3 = vadd.f32 %v2653_v11, %v2505_v18  ;;  %v2002_v18 = vsel %vm1984_vm10, %v1876_v28, 0.0  ;;  %v2360_v58 = vsel %vm2342_vm9, %v2341_v49, %v9929_v5 }
 0x72c   : > { %v1968_v26 = vpop.permute.xlu0 %1967  ;;  %v2020_v14 = vadd.f32 %v2002_v18, %v1817_v57  ;;  %v2382_v1 = vmul.f32 %v9839_v30, %v2360_v58  ;;  %v2749_v59 = vsel %vm1376_vm5, %v2695_v56, 0.0  ;;  %v3564_v57 = vld [vmem:[#allocation5 + $0x60] sm:$0xff] }
 0x72d   : > { %v2765_v10 = vadd.f32 %v2693_v42, %v2671_v3  ;;  %vm1986_vm3 = vcmp.eq.s32.totalorder %v1968_v26, 1 }
 0x72e   : > { %v2004_v43 = vsel %vm1986_vm3, %v1878_v19, 0.0  ;;  %v2205_v50 = vadd.f32 %v9000_v48, %v2020_v14  ;;  %v2694_v48 = vmul.f32 %v9847_v40, %v1708_v16 }
 0x72f   : > { %v2931_v24 = vadd.f32 %v2913_v8, %v2765_v10  ;;  %v2022_v22 = vadd.f32 %v2004_v43, %v1819_v20  ;;  %v9933_v10 = vld [vmem:[#allocation64_spill] sm:$0xff] }
 0x730   : > { %v2153_v33 = vpop.permute.xlu0 %2152  ;;  %v2790_v51 = vmul.f32 %v8697_v55, %v9933_v10  ;;  %v3730_v10 = vld [vmem:[#allocation3 + $0x8] sm:$0xff] }
 0x731   : > { %v2956_v61 = vadd.f32 %v8757_v9, %v2931_v24  ;;  %vm2171_vm11 = vcmp.eq.s32.totalorder %v2153_v33, 1  ;;  %v2489_v24 = vsel %vm2471_vm7, %v2381_v38, 0.0 }
 0x732   : > { %v2189_v37 = vsel %vm2171_vm11, %v2081_v31, 0.0 }
 0x733   : > { %2974 = vst.msk [vmem:[#allocation5 + $0x70] sm:$0xff] %vm986_vm1, %v2956_v61  ;;  %v2207_v47 = vadd.f32 %v2189_v37, %v2022_v22 }
 0x734   : > { %v2874_v15 = vpop.permute.xlu0 %2873 }
 0x735   : > { %v2323_v21 = vadd.f32 %v8832_v17, %v2207_v47  ;;  %vm2896_vm14 = vcmp.eq.s32.totalorder %v2874_v15, 1  ;;  %v3565_v47 = vld [vmem:[#allocation5 + $0x68] sm:$0xff] }
 0x736   : > { %v2914_v3 = vsel %vm2896_vm14, %v2788_v60, 0.0 }
 0x738   : > { %v2283_v12 = vpop.permute.xlu0 %2282 }
 0x739   : > { %v2321_v27 = vadd.f32 %v2283_v12, %v2205_v50 }
 0x73a   : > { %v3566_v12 = vld [vmem:[#allocation5 + $0x70] sm:$0xff] }
 0x73b   : > { %v2506_v17 = vadd.f32 %v2488_v25, %v2321_v27 }
 0x73c   : > { %v2454_v13 = vpop.permute.xlu0 %2453 }
 0x73d   : > { %v2672_v54 = vadd.f32 %v8722_v0, %v2506_v17  ;;  %vm2472_vm15 = vcmp.eq.s32.totalorder %v2454_v13, 1 }
 0x73e   : > { %v2490_v11 = vsel %vm2472_vm15, %v2382_v1, 0.0 }
 0x73f   : > { %v2766_v46 = vadd.f32 %v2694_v48, %v2672_v54  ;;  %v2508_v42 = vadd.f32 %v2490_v11, %v2323_v21 }
 0x740   : > { %v5737_v36 = vpop.permute.xlu0 %5736 }
 0x741   : > { %v2932_v19 = vadd.f32 %v2914_v3, %v2766_v46  ;;  %v5739_v26 = vunpack.i.h.bf16 %v5737_v36  ;;  %v5738_v7 = vunpack.i.l.bf16 %v5737_v36 }
 0x743   : > { %v2957_v0 = vadd.f32 %v8757_v9, %v2932_v19  ;;  %vm2898_vm4 = vcmp.eq.s32.totalorder %v5739_v26, 1  ;;  %vm2638_vm6 = vcmp.eq.s32.totalorder %v5738_v7, 1 }
 0x744   : > { %v2656_v8 = vsel %vm2638_vm6, %v2530_v4, 0.0  ;;  %v2285_v23 = vpop.permute.xlu0 %2284  ;;  %v2916_v2 = vsel %vm2898_vm4, %v2790_v51, 0.0 }
 0x745   : > { %2975 = vst.msk [vmem:[#allocation5 + $0x78] sm:$0xff] %vm986_vm1, %v2957_v0  ;;  %v2674_v43 = vadd.f32 %v2656_v8, %v2508_v42  ;;  %v2322_v20 = vadd.f32 %v2285_v23, %v9014_v6 }
 0x747   : > { %v2934_v53 = vadd.f32 %v2916_v2, %v2674_v43  ;;  %v2507_v28 = vadd.f32 %v2489_v24, %v2322_v20 }
 0x748   : > { %v1015_v31 = vpop.permute.xlu0 %1014 }
 0x749   : > { %v2959_v30 = vadd.f32 %v8757_v9, %v2934_v53  ;;  %v2673_v33 = vadd.f32 %v8792_v41, %v2507_v28  ;;  %1068 = vst.msk [vmem:[#allocation3] sm:$0xff] %vm986_vm1, %v1015_v31  ;;  %v3732_v28 = vld [vmem:[#allocation3 + $0x18] sm:$0xff] }
 0x74b   : > { %2977 = vst.msk [vmem:[#allocation5 + $0x88] sm:$0xff] %vm986_vm1, %v2959_v30  ;;  %v2767_v6 = vadd.f32 %v2749_v59, %v2673_v33 }
 0x74c   : > { %v1019_v61 = vpop.permute.xlu0 %1018  ;;  %v3567_v27 = vld [vmem:[#allocation5 + $0x78] sm:$0xff] }
 0x74d   : > { %v2933_v22 = vadd.f32 %v8814_v29, %v2767_v6  ;;  %1070 = vst.msk [vmem:[#allocation3 + $0x10] sm:$0xff] %vm986_vm1, %v1019_v61 }
 0x74f   : > { %v2958_v40 = vadd.f32 %v8757_v9, %v2933_v22 }
 0x750   : > { %v1023_v18 = vpop.permute.xlu0 %1022  ;;  %v3729_v38 = vld [vmem:[#allocation3] sm:$0xff] }
 0x751   : > { %v3706_v37 = vpop.f32.mrb[60].mxu0  ;;  %2976 = vst.msk [vmem:[#allocation5 + $0x80] sm:$0xff] %vm986_vm1, %v2958_v40  ;;  %1072 = vst.msk [vmem:[#allocation3 + $0x20] sm:$0xff] %vm986_vm1, %v1023_v18 }
 0x752   : > { %v3708_v41 = vpop.f32.mrb[61].mxu0  ;;  %v3707_v15 = vadd.f32 %v3706_v37, %v3564_v57  ;;  %v3569_v54 = vld [vmem:[#allocation5 + $0x88] sm:$0xff]  ;;  %v3734_v37 = vld [vmem:[#allocation3 + $0x28] sm:$0xff] }
 0x753   : > { %v3709_v39 = vpop.f32.mrb[62].mxu0 }
 0x754   : > { %v3710_v49 = vadd.f32 %v3709_v39, %v3565_v47  ;;  %v3711_v14 = vpop.f32.mrb[63].mxu0  ;;  %v1027_v21 = vpop.permute.xlu0 %1026  ;;  %v3731_v53 = vld [vmem:[#allocation3 + $0x10] sm:$0xff] }
 0x755   : > { %1074 = vst.msk [vmem:[#allocation3 + $0x30] sm:$0xff] %vm986_vm1, %v1027_v21 }
 0x756   : > { %v3753_v45 = vpack.c.bf16 %v3710_v49, %v3707_v15 }
 0x758   : > { %5421 = vmatmul.mubr.msk.bf16.gmra.mrb[84].mxu1 %vm986_vm1, %v3753_v45  ;;  %v1031_v9 = vpop.permute.xlu0 %1030  ;;  %v3568_v48 = vld [vmem:[#allocation5 + $0x80] sm:$0xff]  ;;  %v3733_v18 = vld [vmem:[#allocation3 + $0x20] sm:$0xff] }
 0x759   : > { %v3714_v29 = vpop.f32.mrb[64].mxu0  ;;  %5424 = vmatprep.mubr.msk.bf16.mxu1 %vm6339_vm0, %v9854_v44  ;;  %1076 = vst.msk [vmem:[#allocation3 + $0x40] sm:$0xff] %vm986_vm1, %v1031_v9 }
 0x75a   : > { %v3716_v50 = vpop.f32.mrb[65].mxu0  ;;  %v3715_v5 = vadd.f32 %v3714_v29, %v3566_v12  ;;  %v3736_v29 = vld [vmem:[#allocation3 + $0x38] sm:$0xff] }
 0x75b   : > { %v3717_v62 = vpop.f32.mrb[66].mxu0 }
 0x75c   : > { %v3718_v58 = vadd.f32 %v3717_v62, %v3567_v27  ;;  %v3719_v32 = vpop.f32.mrb[67].mxu0  ;;  %v1035_v16 = vpop.permute.xlu0 %1034  ;;  %v3735_v9 = vld [vmem:[#allocation3 + $0x30] sm:$0xff] }
 0x75d   : > { %1078 = vst.msk [vmem:[#allocation3 + $0x50] sm:$0xff] %vm986_vm1, %v1035_v16 }
 0x75e   : > { %v3754_v25 = vpack.c.bf16 %v3718_v58, %v3715_v5 }
 0x760   : > { %5425 = vmatmul.mubr.msk.bf16.gmra.mrb[88].mxu1 %vm986_vm1, %v3754_v25  ;;  %v1039_v17 = vpop.permute.xlu0 %1038 }
 0x761   : > { %v3722_v1 = vpop.f32.mrb[68].mxu0  ;;  %5428 = vmatprep.mubr.msk.bf16.mxu1 %vm6339_vm0, %v9854_v44  ;;  %1080 = vst.msk [vmem:[#allocation3 + $0x60] sm:$0xff] %vm986_vm1, %v1039_v17  ;;  %v3737_v17 = vld [vmem:[#allocation3 + $0x40] sm:$0xff] }
 0x762   : > { %v3724_v13 = vpop.f32.mrb[69].mxu0  ;;  %v3723_v60 = vadd.f32 %v3722_v1, %v3568_v48  ;;  %v3738_v1 = vld [vmem:[#allocation3 + $0x48] sm:$0xff] }
 0x763   : > { %v3725_v35 = vpop.f32.mrb[70].mxu0 }
 0x764   : > { %v3726_v11 = vadd.f32 %v3725_v35, %v3569_v54  ;;  %v3727_v46 = vpop.f32.mrb[71].mxu0  ;;  %v1043_v42 = vpop.permute.xlu0 %1042 }
 0x765   : > { %1082 = vst.msk [vmem:[#allocation3 + $0x70] sm:$0xff] %vm986_vm1, %v1043_v42 }
 0x766   : > { %v3755_v3 = vpack.c.bf16 %v3726_v11, %v3723_v60 }
 0x768   : > { %5429 = vmatmul.mubr.msk.bf16.gmra.mrb[92].mxu1 %vm986_vm1, %v3755_v3  ;;  %v1047_v36 = vpop.permute.xlu0 %1046 }
 0x769   : > { %5492 = vmatprep.mubr.msk.bf16.mxu1 %vm6339_vm0, %v9854_v44  ;;  %1084 = vst.msk [vmem:[#allocation3 + $0x80] sm:$0xff] %vm986_vm1, %v1047_v36  ;;  %v3739_v36 = vld [vmem:[#allocation3 + $0x50] sm:$0xff] }
 0x799   : > { %v3856_v19 = vpop.f32.mrb[72].mxu0 }
 0x79a   : > { %v3857_v26 = vadd.f32 %v9125_v63, %v3856_v19  ;;  %v5398_v7 = vpop.f32.mrb[73].mxu0  ;;  %v3740_v19 = vld [vmem:[#allocation3 + $0x58] sm:$0xff] }
 0x79b   : > { %v3859_v52 = vpop.f32.mrb[74].mxu0 }
 0x79c   : > { %v3860_v4 = vadd.f32 %v9125_v63, %v3859_v52  ;;  %v5399_v0 = vpop.f32.mrb[75].mxu0  ;;  %v9129_v51 = vadd.f32 %v3857_v26, %v3729_v38  ;;  %v5771_v38 = vld [vmem:[%s9542_s12 + $0x10] sm:$0xff]  }
 0x79d   : > { %v5770_v0 = vld [vmem:[%s9542_s12 + $0x8] sm:$0xff]  }
 0x79e   : > { %v9131_v8 = vadd.f32 %v3860_v4, %v3730_v10  ;;  %v5769_v4 = vld [vmem:[%s9542_s12] sm:$0xff]   ;;  %v5772_v10 = vld [vmem:[%s9542_s12 + $0x18] sm:$0xff]  }
 0x79f   : > { %5477 = vmatpush3.bf16.msra.mxu1 %v5769_v4 }
 0x7a0   : > { %v3945_v23 = vpack.c.bf16 %v9131_v8, %v9129_v51  ;;  %5478 = vmatprep.subr.bf16.mxu1 %v9854_v44 }
 0x7a2   : > { %5441 = vmatmul.mubr.msk.bf16.vlgmr.msra.gmra.mrb[84].mxu0 %vm986_vm1, %v3945_v23  ;;  %v3864_v43 = vpop.f32.mrb[76].mxu0  ;;  %v5773_v23 = vld [vmem:[%s9542_s12 + $0x20] sm:$0xff]  }
 0x7a3   : > { %v3865_v20 = vadd.f32 %v9125_v63, %v3864_v43  ;;  %v5402_v24 = vpop.f32.mrb[77].mxu0  ;;  %5444 = vmatprep.mubr.msk.bf16.mxu0 %vm6339_vm0, %v9854_v44  ;;  %5479 = vmatpush3.bf16.msra.mxu1 %v5770_v0  ;;  %v5774_v43 = vld [vmem:[%s9542_s12 + $0x28] sm:$0xff]  }
 0x7a4   : > { %v3867_v2 = vpop.f32.mrb[78].mxu0  ;;  %5480 = vmatprep.subr.bf16.mxu1 %v9854_v44  ;;  %v5776_v24 = vld [vmem:[%s9542_s12 + $0x38] sm:$0xff]  }
 0x7a5   : > { %v3868_v34 = vadd.f32 %v9125_v63, %v3867_v2  ;;  %v5403_v56 = vpop.f32.mrb[79].mxu0  ;;  %v9140_v31 = vadd.f32 %v3865_v20, %v3731_v53  ;;  %v5775_v20 = vld [vmem:[%s9542_s12 + $0x30] sm:$0xff]  }
 0x7a7   : > { %v9142_v30 = vadd.f32 %v3868_v34, %v3732_v28  ;;  %5481 = vmatpush3.bf16.msra.mxu1 %v5771_v38 }
 0x7a8   : > { %5482 = vmatprep.subr.bf16.mxu1 %v9854_v44 }
 0x7a9   : > { %v3946_v33 = vpack.c.bf16 %v9142_v30, %v9140_v31 }
 0x7aa   : > { %v3872_v55 = vpop.f32.mrb[80].mxu0 }
 0x7ab   : > { %v3873_v59 = vadd.f32 %v9125_v63, %v3872_v55  ;;  %v5406_v6 = vpop.f32.mrb[81].mxu0  ;;  %5445 = vmatmul.mubr.msk.bf16.gmra.mrb[88].mxu0 %vm986_vm1, %v3946_v33  ;;  %5483 = vmatpush3.bf16.msra.mxu1 %v5772_v10  ;;  %v3741_v55 = vld [vmem:[#allocation3 + $0x60] sm:$0xff] }
 0x7ac   : > { %v3875_v61 = vpop.f32.mrb[82].mxu0  ;;  %5448 = vmatprep.mubr.msk.bf16.mxu0 %vm6339_vm0, %v9854_v44  ;;  %5484 = vmatprep.subr.bf16.mxu1 %v9854_v44 }
 0x7ad   : > { %v3876_v22 = vadd.f32 %v9125_v63, %v3875_v61  ;;  %v5407_v40 = vpop.f32.mrb[83].mxu0  ;;  %v9151_v41 = vadd.f32 %v3873_v59, %v3733_v18  ;;  %v3742_v59 = vld [vmem:[#allocation3 + $0x68] sm:$0xff] }
 0x7af   : > { %v9153_v57 = vadd.f32 %v3876_v22, %v3734_v37  ;;  %5485 = vmatpush3.bf16.msra.mxu1 %v5773_v23 }
 0x7b0   : > { %5486 = vmatprep.subr.bf16.mxu1 %v9854_v44 }
 0x7b1   : > { %v3947_v47 = vpack.c.bf16 %v9153_v57, %v9151_v41 }
 0x7b3   : > { %5449 = vmatmul.mubr.msk.bf16.gmra.mrb[92].mxu0 %vm986_vm1, %v3947_v47  ;;  %5487 = vmatpush3.bf16.msra.mxu1 %v5774_v43 }
 0x7b4   : > { %5452 = vmatprep.mubr.msk.bf16.mxu0 %vm6339_vm0, %v9854_v44  ;;  %5488 = vmatprep.subr.bf16.mxu1 %v9854_v44 }
 0x7b7   : > { %5489 = vmatpush3.bf16.msra.mxu1 %v5775_v20 }
 0x7b8   : > { %5490 = vmatprep.subr.bf16.mxu1 %v9854_v44 }
 0x7bb   : > { %5491 = vmatpush3.bf16.msra.mxu1 %v5776_v24 }
 0x7bc   : > { %5572 = vmatprep.subr.bf16.mxu1 %v9854_v44 }
 0x7dd   : > { %v3880_v39 = vpop.f32.mrb[72].mxu1 }
 0x7de   : > { %v3881_v15 = vadd.f32 %v9125_v63, %v3880_v39  ;;  %v5410_v49 = vpop.f32.mrb[73].mxu1 }
 0x7df   : > { %v3883_v14 = vpop.f32.mrb[74].mxu1  ;;  %v3743_v49 = vld [vmem:[#allocation3 + $0x70] sm:$0xff] }
 0x7e0   : > { %v3884_v21 = vadd.f32 %v9125_v63, %v3883_v14  ;;  %v5411_v45 = vpop.f32.mrb[75].mxu1  ;;  %v9162_v50 = vadd.f32 %v3881_v15, %v3735_v9  ;;  %v3744_v14 = vld [vmem:[#allocation3 + $0x78] sm:$0xff] }
 0x7e2   : > { %v9164_v12 = vadd.f32 %v3884_v21, %v3736_v29 }
 0x7e4   : > { %v3948_v27 = vpack.c.bf16 %v9164_v12, %v9162_v50 }
 0x7e5   : > { %v3888_v62 = vpop.f32.mrb[76].mxu1 }
 0x7e6   : > { %v3889_v5 = vadd.f32 %v9125_v63, %v3888_v62  ;;  %v5414_v58 = vpop.f32.mrb[77].mxu1  ;;  %5453 = vmatmul.mubr.msk.bf16.gmra.mrb[96].mxu0 %vm986_vm1, %v3948_v27 }
 0x7e7   : > { %v3891_v32 = vpop.f32.mrb[78].mxu1  ;;  %5456 = vmatprep.mubr.msk.bf16.mxu0 %vm6339_vm0, %v9854_v44 }
 0x7e8   : > { %v3892_v16 = vadd.f32 %v9125_v63, %v3891_v32  ;;  %v5415_v25 = vpop.f32.mrb[79].mxu1  ;;  %v9173_v13 = vadd.f32 %v3889_v5, %v3737_v17 }
 0x7e9   : > { %v3746_v25 = vld [vmem:[#allocation3 + $0x88] sm:$0xff] }
 0x7ea   : > { %v9175_v48 = vadd.f32 %v3892_v16, %v3738_v1  ;;  %v3745_v16 = vld [vmem:[#allocation3 + $0x80] sm:$0xff] }
 0x7ec   : > { %v3949_v54 = vpack.c.bf16 %v9175_v48, %v9173_v13 }
 0x7ed   : > { %v3896_v35 = vpop.f32.mrb[80].mxu1 }
 0x7ee   : > { %v3897_v60 = vadd.f32 %v9125_v63, %v3896_v35  ;;  %v5418_v11 = vpop.f32.mrb[81].mxu1  ;;  %5457 = vmatmul.mubr.msk.bf16.gmra.mrb[100].mxu0 %vm986_vm1, %v3949_v54  ;;  %v9261_v35 = vld [vmem:[%s9541_s11] ss:$0 sm:$0xff] }
 0x7ef   : > { %v3899_v46 = vpop.f32.mrb[82].mxu1  ;;  %5460 = vmatprep.mubr.msk.bf16.mxu0 %vm6339_vm0, %v9854_v44 }
 0x7f0   : > { %v3900_v42 = vadd.f32 %v9125_v63, %v3899_v46  ;;  %v5419_v3 = vpop.f32.mrb[83].mxu1  ;;  %v9184_v26 = vadd.f32 %v3897_v60, %v3739_v36 }
 0x7f2   : > { %v9186_v7 = vadd.f32 %v3900_v42, %v3740_v19 }
 0x7f4   : > { %v3950_v52 = vpack.c.bf16 %v9186_v7, %v9184_v26 }
 0x7f6   : > { %5461 = vmatmul.mubr.msk.bf16.gmra.mrb[104].mxu0 %vm986_vm1, %v3950_v52 }
 0x7f7   : > { %5464 = vmatprep.mubr.msk.bf16.mxu0 %vm6339_vm0, %v9854_v44 }
 0x82b   : > { %v3904_v2 = vpop.f32.mrb[84].mxu1 }
 0x82c   : > { %v3905_v34 = vadd.f32 %v9125_v63, %v3904_v2  ;;  %v5422_v56 = vpop.f32.mrb[85].mxu1 }
 0x82d   : > { %v3907_v53 = vpop.f32.mrb[86].mxu1 }
 0x82e   : > { %v3908_v28 = vadd.f32 %v9125_v63, %v3907_v53  ;;  %v5423_v33 = vpop.f32.mrb[87].mxu1  ;;  %v9227_v6 = vadd.f32 %v3905_v34, %v3741_v55 }
 0x830   : > { %v9229_v61 = vadd.f32 %v3908_v28, %v3742_v59 }
 0x832   : > { %v3951_v22 = vpack.c.bf16 %v9229_v61, %v9227_v6 }
 0x833   : > { %v3912_v40 = vpop.f32.mrb[88].mxu1 }
 0x834   : > { %v3913_v18 = vadd.f32 %v9125_v63, %v3912_v40  ;;  %v5426_v37 = vpop.f32.mrb[89].mxu1  ;;  %5465 = vmatmul.mubr.msk.bf16.gmra.mrb[108].mxu0 %vm986_vm1, %v3951_v22 }
 0x835   : > { %v3915_v47 = vpop.f32.mrb[90].mxu1  ;;  %5468 = vmatprep.mubr.msk.bf16.mxu0 %vm6339_vm0, %v9854_v44 }
 0x836   : > { %v3916_v39 = vadd.f32 %v9125_v63, %v3915_v47  ;;  %v5427_v15 = vpop.f32.mrb[91].mxu1  ;;  %v9238_v21 = vadd.f32 %v3913_v18, %v3743_v49 }
 0x838   : > { %v9240_v45 = vadd.f32 %v3916_v39, %v3744_v14 }
 0x83a   : > { %v3952_v9 = vpack.c.bf16 %v9240_v45, %v9238_v21 }
 0x83b   : > { %v3920_v29 = vpop.f32.mrb[92].mxu1 }
 0x83c   : > { %v3921_v27 = vadd.f32 %v9125_v63, %v3920_v29  ;;  %v5430_v62 = vpop.f32.mrb[93].mxu1  ;;  %5469 = vmatmul.mubr.msk.bf16.gmra.mrb[112].mxu0 %vm986_vm1, %v3952_v9 }
 0x83d   : > { %v3923_v5 = vpop.f32.mrb[94].mxu1  ;;  %5472 = vmatprep.mubr.msk.bf16.mxu0 %vm6339_vm0, %v9854_v44 }
 0x83e   : > { %v3924_v58 = vadd.f32 %v9125_v63, %v3923_v5  ;;  %v5431_v32 = vpop.f32.mrb[95].mxu1  ;;  %v9249_v17 = vadd.f32 %v3921_v27, %v3745_v16 }
 0x840   : > { %v9251_v1 = vadd.f32 %v3924_v58, %v3746_v25 }
 0x842   : > { %v3953_v54 = vpack.c.bf16 %v9251_v1, %v9249_v17 }
 0x844   : > { %5473 = vmatmul.mubr.msk.bf16.gmra.mrb[116].mxu0 %vm986_vm1, %v3953_v54 }
 0x845   : > { %5536 = vmatprep.mubr.msk.bf16.mxu0 %vm6339_vm0, %v9854_v44 }
 0x875   : > { %v4054_v63 = vpop.f32.mrb[84].mxu0 }
 0x876   : > { %v4055_v60 = vadd.f32 %v9261_v35, %v4054_v63  ;;  %v5442_v11 = vpop.f32.mrb[85].mxu0 }
 0x877   : > { %v4057_v46 = vpop.f32.mrb[86].mxu0 }
 0x878   : > { %v4125_v42 = vsub.f32 0.0, %v4055_v60  ;;  %v4058_v3 = vadd.f32 %v9261_v35, %v4057_v46  ;;  %v5443_v36 = vpop.f32.mrb[87].mxu0 }
 0x87a   : > { %v4143_v19 = vmul.f32 1.442695, %v4125_v42  ;;  %v4126_v52 = vsub.f32 0.0, %v4058_v3 }
 0x87c   : > { %5965 = vpow2.f32 %v4143_v19  ;;  %v4145_v4 = vmul.f32 1.442695, %v4126_v52 }
 0x87e   : > { %5967 = vpow2.f32 %v4145_v4  ;;  %v4062_v0 = vpop.f32.mrb[88].mxu0 }
 0x87f   : > { %v4063_v38 = vadd.f32 %v9261_v35, %v4062_v0  ;;  %v5446_v10 = vpop.f32.mrb[89].mxu0 }
 0x880   : > { %v4065_v23 = vpop.f32.mrb[90].mxu0 }
 0x881   : > { %v4127_v43 = vsub.f32 0.0, %v4063_v38  ;;  %v4066_v20 = vadd.f32 %v9261_v35, %v4065_v23  ;;  %v5447_v24 = vpop.f32.mrb[91].mxu0 }
 0x883   : > { %v4147_v2 = vmul.f32 1.442695, %v4127_v43  ;;  %v4128_v34 = vsub.f32 0.0, %v4066_v20  ;;  %v5777_v43 = vld [vmem:[#allocation12] sm:$0xff]  }
 0x885   : > { %5969 = vpow2.f32 %v4147_v2  ;;  %v4149_v56 = vmul.f32 1.442695, %v4128_v34  ;;  %v5778_v2 = vld [vmem:[#allocation12 + $0x8] sm:$0xff]  }
 0x886   : > { %v5966_v53 = vpop.eup %5965  ;;  %v4070_v28 = vpop.f32.mrb[92].mxu0 }
 0x887   : > { %v4179_v33 = vadd.f32 1.0, %v5966_v53  ;;  %5971 = vpow2.f32 %v4149_v56  ;;  %v4071_v55 = vadd.f32 %v9261_v35, %v4070_v28  ;;  %v5450_v59 = vpop.f32.mrb[93].mxu0 }
 0x888   : > { %v5968_v22 = vpop.eup %5967  ;;  %v4073_v40 = vpop.f32.mrb[94].mxu0 }
 0x889   : > { %5973 = vrcp.f32 %v4179_v33  ;;  %v4180_v18 = vadd.f32 1.0, %v5968_v22  ;;  %v4129_v37 = vsub.f32 0.0, %v4071_v55  ;;  %v4074_v47 = vadd.f32 %v9261_v35, %v4073_v40  ;;  %v5451_v39 = vpop.f32.mrb[95].mxu0  ;;  %v5779_v33 = vld [vmem:[#allocation12 + $0x10] sm:$0xff]  }
 0x88b   : > { %5975 = vrcp.f32 %v4180_v18  ;;  %v4151_v15 = vmul.f32 1.442695, %v4129_v37  ;;  %v4130_v49 = vsub.f32 0.0, %v4074_v47  ;;  %v5780_v18 = vld [vmem:[#allocation12 + $0x18] sm:$0xff]  }
 0x88d   : > { %5977 = vpow2.f32 %v4151_v15  ;;  %v4153_v14 = vmul.f32 1.442695, %v4130_v49 }
 0x88f   : > { %v5970_v9 = vpop.eup %5969  ;;  %5979 = vpow2.f32 %v4153_v14 }
 0x890   : > { %v4181_v29 = vadd.f32 1.0, %v5970_v9 }
 0x891   : > { %v5972_v27 = vpop.eup %5971 }
 0x892   : > { %5981 = vrcp.f32 %v4181_v29  ;;  %v4182_v62 = vadd.f32 1.0, %v5972_v27 }
 0x893   : > { %v5974_v5 = vpop.eup %5973 }
 0x894   : > { %5983 = vrcp.f32 %v4182_v62  ;;  %v4215_v32 = vmul.f32 %v5974_v5, %v4055_v60 }
 0x895   : > { %v5976_v58 = vpop.eup %5975 }
 0x896   : > { %v4216_v16 = vmul.f32 %v5976_v58, %v4058_v3 }
 0x897   : > { %v5978_v25 = vpop.eup %5977 }
 0x898   : > { %v4233_v54 = vpack.c.bf16 %v4216_v16, %v4215_v32  ;;  %v4183_v63 = vadd.f32 1.0, %v5978_v25 }
 0x899   : > { %v5980_v11 = vpop.eup %5979 }
 0x89a   : > { %5985 = vrcp.f32 %v4183_v63  ;;  %v4184_v46 = vadd.f32 1.0, %v5980_v11  ;;  %5493 = vmatmul.mubr.bf16.vlgmr.msra.gmra.mrb[96].mxu1 %v4233_v54 }
 0x89b   : > { %5496 = vmatprep.mubr.msk.bf16.mxu1 %vm6339_vm0, %v9854_v44  ;;  %5573 = vmatpush3.bf16.msra.mxu1 %v5777_v43 }
 0x89c   : > { %v5982_v42 = vpop.eup %5981  ;;  %5987 = vrcp.f32 %v4184_v46  ;;  %5574 = vmatprep.subr.bf16.mxu1 %v9854_v44 }
 0x89d   : > { %v4217_v19 = vmul.f32 %v5982_v42, %v4063_v38 }
 0x89e   : > { %v5984_v36 = vpop.eup %5983 }
 0x89f   : > { %v4218_v52 = vmul.f32 %v5984_v36, %v4066_v20  ;;  %5575 = vmatpush3.bf16.msra.mxu1 %v5778_v2 }
 0x8a0   : > { %5576 = vmatprep.subr.bf16.mxu1 %v9854_v44 }
 0x8a1   : > { %v4234_v4 = vpack.c.bf16 %v4218_v52, %v4217_v19 }
 0x8a3   : > { %5497 = vmatmul.mubr.bf16.gmra.mrb[100].mxu1 %v4234_v4 }
 0x8a4   : > { %v5986_v0 = vpop.eup %5985  ;;  %5500 = vmatprep.mubr.msk.bf16.mxu1 %vm6339_vm0, %v9854_v44  ;;  %5577 = vmatpush3.bf16.msra.mxu1 %v5779_v33 }
 0x8a5   : > { %v4219_v3 = vmul.f32 %v5986_v0, %v4071_v55  ;;  %5578 = vmatprep.subr.bf16.mxu1 %v9854_v44 }
 0x8a6   : > { %v5988_v60 = vpop.eup %5987 }
 0x8a7   : > { %v4220_v10 = vmul.f32 %v5988_v60, %v4074_v47 }
 0x8a8   : > { %5579 = vmatpush3.bf16.msra.mxu1 %v5780_v18 }
 0x8a9   : > { %v4235_v23 = vpack.c.bf16 %v4220_v10, %v4219_v3 }
 0x8ab   : > { %5501 = vmatmul.mubr.bf16.gmra.mrb[104].mxu1 %v4235_v23 }
 0x8ac   : > { %5504 = vmatprep.mubr.msk.bf16.mxu1 %vm6339_vm0, %v9854_v44 }
 0x8b9   : > { %v4078_v24 = vpop.f32.mrb[96].mxu0 }
 0x8ba   : > { %v4079_v38 = vadd.f32 %v9261_v35, %v4078_v24  ;;  %v5454_v20 = vpop.f32.mrb[97].mxu0 }
 0x8bb   : > { %v4081_v34 = vpop.f32.mrb[98].mxu0 }
 0x8bc   : > { %v4131_v56 = vsub.f32 0.0, %v4079_v38  ;;  %v4082_v53 = vadd.f32 %v9261_v35, %v4081_v34  ;;  %v5455_v28 = vpop.f32.mrb[99].mxu0 }
 0x8be   : > { %v4155_v55 = vmul.f32 1.442695, %v4131_v56  ;;  %v4132_v59 = vsub.f32 0.0, %v4082_v53 }
 0x8c0   : > { %5989 = vpow2.f32 %v4155_v55  ;;  %v4157_v22 = vmul.f32 1.442695, %v4132_v59 }
 0x8c1   : > { %v4086_v40 = vpop.f32.mrb[100].mxu0 }
 0x8c2   : > { %5991 = vpow2.f32 %v4157_v22  ;;  %v4087_v37 = vadd.f32 %v9261_v35, %v4086_v40  ;;  %v5458_v47 = vpop.f32.mrb[101].mxu0  ;;  %v5781_v40 = vld [vmem:[#allocation14] sm:$0xff]  }
 0x8c3   : > { %v4089_v39 = vpop.f32.mrb[102].mxu0  ;;  %5529 = vmatpush3.bf16.msra.mxu0 %v5781_v40  ;;  %v5782_v47 = vld [vmem:[#allocation14 + $0x8] sm:$0xff]  }
 0x8c4   : > { %v4133_v15 = vsub.f32 0.0, %v4087_v37  ;;  %v4090_v49 = vadd.f32 %v9261_v35, %v4089_v39  ;;  %v5459_v14 = vpop.f32.mrb[103].mxu0  ;;  %5530 = vmatprep.subr.bf16.mxu0 %v9854_v44 }
 0x8c6   : > { %v4159_v9 = vmul.f32 1.442695, %v4133_v15  ;;  %v4134_v29 = vsub.f32 0.0, %v4090_v49 }
 0x8c7   : > { %5531 = vmatpush3.bf16.msra.mxu0 %v5782_v47 }
 0x8c8   : > { %5993 = vpow2.f32 %v4159_v9  ;;  %v4161_v27 = vmul.f32 1.442695, %v4134_v29  ;;  %5532 = vmatprep.subr.bf16.mxu0 %v9854_v44 }
 0x8c9   : > { %v4094_v62 = vpop.f32.mrb[104].mxu0 }
 0x8ca   : > { %v5990_v5 = vpop.eup %5989  ;;  %5995 = vpow2.f32 %v4161_v27  ;;  %v4095_v58 = vadd.f32 %v9261_v35, %v4094_v62  ;;  %v5462_v32 = vpop.f32.mrb[105].mxu0 }
 0x8cb   : > { %v4185_v16 = vadd.f32 1.0, %v5990_v5  ;;  %v4097_v25 = vpop.f32.mrb[106].mxu0 }
 0x8cc   : > { %v5992_v54 = vpop.eup %5991  ;;  %v4135_v63 = vsub.f32 0.0, %v4095_v58  ;;  %v4098_v11 = vadd.f32 %v9261_v35, %v4097_v25  ;;  %v5463_v46 = vpop.f32.mrb[107].mxu0 }
 0x8cd   : > { %5997 = vrcp.f32 %v4185_v16  ;;  %v4186_v42 = vadd.f32 1.0, %v5992_v54 }
 0x8ce   : > { %v4163_v36 = vmul.f32 1.442695, %v4135_v63  ;;  %v4136_v19 = vsub.f32 0.0, %v4098_v11 }
 0x8cf   : > { %5999 = vrcp.f32 %v4186_v42 }
 0x8d0   : > { %6001 = vpow2.f32 %v4163_v36  ;;  %v4165_v52 = vmul.f32 1.442695, %v4136_v19 }
 0x8d2   : > { %v5994_v4 = vpop.eup %5993  ;;  %6003 = vpow2.f32 %v4165_v52 }
 0x8d3   : > { %v4187_v0 = vadd.f32 1.0, %v5994_v4 }
 0x8d4   : > { %v5996_v60 = vpop.eup %5995 }
 0x8d5   : > { %6005 = vrcp.f32 %v4187_v0  ;;  %v4188_v3 = vadd.f32 1.0, %v5996_v60 }
 0x8d7   : > { %v5998_v10 = vpop.eup %5997  ;;  %6007 = vrcp.f32 %v4188_v3 }
 0x8d8   : > { %v4221_v24 = vmul.f32 %v5998_v10, %v4079_v38 }
 0x8d9   : > { %v6000_v23 = vpop.eup %5999 }
 0x8da   : > { %v6002_v43 = vpop.eup %6001  ;;  %v4222_v2 = vmul.f32 %v6000_v23, %v4082_v53 }
 0x8db   : > { %v4189_v20 = vadd.f32 1.0, %v6002_v43 }
 0x8dc   : > { %v6004_v34 = vpop.eup %6003  ;;  %v4236_v56 = vpack.c.bf16 %v4222_v2, %v4221_v24 }
 0x8dd   : > { %6009 = vrcp.f32 %v4189_v20  ;;  %v4190_v28 = vadd.f32 1.0, %v6004_v34 }
 0x8de   : > { %5505 = vmatmul.mubr.bf16.gmra.mrb[108].mxu1 %v4236_v56 }
 0x8df   : > { %v6006_v33 = vpop.eup %6005  ;;  %6011 = vrcp.f32 %v4190_v28  ;;  %5508 = vmatprep.mubr.msk.bf16.mxu1 %vm6339_vm0, %v9854_v44 }
 0x8e0   : > { %v4223_v59 = vmul.f32 %v6006_v33, %v4087_v37  ;;  %v5783_v37 = vld [vmem:[#allocation14 + $0x10] sm:$0xff]  }
 0x8e1   : > { %v6008_v55 = vpop.eup %6007  ;;  %5533 = vmatpush3.bf16.msra.mxu0 %v5783_v37 }
 0x8e2   : > { %v4224_v22 = vmul.f32 %v6008_v55, %v4090_v49  ;;  %v5784_v49 = vld [vmem:[#allocation14 + $0x18] sm:$0xff]   ;;  %5534 = vmatprep.subr.bf16.mxu0 %v9854_v44 }
 0x8e4   : > { %v4237_v18 = vpack.c.bf16 %v4224_v22, %v4223_v59 }
 0x8e5   : > { %5535 = vmatpush3.bf16.msra.mxu0 %v5784_v49 }
 0x8e6   : > { %5509 = vmatmul.mubr.bf16.gmra.mrb[112].mxu1 %v4237_v18 }
 0x8e7   : > { %v6010_v38 = vpop.eup %6009  ;;  %5512 = vmatprep.mubr.msk.bf16.mxu1 %vm6339_vm0, %v9854_v44 }
 0x8e8   : > { %v4225_v39 = vmul.f32 %v6010_v38, %v4095_v58 }
 0x8e9   : > { %v6012_v53 = vpop.eup %6011 }
 0x8ea   : > { %v4226_v15 = vmul.f32 %v6012_v53, %v4098_v11 }
 0x8ec   : > { %v4238_v14 = vpack.c.bf16 %v4226_v15, %v4225_v39 }
 0x8ee   : > { %5513 = vmatmul.mubr.bf16.gmra.mrb[116].mxu1 %v4238_v14 }
 0x8ef   : > { %5516 = vmatprep.mubr.msk.bf16.mxu1 %vm6339_vm0, %v9854_v44 }
 0x907   : > { %v4102_v9 = vpop.f32.mrb[108].mxu0 }
 0x908   : > { %v4103_v29 = vadd.f32 %v9261_v35, %v4102_v9  ;;  %v5466_v27 = vpop.f32.mrb[109].mxu0 }
 0x909   : > { %v4105_v62 = vpop.f32.mrb[110].mxu0 }
 0x90a   : > { %v4137_v5 = vsub.f32 0.0, %v4103_v29  ;;  %v4106_v58 = vadd.f32 %v9261_v35, %v4105_v62  ;;  %v5467_v32 = vpop.f32.mrb[111].mxu0 }
 0x90c   : > { %v4167_v16 = vmul.f32 1.442695, %v4137_v5  ;;  %v4138_v25 = vsub.f32 0.0, %v4106_v58 }
 0x90e   : > { %6013 = vpow2.f32 %v4167_v16  ;;  %v4169_v54 = vmul.f32 1.442695, %v4138_v25 }
 0x90f   : > { %v4110_v63 = vpop.f32.mrb[112].mxu0 }
 0x910   : > { %6015 = vpow2.f32 %v4169_v54  ;;  %v4111_v11 = vadd.f32 %v9261_v35, %v4110_v63  ;;  %v5470_v46 = vpop.f32.mrb[113].mxu0 }
 0x911   : > { %v4113_v42 = vpop.f32.mrb[114].mxu0 }
 0x912   : > { %v4139_v36 = vsub.f32 0.0, %v4111_v11  ;;  %v4114_v19 = vadd.f32 %v9261_v35, %v4113_v42  ;;  %v5471_v52 = vpop.f32.mrb[115].mxu0  ;;  %v4436_v42 = vld [vmem:[#allocation2] sm:$0xff] }
 0x913   : > { %v4440_v52 = vld [vmem:[#allocation2 + $0x20] sm:$0xff] }
 0x914   : > { %v4171_v4 = vmul.f32 1.442695, %v4139_v36  ;;  %v4140_v0 = vsub.f32 0.0, %v4114_v19  ;;  %v4438_v36 = vld [vmem:[#allocation2 + $0x10] sm:$0xff] }
 0x916   : > { %6017 = vpow2.f32 %v4171_v4  ;;  %v4173_v60 = vmul.f32 1.442695, %v4140_v0  ;;  %v4441_v4 = vld [vmem:[#allocation2 + $0x28] sm:$0xff]  ;;  %v9323_v0 = vld [vmem:[%s9936_s13] ss:$0 sm:$0xff]  ;;  %s6259_s13 = scalar_lea.vmem %s6258_s18, 4608 }
 0x917   : > { %v4118_v3 = vpop.f32.mrb[116].mxu0  ;;  %p6261_p9 = scmp.lt.s32.totalorder %s6259_s13, %s6253_s28 }
 0x918   : > { %v6014_v10 = vpop.eup %6013  ;;  %6019 = vpow2.f32 %v4173_v60  ;;  %v4119_v23 = vadd.f32 %v9261_v35, %v4118_v3  ;;  %v5474_v43 = vpop.f32.mrb[117].mxu0 }
 0x919   : > { %v4191_v24 = vadd.f32 1.0, %v6014_v10  ;;  %v4121_v2 = vpop.f32.mrb[118].mxu0  ;;  %p6262_p5 = por %p6261_p9, %p6260_p6 }
 0x91a   : > { %v6016_v20 = vpop.eup %6015  ;;  %v4141_v34 = vsub.f32 0.0, %v4119_v23  ;;  %v4122_v56 = vadd.f32 %v9261_v35, %v4121_v2  ;;  %v5475_v28 = vpop.f32.mrb[119].mxu0 }
 0x91b   : > { %6021 = vrcp.f32 %v4191_v24  ;;  %v4192_v33 = vadd.f32 1.0, %v6016_v20  ;;  %p6263_p0 = pnand %p6262_p5, %p6256_p1 }
 0x91c   : > { %v4175_v55 = vmul.f32 1.442695, %v4141_v34  ;;  %v4142_v59 = vsub.f32 0.0, %v4122_v56  ;;  %v4442_v34 = vld [vmem:[#allocation2 + $0x30] sm:$0xff] }
 0x91d   : > { %6023 = vrcp.f32 %v4192_v33 }
 0x91e   : > { %6025 = vpow2.f32 %v4175_v55  ;;  %v4177_v22 = vmul.f32 1.442695, %v4142_v59 }
 0x920   : > { %v6018_v40 = vpop.eup %6017  ;;  %6027 = vpow2.f32 %v4177_v22 }
 0x921   : > { %v4193_v18 = vadd.f32 1.0, %v6018_v40 }
 0x922   : > { %v6020_v47 = vpop.eup %6019 }
 0x923   : > { %6029 = vrcp.f32 %v4193_v18  ;;  %v4194_v38 = vadd.f32 1.0, %v6020_v47  ;;  %v4443_v18 = vld [vmem:[#allocation2 + $0x38] sm:$0xff] }
 0x925   : > { %v6022_v53 = vpop.eup %6021  ;;  %6031 = vrcp.f32 %v4194_v38 }
 0x926   : > { %v4227_v14 = vmul.f32 %v6022_v53, %v4103_v29 }
 0x927   : > { %v6024_v39 = vpop.eup %6023 }
 0x928   : > { %v6026_v15 = vpop.eup %6025  ;;  %v4228_v35 = vmul.f32 %v6024_v39, %v4106_v58 }
 0x929   : > { %v4195_v37 = vadd.f32 1.0, %v6026_v15 }
 0x92a   : > { %v6028_v49 = vpop.eup %6027  ;;  %v4239_v9 = vpack.c.bf16 %v4228_v35, %v4227_v14 }
 0x92b   : > { %6033 = vrcp.f32 %v4195_v37  ;;  %v4196_v27 = vadd.f32 1.0, %v6028_v49  ;;  %v4444_v37 = vld [vmem:[#allocation2 + $0x40] sm:$0xff] }
 0x92c   : > { %5517 = vmatmul.mubr.bf16.gmra.mrb[120].mxu1 %v4239_v9 }
 0x92d   : > { %v6030_v62 = vpop.eup %6029  ;;  %6035 = vrcp.f32 %v4196_v27  ;;  %5520 = vmatprep.mubr.msk.bf16.mxu1 %vm6339_vm0, %v9854_v44 }
 0x92e   : > { %v4229_v32 = vmul.f32 %v6030_v62, %v4111_v11  ;;  %v4437_v11 = vld [vmem:[#allocation2 + $0x8] sm:$0xff] }
 0x92f   : > { %v6032_v5 = vpop.eup %6031 }
 0x930   : > { %v4230_v16 = vmul.f32 %v6032_v5, %v4114_v19  ;;  %v4439_v19 = vld [vmem:[#allocation2 + $0x18] sm:$0xff] }
 0x932   : > { %v4240_v25 = vpack.c.bf16 %v4230_v16, %v4229_v32 }
 0x934   : > { %5521 = vmatmul.mubr.bf16.gmra.mrb[124].mxu1 %v4240_v25 }
 0x935   : > { %v6034_v54 = vpop.eup %6033  ;;  %5524 = vmatprep.mubr.msk.bf16.mxu1 %vm6339_vm0, %v9854_v44 }
 0x936   : > { %v4231_v58 = vmul.f32 %v6034_v54, %v4119_v23 }
 0x937   : > { %v6036_v29 = vpop.eup %6035 }
 0x938   : > { %v4232_v63 = vmul.f32 %v6036_v29, %v4122_v56 }
 0x93a   : > { %v4241_v46 = vpack.c.bf16 %v4232_v63, %v4231_v58 }
 0x93c   : > { %5525 = vmatmul.mubr.bf16.gmra.mrb[128].mxu1 %v4241_v46 }
 0x93d   : > { %5580 = vmatprep.mubr.msk.bf16.mxu1 %vm6339_vm0, %v9854_v44 }
 0x944   : > { %5581 = vmatmul.mubr.msk.bf16.vlgmr.msra.gmra.mrb[132].mxu1 %vm986_vm1, %v4436_v42 }
 0x945   : > { %5584 = vmatprep.mubr.msk.bf16.mxu1 %vm6339_vm0, %v9854_v44 }
 0x94c   : > { %5585 = vmatmul.mubr.msk.bf16.gmra.mrb[136].mxu1 %vm986_vm1, %v4437_v11 }
 0x94d   : > { %5588 = vmatprep.mubr.msk.bf16.mxu1 %vm6339_vm0, %v9854_v44 }
 0x954   : > { %5589 = vmatmul.mubr.msk.bf16.gmra.mrb[140].mxu1 %vm986_vm1, %v4438_v36 }
 0x955   : > { %5592 = vmatprep.mubr.msk.bf16.mxu1 %vm6339_vm0, %v9854_v44 }
 0x95c   : > { %5593 = vmatmul.mubr.msk.bf16.gmra.mrb[144].mxu1 %vm986_vm1, %v4439_v19 }
 0x95d   : > { %5596 = vmatprep.mubr.msk.bf16.mxu1 %vm6339_vm0, %v9854_v44 }
 0x964   : > { %5597 = vmatmul.mubr.msk.bf16.gmra.mrb[148].mxu1 %vm986_vm1, %v4440_v52 }
 0x965   : > { %5600 = vmatprep.mubr.msk.bf16.mxu1 %vm6339_vm0, %v9854_v44 }
 0x96c   : > { %5601 = vmatmul.mubr.msk.bf16.gmra.mrb[152].mxu1 %vm986_vm1, %v4441_v4 }
 0x96d   : > { %v4347_v60 = vpop.f32.mrb[96].mxu1  ;;  %5604 = vmatprep.mubr.msk.bf16.mxu1 %vm6339_vm0, %v9854_v44 }
 0x96e   : > { %v4348_v3 = vadd.f32 %v9323_v0, %v4347_v60  ;;  %v5494_v10 = vpop.f32.mrb[97].mxu1 }
 0x96f   : > { %v4350_v23 = vpop.f32.mrb[98].mxu1 }
 0x970   : > { %v4351_v43 = vadd.f32 %v9323_v0, %v4350_v23  ;;  %v5495_v24 = vpop.f32.mrb[99].mxu1  ;;  %v4418_v2 = vadd.f32 %v4348_v3, %v9129_v51 }
 0x972   : > { %v4419_v20 = vadd.f32 %v4351_v43, %v9131_v8 }
 0x974   : > { %v4453_v56 = vpack.c.bf16 %v4419_v20, %v4418_v2  ;;  %5605 = vmatmul.mubr.msk.bf16.gmra.mrb[156].mxu1 %vm986_vm1, %v4442_v34 }
 0x975   : > { %5608 = vmatprep.mubr.msk.bf16.mxu1 %vm6339_vm0, %v9854_v44 }
 0x976   : > { %5537 = vmatmul.mubr.msk.bf16.vlgmr.msra.gmra.mrb[120].mxu0 %vm986_vm1, %v4453_v56  ;;  %v4355_v28 = vpop.f32.mrb[100].mxu1 }
 0x977   : > { %v4356_v33 = vadd.f32 %v9323_v0, %v4355_v28  ;;  %v5498_v55 = vpop.f32.mrb[101].mxu1  ;;  %5540 = vmatprep.mubr.msk.bf16.mxu0 %vm6339_vm0, %v9854_v44 }
 0x978   : > { %v4358_v59 = vpop.f32.mrb[102].mxu1 }
 0x979   : > { %v4359_v51 = vadd.f32 %v9323_v0, %v4358_v59  ;;  %v5499_v8 = vpop.f32.mrb[103].mxu1  ;;  %v4420_v22 = vadd.f32 %v4356_v33, %v9140_v31 }
 0x97b   : > { %v4421_v40 = vadd.f32 %v4359_v51, %v9142_v30 }
 0x97c   : > { %5609 = vmatmul.mubr.msk.bf16.gmra.mrb[160].mxu1 %vm986_vm1, %v4443_v18 }
 0x97d   : > { %v4454_v47 = vpack.c.bf16 %v4421_v40, %v4420_v22  ;;  %5612 = vmatprep.mubr.msk.bf16.mxu1 %vm6339_vm0, %v9854_v44 }
 0x97e   : > { %v4363_v38 = vpop.f32.mrb[104].mxu1 }
 0x97f   : > { %v4364_v53 = vadd.f32 %v9323_v0, %v4363_v38  ;;  %v5502_v39 = vpop.f32.mrb[105].mxu1  ;;  %5541 = vmatmul.mubr.msk.bf16.gmra.mrb[124].mxu0 %vm986_vm1, %v4454_v47 }
 0x980   : > { %v4366_v15 = vpop.f32.mrb[106].mxu1  ;;  %5544 = vmatprep.mubr.msk.bf16.mxu0 %vm6339_vm0, %v9854_v44 }
 0x981   : > { %v4367_v31 = vadd.f32 %v9323_v0, %v4366_v15  ;;  %v5503_v30 = vpop.f32.mrb[107].mxu1  ;;  %v4422_v14 = vadd.f32 %v4364_v53, %v9151_v41 }
 0x983   : > { %v4423_v35 = vadd.f32 %v4367_v31, %v9153_v57 }
 0x984   : > { %5613 = vmatmul.mubr.msk.bf16.gmra.mrb[164].mxu1 %vm986_vm1, %v4444_v37 }
 0x985   : > { %v4455_v49 = vpack.c.bf16 %v4423_v35, %v4422_v14 }
 0x987   : > { %5545 = vmatmul.mubr.msk.bf16.gmra.mrb[128].mxu0 %vm986_vm1, %v4455_v49 }
 0x988   : > { %5548 = vmatprep.mubr.msk.bf16.mxu0 %vm6339_vm0, %v9854_v44 }
 0x9b1   : > { %v4371_v9 = vpop.f32.mrb[108].mxu1 }
 0x9b2   : > { %v4372_v27 = vadd.f32 %v9323_v0, %v4371_v9  ;;  %v5506_v62 = vpop.f32.mrb[109].mxu1 }
 0x9b3   : > { %v4374_v5 = vpop.f32.mrb[110].mxu1 }
 0x9b4   : > { %v4375_v32 = vadd.f32 %v9323_v0, %v4374_v5  ;;  %v5507_v16 = vpop.f32.mrb[111].mxu1  ;;  %v4424_v41 = vadd.f32 %v4372_v27, %v9162_v50 }
 0x9b6   : > { %v4425_v57 = vadd.f32 %v4375_v32, %v9164_v12 }
 0x9b8   : > { %v4456_v25 = vpack.c.bf16 %v4425_v57, %v4424_v41 }
 0x9b9   : > { %v4379_v54 = vpop.f32.mrb[112].mxu1 }
 0x9ba   : > { %v4380_v29 = vadd.f32 %v9323_v0, %v4379_v54  ;;  %v5510_v58 = vpop.f32.mrb[113].mxu1  ;;  %5549 = vmatmul.mubr.msk.bf16.gmra.mrb[132].mxu0 %vm986_vm1, %v4456_v25 }
 0x9bb   : > { %v4382_v63 = vpop.f32.mrb[114].mxu1  ;;  %5552 = vmatprep.mubr.msk.bf16.mxu0 %vm6339_vm0, %v9854_v44 }
 0x9bc   : > { %v4383_v46 = vadd.f32 %v9323_v0, %v4382_v63  ;;  %v5511_v42 = vpop.f32.mrb[115].mxu1  ;;  %v4426_v11 = vadd.f32 %v4380_v29, %v9173_v13 }
 0x9be   : > { %v4427_v50 = vadd.f32 %v4383_v46, %v9175_v48 }
 0x9c0   : > { %v4457_v36 = vpack.c.bf16 %v4427_v50, %v4426_v11 }
 0x9c1   : > { %v4387_v12 = vpop.f32.mrb[116].mxu1 }
 0x9c2   : > { %v4388_v19 = vadd.f32 %v9323_v0, %v4387_v12  ;;  %v5514_v52 = vpop.f32.mrb[117].mxu1  ;;  %5553 = vmatmul.mubr.msk.bf16.gmra.mrb[136].mxu0 %vm986_vm1, %v4457_v36  ;;  %v9413_v36 = vld [vmem:[%s9937_s22] ss:$0 sm:$0xff] }
 0x9c3   : > { %v4390_v4 = vpop.f32.mrb[118].mxu1  ;;  %5556 = vmatprep.mubr.msk.bf16.mxu0 %vm6339_vm0, %v9854_v44 }
 0x9c4   : > { %v4391_v60 = vadd.f32 %v9323_v0, %v4390_v4  ;;  %v5515_v3 = vpop.f32.mrb[119].mxu1  ;;  %v4428_v10 = vadd.f32 %v4388_v19, %v9184_v26 }
 0x9c6   : > { %v4429_v13 = vadd.f32 %v4391_v60, %v9186_v7 }
 0x9c8   : > { %v4458_v23 = vpack.c.bf16 %v4429_v13, %v4428_v10 }
 0x9ca   : > { %5557 = vmatmul.mubr.msk.bf16.gmra.mrb[140].mxu0 %vm986_vm1, %v4458_v23 }
 0x9cb   : > { %5560 = vmatprep.mubr.msk.bf16.mxu0 %vm6339_vm0, %v9854_v44 }
 0x9ff   : > { %v4395_v48 = vpop.f32.mrb[120].mxu1 }
 0xa00   : > { %v4396_v43 = vadd.f32 %v9323_v0, %v4395_v48  ;;  %v5518_v24 = vpop.f32.mrb[121].mxu1 }
 0xa01   : > { %v4398_v2 = vpop.f32.mrb[122].mxu1 }
 0xa02   : > { %v4399_v20 = vadd.f32 %v9323_v0, %v4398_v2  ;;  %v5519_v34 = vpop.f32.mrb[123].mxu1  ;;  %v4430_v56 = vadd.f32 %v4396_v43, %v9227_v6 }
 0xa04   : > { %v4431_v26 = vadd.f32 %v4399_v20, %v9229_v61 }
 0xa06   : > { %v4459_v28 = vpack.c.bf16 %v4431_v26, %v4430_v56 }
 0xa07   : > { %v4403_v7 = vpop.f32.mrb[124].mxu1 }
 0xa08   : > { %v4404_v33 = vadd.f32 %v9323_v0, %v4403_v7  ;;  %v5522_v55 = vpop.f32.mrb[125].mxu1  ;;  %5561 = vmatmul.mubr.msk.bf16.gmra.mrb[144].mxu0 %vm986_vm1, %v4459_v28 }
 0xa09   : > { %v4406_v59 = vpop.f32.mrb[126].mxu1  ;;  %5564 = vmatprep.mubr.msk.bf16.mxu0 %vm6339_vm0, %v9854_v44 }
 0xa0a   : > { %v4407_v51 = vadd.f32 %v9323_v0, %v4406_v59  ;;  %v5523_v8 = vpop.f32.mrb[127].mxu1  ;;  %v4432_v22 = vadd.f32 %v4404_v33, %v9238_v21 }
 0xa0c   : > { %v4433_v6 = vadd.f32 %v4407_v51, %v9240_v45 }
 0xa0e   : > { %v4460_v40 = vpack.c.bf16 %v4433_v6, %v4432_v22 }
 0xa0f   : > { %v4411_v61 = vpop.f32.mrb[128].mxu1 }
 0xa10   : > { %v4412_v18 = vadd.f32 %v9323_v0, %v4411_v61  ;;  %v5526_v47 = vpop.f32.mrb[129].mxu1  ;;  %5565 = vmatmul.mubr.msk.bf16.gmra.mrb[148].mxu0 %vm986_vm1, %v4460_v40 }
 0xa11   : > { %v4414_v38 = vpop.f32.mrb[130].mxu1  ;;  %5568 = vmatprep.mubr.msk.bf16.mxu0 %vm6339_vm0, %v9854_v44 }
 0xa12   : > { %v4415_v53 = vadd.f32 %v9323_v0, %v4414_v38  ;;  %v5527_v39 = vpop.f32.mrb[131].mxu1  ;;  %v4434_v15 = vadd.f32 %v4412_v18, %v9249_v17 }
 0xa14   : > { %v4435_v21 = vadd.f32 %v4415_v53, %v9251_v1 }
 0xa16   : > { %v4461_v31 = vpack.c.bf16 %v4435_v21, %v4434_v15 }
 0xa17   : > { %v4711_v45 = vpop.f32.mrb[132].mxu1 }
 0xa18   : > { %5569 = vmatmul.mubr.msk.bf16.gmra.mrb[152].mxu0 %vm986_vm1, %v4461_v31  ;;  %v5582_v30 = vpop.f32.mrb[133].mxu1 }
 0xa19   : > { %v4714_v14 = vpop.f32.mrb[134].mxu1 }
 0xa1a   : > { %v5583_v35 = vpop.f32.mrb[135].mxu1 }
 0xa1f   : > { %v4719_v37 = vpop.f32.mrb[136].mxu1 }
 0xa20   : > { %v5586_v49 = vpop.f32.mrb[137].mxu1 }
 0xa21   : > { %v4722_v9 = vpop.f32.mrb[138].mxu1 }
 0xa22   : > { %v5587_v27 = vpop.f32.mrb[139].mxu1 }
 0xa27   : > { %v4727_v62 = vpop.f32.mrb[140].mxu1 }
 0xa28   : > { %v5590_v44 = vpop.f32.mrb[141].mxu1 }
 0xa29   : > { %v4730_v5 = vpop.f32.mrb[142].mxu1 }
 0xa2a   : > { %v5591_v0 = vpop.f32.mrb[143].mxu1 }
 0xa2f   : > { %v9396_v32 = vpop.f32.mrb[144].mxu1 }
 0xa30   : > { %v5594_v17 = vpop.f32.mrb[145].mxu1 }
 0xa31   : > { %v9398_v16 = vpop.f32.mrb[146].mxu1 }
 0xa32   : > { %v5595_v1 = vpop.f32.mrb[147].mxu1 }
 0xa37   : > { %v9400_v41 = vpop.f32.mrb[148].mxu1 }
 0xa38   : > { %v5598_v57 = vpop.f32.mrb[149].mxu1 }
 0xa39   : > { %v9402_v25 = vpop.f32.mrb[150].mxu1 }
 0xa3a   : > { %v5599_v54 = vpop.f32.mrb[151].mxu1 }
 0xa3f   : > { %v9404_v29 = vpop.f32.mrb[152].mxu1 }
 0xa40   : > { %v5602_v58 = vpop.f32.mrb[153].mxu1 }
 0xa41   : > { %v9406_v63 = vpop.f32.mrb[154].mxu1 }
 0xa42   : > { %v5603_v46 = vpop.f32.mrb[155].mxu1 }
 0xa47   : > { %v9408_v42 = vpop.f32.mrb[156].mxu1 }
 0xa48   : > { %v5606_v11 = vpop.f32.mrb[157].mxu1 }
 0xa49   : > { %v4555_v50 = vpop.f32.mrb[120].mxu0  ;;  %v9415_v12 = vpop.f32.mrb[158].mxu1 }
 0xa4a   : > { %v4712_v19 = vadd.f32 %v4711_v45, %v4555_v50  ;;  %v5538_v52 = vpop.f32.mrb[121].mxu0  ;;  %v5607_v4 = vpop.f32.mrb[159].mxu1 }
 0xa4b   : > { %v4558_v60 = vpop.f32.mrb[122].mxu0 }
 0xa4c   : > { %v4789_v3 = vadd.f32 %v9413_v36, %v4712_v19  ;;  %v4715_v10 = vadd.f32 %v4714_v14, %v4558_v60  ;;  %v5539_v13 = vpop.f32.mrb[123].mxu0 }
 0xa4e   : > { %v4807_v23 = vsub.f32 0.0, %v4789_v3  ;;  %v4790_v48 = vadd.f32 %v9413_v36, %v4715_v10 }
 0xa4f   : > { %v9419_v43 = vpop.f32.mrb[160].mxu1 }
 0xa50   : > { %v4825_v24 = vmul.f32 1.442695, %v4807_v23  ;;  %v4808_v2 = vsub.f32 0.0, %v4790_v48  ;;  %v5610_v20 = vpop.f32.mrb[161].mxu1 }
 0xa51   : > { %v9421_v34 = vpop.f32.mrb[162].mxu1 }
 0xa52   : > { %6037 = vpow2.f32 %v4825_v24  ;;  %v4827_v56 = vmul.f32 1.442695, %v4808_v2  ;;  %v5611_v26 = vpop.f32.mrb[163].mxu1  ;;  %v4563_v28 = vpop.f32.mrb[124].mxu0 }
 0xa53   : > { %v4720_v7 = vadd.f32 %v4719_v37, %v4563_v28  ;;  %v5542_v33 = vpop.f32.mrb[125].mxu0 }
 0xa54   : > { %6039 = vpow2.f32 %v4827_v56  ;;  %v4566_v55 = vpop.f32.mrb[126].mxu0 }
 0xa55   : > { %v4791_v59 = vadd.f32 %v9413_v36, %v4720_v7  ;;  %v4723_v51 = vadd.f32 %v4722_v9, %v4566_v55  ;;  %v5543_v8 = vpop.f32.mrb[127].mxu0 }
 0xa57   : > { %v4809_v22 = vsub.f32 0.0, %v4791_v59  ;;  %v4792_v6 = vadd.f32 %v9413_v36, %v4723_v51  ;;  %v9425_v40 = vpop.f32.mrb[164].mxu1 }
 0xa58   : > { %v5614_v61 = vpop.f32.mrb[165].mxu1 }
 0xa59   : > { %v4829_v18 = vmul.f32 1.442695, %v4809_v22  ;;  %v4810_v47 = vsub.f32 0.0, %v4792_v6  ;;  %v9427_v38 = vpop.f32.mrb[166].mxu1 }
 0xa5a   : > { %v5615_v53 = vpop.f32.mrb[167].mxu1  ;;  %v4571_v39 = vpop.f32.mrb[128].mxu0 }
 0xa5b   : > { %6041 = vpow2.f32 %v4829_v18  ;;  %v4831_v15 = vmul.f32 1.442695, %v4810_v47  ;;  %v4728_v21 = vadd.f32 %v4727_v62, %v4571_v39  ;;  %v5546_v31 = vpop.f32.mrb[129].mxu0 }
 0xa5c   : > { %v6038_v45 = vpop.eup %6037  ;;  %v4574_v30 = vpop.f32.mrb[130].mxu0 }
 0xa5d   : > { %v4861_v14 = vadd.f32 1.0, %v6038_v45  ;;  %6043 = vpow2.f32 %v4831_v15  ;;  %v4793_v35 = vadd.f32 %v9413_v36, %v4728_v21  ;;  %v4731_v37 = vadd.f32 %v4730_v5, %v4574_v30  ;;  %v5547_v49 = vpop.f32.mrb[131].mxu0 }
 0xa5e   : > { %v6040_v9 = vpop.eup %6039 }
 0xa5f   : > { %6045 = vrcp.f32 %v4861_v14  ;;  %v4862_v27 = vadd.f32 1.0, %v6040_v9  ;;  %v4811_v44 = vsub.f32 0.0, %v4793_v35  ;;  %v4794_v0 = vadd.f32 %v9413_v36, %v4731_v37 }
 0xa61   : > { %6047 = vrcp.f32 %v4862_v27  ;;  %v4833_v17 = vmul.f32 1.442695, %v4811_v44  ;;  %v4812_v62 = vsub.f32 0.0, %v4794_v0 }
 0xa63   : > { %6049 = vpow2.f32 %v4833_v17  ;;  %v4835_v1 = vmul.f32 1.442695, %v4812_v62 }
 0xa65   : > { %v6042_v57 = vpop.eup %6041  ;;  %6051 = vpow2.f32 %v4835_v1 }
 0xa66   : > { %v4863_v54 = vadd.f32 1.0, %v6042_v57 }
 0xa67   : > { %v6044_v58 = vpop.eup %6043 }
 0xa68   : > { %6053 = vrcp.f32 %v4863_v54  ;;  %v4864_v5 = vadd.f32 1.0, %v6044_v58 }
 0xa69   : > { %v6046_v46 = vpop.eup %6045 }
 0xa6a   : > { %v4897_v11 = vmul.f32 %v6046_v46, %v4789_v3  ;;  %6055 = vrcp.f32 %v4864_v5 }
 0xa6b   : > { %v6048_v50 = vpop.eup %6047 }
 0xa6c   : > { %4915 = vst [vmem:[%s9434_s23] sm:$0xff] %v4897_v11  ;;  %v4898_v19 = vmul.f32 %v6048_v50, %v4790_v48 }
 0xa6d   : > { %v6050_v52 = vpop.eup %6049 }
 0xa6e   : > { %4916 = vst [vmem:[%s9434_s23 + $0x8] sm:$0xff] %v4898_v19  ;;  %v4865_v4 = vadd.f32 1.0, %v6050_v52 }
 0xa6f   : > { %v6052_v60 = vpop.eup %6051 }
 0xa70   : > { %6057 = vrcp.f32 %v4865_v4  ;;  %v4866_v10 = vadd.f32 1.0, %v6052_v60 }
 0xa72   : > { %v6054_v13 = vpop.eup %6053  ;;  %6059 = vrcp.f32 %v4866_v10 }
 0xa73   : > { %v4899_v3 = vmul.f32 %v6054_v13, %v4791_v59 }
 0xa74   : > { %v6056_v23 = vpop.eup %6055 }
 0xa75   : > { %4917 = vst [vmem:[%s9434_s23 + $0x10] sm:$0xff] %v4899_v3  ;;  %v4900_v24 = vmul.f32 %v6056_v23, %v4792_v6 }
 0xa77   : > { %4918 = vst [vmem:[%s9434_s23 + $0x18] sm:$0xff] %v4900_v24 }
 0xa7a   : > { %v6058_v2 = vpop.eup %6057 }
 0xa7b   : > { %v4901_v20 = vmul.f32 %v6058_v2, %v4793_v35 }
 0xa7c   : > { %v6060_v56 = vpop.eup %6059 }
 0xa7d   : > { %4919 = vst [vmem:[%s9434_s23 + $0x20] sm:$0xff] %v4901_v20  ;;  %v4902_v48 = vmul.f32 %v6060_v56, %v4794_v0 }
 0xa7f   : > { %4920 = vst [vmem:[%s9434_s23 + $0x28] sm:$0xff] %v4902_v48 }
 0xa8d   : > { %v4579_v26 = vpop.f32.mrb[132].mxu0 }
 0xa8e   : > { %v4736_v28 = vadd.f32 %v9396_v32, %v4579_v26  ;;  %v5550_v7 = vpop.f32.mrb[133].mxu0 }
 0xa8f   : > { %v4582_v33 = vpop.f32.mrb[134].mxu0 }
 0xa90   : > { %v4795_v55 = vadd.f32 %v9413_v36, %v4736_v28  ;;  %v4739_v51 = vadd.f32 %v9398_v16, %v4582_v33  ;;  %v5551_v59 = vpop.f32.mrb[135].mxu0 }
 0xa92   : > { %v4813_v8 = vsub.f32 0.0, %v4795_v55  ;;  %v4796_v22 = vadd.f32 %v9413_v36, %v4739_v51 }
 0xa94   : > { %v4837_v6 = vmul.f32 1.442695, %v4813_v8  ;;  %v4814_v61 = vsub.f32 0.0, %v4796_v22 }
 0xa95   : > { %v4587_v18 = vpop.f32.mrb[136].mxu0 }
 0xa96   : > { %6061 = vpow2.f32 %v4837_v6  ;;  %v4839_v47 = vmul.f32 1.442695, %v4814_v61  ;;  %v4744_v53 = vadd.f32 %v9400_v41, %v4587_v18  ;;  %v5554_v39 = vpop.f32.mrb[137].mxu0 }
 0xa97   : > { %v4590_v15 = vpop.f32.mrb[138].mxu0 }
 0xa98   : > { %6063 = vpow2.f32 %v4839_v47  ;;  %v4797_v32 = vadd.f32 %v9413_v36, %v4744_v53  ;;  %v4747_v21 = vadd.f32 %v9402_v25, %v4590_v15  ;;  %v5555_v31 = vpop.f32.mrb[139].mxu0 }
 0xa9a   : > { %v4815_v16 = vsub.f32 0.0, %v4797_v32  ;;  %v4798_v45 = vadd.f32 %v9413_v36, %v4747_v21 }
 0xa9c   : > { %v4841_v30 = vmul.f32 1.442695, %v4815_v16  ;;  %v4816_v14 = vsub.f32 0.0, %v4798_v45 }
 0xa9d   : > { %v4595_v35 = vpop.f32.mrb[140].mxu0 }
 0xa9e   : > { %6065 = vpow2.f32 %v4841_v30  ;;  %v4843_v37 = vmul.f32 1.442695, %v4816_v14  ;;  %v4752_v49 = vadd.f32 %v9404_v29, %v4595_v35  ;;  %v5558_v9 = vpop.f32.mrb[141].mxu0 }
 0xa9f   : > { %v4598_v41 = vpop.f32.mrb[142].mxu0 }
 0xaa0   : > { %v6062_v27 = vpop.eup %6061  ;;  %6067 = vpow2.f32 %v4843_v37  ;;  %v4799_v44 = vadd.f32 %v9413_v36, %v4752_v49  ;;  %v4755_v0 = vadd.f32 %v9406_v63, %v4598_v41  ;;  %v5559_v25 = vpop.f32.mrb[143].mxu0 }
 0xaa1   : > { %v4867_v17 = vadd.f32 1.0, %v6062_v27 }
 0xaa2   : > { %v6064_v62 = vpop.eup %6063  ;;  %v4817_v1 = vsub.f32 0.0, %v4799_v44  ;;  %v4800_v57 = vadd.f32 %v9413_v36, %v4755_v0 }
 0xaa3   : > { %6069 = vrcp.f32 %v4867_v17  ;;  %v4868_v54 = vadd.f32 1.0, %v6064_v62 }
 0xaa4   : > { %v4845_v58 = vmul.f32 1.442695, %v4817_v1  ;;  %v4818_v5 = vsub.f32 0.0, %v4800_v57 }
 0xaa5   : > { %6071 = vrcp.f32 %v4868_v54 }
 0xaa6   : > { %6073 = vpow2.f32 %v4845_v58  ;;  %v4847_v29 = vmul.f32 1.442695, %v4818_v5 }
 0xaa8   : > { %v6066_v46 = vpop.eup %6065  ;;  %6075 = vpow2.f32 %v4847_v29 }
 0xaa9   : > { %v4869_v11 = vadd.f32 1.0, %v6066_v46 }
 0xaaa   : > { %v6068_v50 = vpop.eup %6067 }
 0xaab   : > { %6077 = vrcp.f32 %v4869_v11  ;;  %v4870_v63 = vadd.f32 1.0, %v6068_v50 }
 0xaad   : > { %v6070_v19 = vpop.eup %6069  ;;  %6079 = vrcp.f32 %v4870_v63 }
 0xaae   : > { %v4903_v52 = vmul.f32 %v6070_v19, %v4795_v55 }
 0xaaf   : > { %v6072_v4 = vpop.eup %6071 }
 0xab0   : > { %v6074_v60 = vpop.eup %6073  ;;  %4921 = vst [vmem:[%s9434_s23 + $0x30] sm:$0xff] %v4903_v52  ;;  %v4904_v10 = vmul.f32 %v6072_v4, %v4796_v22 }
 0xab1   : > { %v4871_v13 = vadd.f32 1.0, %v6074_v60 }
 0xab2   : > { %v6076_v3 = vpop.eup %6075  ;;  %4922 = vst [vmem:[%s9434_s23 + $0x38] sm:$0xff] %v4904_v10 }
 0xab3   : > { %6081 = vrcp.f32 %v4871_v13  ;;  %v4872_v23 = vadd.f32 1.0, %v6076_v3 }
 0xab5   : > { %v6078_v24 = vpop.eup %6077  ;;  %6083 = vrcp.f32 %v4872_v23 }
 0xab6   : > { %v4905_v2 = vmul.f32 %v6078_v24, %v4797_v32 }
 0xab7   : > { %v6080_v20 = vpop.eup %6079 }
 0xab8   : > { %4923 = vst [vmem:[%s9434_s23 + $0x40] sm:$0xff] %v4905_v2  ;;  %v4906_v56 = vmul.f32 %v6080_v20, %v4798_v45 }
 0xaba   : > { %4924 = vst [vmem:[%s9434_s23 + $0x48] sm:$0xff] %v4906_v56 }
 0xabd   : > { %v6082_v48 = vpop.eup %6081 }
 0xabe   : > { %v4907_v26 = vmul.f32 %v6082_v48, %v4799_v44 }
 0xabf   : > { %v6084_v28 = vpop.eup %6083 }
 0xac0   : > { %4925 = vst [vmem:[%s9434_s23 + $0x50] sm:$0xff] %v4907_v26  ;;  %v4908_v7 = vmul.f32 %v6084_v28, %v4800_v57 }
 0xac2   : > { %4926 = vst [vmem:[%s9434_s23 + $0x58] sm:$0xff] %v4908_v7 }
 0xadb   : > { %v4603_v33 = vpop.f32.mrb[144].mxu0 }
 0xadc   : > { %v4760_v55 = vadd.f32 %v9408_v42, %v4603_v33  ;;  %v5562_v51 = vpop.f32.mrb[145].mxu0 }
 0xadd   : > { %v4606_v59 = vpop.f32.mrb[146].mxu0 }
 0xade   : > { %v4801_v8 = vadd.f32 %v9413_v36, %v4760_v55  ;;  %v4763_v22 = vadd.f32 %v9415_v12, %v4606_v59  ;;  %v5563_v6 = vpop.f32.mrb[147].mxu0 }
 0xae0   : > { %v4819_v61 = vsub.f32 0.0, %v4801_v8  ;;  %v4802_v18 = vadd.f32 %v9413_v36, %v4763_v22 }
 0xae2   : > { %v4849_v47 = vmul.f32 1.442695, %v4819_v61  ;;  %v4820_v53 = vsub.f32 0.0, %v4802_v18 }
 0xae3   : > { %v4611_v39 = vpop.f32.mrb[148].mxu0 }
 0xae4   : > { %6085 = vpow2.f32 %v4849_v47  ;;  %v4851_v15 = vmul.f32 1.442695, %v4820_v53  ;;  %v4768_v32 = vadd.f32 %v9419_v43, %v4611_v39  ;;  %v5566_v21 = vpop.f32.mrb[149].mxu0 }
 0xae5   : > { %v4614_v31 = vpop.f32.mrb[150].mxu0 }
 0xae6   : > { %6087 = vpow2.f32 %v4851_v15  ;;  %v4803_v42 = vadd.f32 %v9413_v36, %v4768_v32  ;;  %v4771_v16 = vadd.f32 %v9421_v34, %v4614_v31  ;;  %v5567_v45 = vpop.f32.mrb[151].mxu0 }
 0xae8   : > { %v4821_v12 = vsub.f32 0.0, %v4803_v42  ;;  %v4804_v30 = vadd.f32 %v9413_v36, %v4771_v16 }
 0xaea   : > { %v4853_v14 = vmul.f32 1.442695, %v4821_v12  ;;  %v4822_v35 = vsub.f32 0.0, %v4804_v30 }
 0xaeb   : > { %v4619_v37 = vpop.f32.mrb[152].mxu0 }
 0xaec   : > { %6089 = vpow2.f32 %v4853_v14  ;;  %v4855_v49 = vmul.f32 1.442695, %v4822_v35  ;;  %v4776_v9 = vadd.f32 %v9425_v40, %v4619_v37  ;;  %v5570_v41 = vpop.f32.mrb[153].mxu0 }
 0xaed   : > { %v4622_v43 = vpop.f32.mrb[154].mxu0 }
 0xaee   : > { %v6086_v27 = vpop.eup %6085  ;;  %6091 = vpow2.f32 %v4855_v49  ;;  %v4805_v44 = vadd.f32 %v9413_v36, %v4776_v9  ;;  %v4779_v0 = vadd.f32 %v9427_v38, %v4622_v43  ;;  %v5571_v34 = vpop.f32.mrb[155].mxu0 }
 0xaef   : > { %v4873_v25 = vadd.f32 1.0, %v6086_v27 }
 0xaf0   : > { %v6088_v17 = vpop.eup %6087  ;;  %v4823_v62 = vsub.f32 0.0, %v4805_v44  ;;  %v4806_v1 = vadd.f32 %v9413_v36, %v4779_v0 }
 0xaf1   : > { %6093 = vrcp.f32 %v4873_v25  ;;  %v4874_v57 = vadd.f32 1.0, %v6088_v17 }
 0xaf2   : > { %v4857_v54 = vmul.f32 1.442695, %v4823_v62  ;;  %v4824_v58 = vsub.f32 0.0, %v4806_v1 }
 0xaf3   : > { %6095 = vrcp.f32 %v4874_v57 }
 0xaf4   : > { %6097 = vpow2.f32 %v4857_v54  ;;  %v4859_v40 = vmul.f32 1.442695, %v4824_v58 }
 0xaf6   : > { %v6090_v5 = vpop.eup %6089  ;;  %6099 = vpow2.f32 %v4859_v40 }
 0xaf7   : > { %v4875_v29 = vadd.f32 1.0, %v6090_v5 }
 0xaf8   : > { %v6092_v46 = vpop.eup %6091 }
 0xaf9   : > { %6101 = vrcp.f32 %v4875_v29  ;;  %v4876_v38 = vadd.f32 1.0, %v6092_v46 }
 0xafb   : > { %v6094_v11 = vpop.eup %6093  ;;  %6103 = vrcp.f32 %v4876_v38 }
 0xafc   : > { %v4909_v50 = vmul.f32 %v6094_v11, %v4801_v8 }
 0xafd   : > { %v6096_v36 = vpop.eup %6095 }
 0xafe   : > { %v6098_v63 = vpop.eup %6097  ;;  %4927 = vst [vmem:[%s9434_s23 + $0x60] sm:$0xff] %v4909_v50  ;;  %v4910_v19 = vmul.f32 %v6096_v36, %v4802_v18 }
 0xaff   : > { %v4877_v52 = vadd.f32 1.0, %v6098_v63 }
 0xb00   : > { %v6100_v4 = vpop.eup %6099  ;;  %4928 = vst [vmem:[%s9434_s23 + $0x68] sm:$0xff] %v4910_v19 }
 0xb01   : > { %6105 = vrcp.f32 %v4877_v52  ;;  %v4878_v60 = vadd.f32 1.0, %v6100_v4 }
 0xb03   : > { %v6102_v10 = vpop.eup %6101  ;;  %6107 = vrcp.f32 %v4878_v60 }
 0xb04   : > { %v4911_v13 = vmul.f32 %v6102_v10, %v4803_v42 }
 0xb05   : > { %v6104_v3 = vpop.eup %6103 }
 0xb06   : > { %4929 = vst [vmem:[%s9434_s23 + $0x70] sm:$0xff] %v4911_v13  ;;  %v4912_v23 = vmul.f32 %v6104_v3, %v4804_v30 }
 0xb08   : > { %4930 = vst [vmem:[%s9434_s23 + $0x78] sm:$0xff] %v4912_v23 }
 0xb0b   : > { %v6106_v24 = vpop.eup %6105 }
 0xb0c   : > { %v4913_v2 = vmul.f32 %v6106_v24, %v4805_v44 }
 0xb0d   : > { %v6108_v20 = vpop.eup %6107 }
 0xb0e   : > { %4931 = vst [vmem:[%s9434_s23 + $0x80] sm:$0xff] %v4913_v2  ;;  %v4914_v56 = vmul.f32 %v6108_v20, %v4806_v1 }
 0xb10   : > { %4932 = vst [vmem:[%s9434_s23 + $0x88] sm:$0xff] %v4914_v56 }
 0xb11   : > { %6266 = shalt.err (!%p6263_p0)
}
 0xb12   : > { %s6267_s16 = scalar_lea.hbm %s9484_s1, 2304  ;;  %s6271_s19 = scalar_lea.hbm %s9940_s0, 4608 }
 0xb13   : > { %p6268_p10 = scmp.ne.s32.totalorder %s9484_s1, %s6267_s16  ;;  %p6272_p4 = scmp.lt.u32.totalorder %s9484_s1, %s9940_s0 }
 0xb14   : > { %p6273_p12 = scmp.lt.u32.totalorder %s6271_s19, %s6267_s16  ;;  %p6275_p8 = scmp.lt.u32.totalorder %s6267_s16, %s9484_s1 }
 0xb15   : > { %p6269_p2 = pnand %p6268_p10, %p9941_p11 }
 0xb16   : > { %p6274_p7 = por %p6273_p12, %p6272_p4 }
 0xb17   : > { %p6270_p3 = pneg %p6269_p2 }
 0xb18   : > { %p6276_p13 = por %p6275_p8, %p6274_p7 }
 0xb1a   : > { %p6277_p1 = pnand %p6276_p13, %p6270_p3 }
 0xb1c   : > { %6280 = shalt.err (!%p6277_p1)
}
 0xb1d   : > { %s6344_s23 = smov 128   ;;  %s6345_s29 = smov 8  }
 0xb1e   : > { %5647 = dma.vmem_to_hbm [thread:$0]  (%p9941_p11), %s9478_s30, 2304, %s9484_s1, %s9489_s8, %s6344_s23, %s6344_s23, %s6345_s29  }
 0xb1f PF: > { %s9942_s26 = sld [smem:[#allocation23_spill]]  ;;  %s9943_s27 = sld [smem:[#allocation20_spill]] }
 0xb20   : > { %s9944_s28 = sld [smem:[#allocation27_spill]] }
 0xb25   : > { %p5679_p6 = scmp.ge.s32.totalorder %s9942_s26, 2  ;;  %s4962_s14 = sand.u32 1, %s9943_s27  }
 0xb26   : > { %p9945_p9 = scmp.ne.s32.totalorder %s9944_s28, 0  ;;  %s4963_s18 = scalar_lea.sflag [#allocation8], %s4962_s14 }
 0xb28   : > { %p5666_p5 = pnand %p5679_p6, %p9945_p9 }
 0xb2a   : > { %6310 = dma.done.wait (!%p5666_p5), %s4963_s18, 2304  }
 0xb2b   : > { %6312 = vsyncadd (!%p5666_p5), %s4963_s18, 4294964992  ;;  %s9946_s27 = sld [smem:[#allocation24_spill]]  ;;  %s9947_s24 = sld [smem:[#allocation21_spill]] }
 0xb2c   : > { %s9948_s25 = sld [smem:[#allocation22_spill]]  ;;  %s9949_s26 = sld [smem:[#allocation25_spill]] }
 0xb31   : > { %p30_p0 = scmp.ge.s32.totalorder %s9946_s27, 4  }
 0xb33   :  { %32 = sbr.rel (!%p30_p0) target bundleno = 14 (0xe), region = 144 }
 0xb3a   :  { %4968 = vsyncpa [#allocation7], 1 }
 0xb3b   :  { %4970 = vsyncpa [#allocation7 + $0x1], 1 }
 0xb3c   :  { %4971 = vsyncpa [#allocation10], 1 }
 0xb3d   :  { %4972 = vsyncpa [#allocation13], 1 }
 0xb3e   :  { %4973 = vsyncpa [#allocation8], 1 }
 0xb3f   :  { %4975 = vsyncpa [#allocation8 + $0x1], 1 }

</bundles_post_ra>
